<compile_context>
chip_gen: v7x
topology: tpu7x:2x2x1
jax: 0.10.0
libtpu: 0.0.40
codegen_flags: <defaults>
</compile_context>

<pallas_src>
import functools

import jax
import jax.numpy as jnp
from jax import lax
from jax.experimental import pallas as pl
from jax.experimental.pallas import tpu as pltpu

_LN_EPS = 1e-5


# ---------------------------------------------------------------------------
# Kernel 1: fused LayerNorm + multi-head self-attention (Attention, sr_ratio==1)
#   out = v_cat + softmax(q k^T * scale) @ v @ Wproj + bproj,   q/k/v from LN(x)
# ---------------------------------------------------------------------------
def _ln_mha_kernel(x_ref, g_ref, beta_ref, wqk_ref, wvf_ref, wo_ref, bo_ref,
                   o_ref, *, num_heads, mxu_dtype, approx_recip):
    bb, n_tok, c_in = x_ref.shape
    hd = wo_ref.shape[1]
    d_out = wo_ref.shape[-1]
    m = bb * n_tok

    # --- fused LayerNorm (f32 on the VPU); fold (batch_block, tokens) -> sublanes ---
    x = x_ref[...].astype(jnp.float32).reshape(m, c_in)
    mu = jnp.mean(x, axis=-1, keepdims=True)
    xc = x - mu
    var = jnp.mean(xc * xc, axis=-1, keepdims=True)
    xn32 = xc * lax.rsqrt(var + _LN_EPS) * g_ref[...] + beta_ref[...]
    xn = xn32.astype(mxu_dtype)                       # MXU inputs (bf16 in perf mode)

    # --- single lane-dense v projection: feeds BOTH the "+ v" residual and the
    #     per-head attention values (per-head v = static lane slice).  No second
    #     v matmul, no head concat. ---
    vflat = jnp.dot(xn, wvf_ref[...], preferred_element_type=jnp.float32)  # (M, D) f32
    acc = bo_ref[...] + vflat                                              # (M, D) f32

    # --- per-head attention; heads indexed on the leading weight axis (free view).
    #     Per-head output is accumulated into `acc` via its proj slice: only ONE
    #     head's (N, N) score tile is live at a time.  H is small -> static unroll
    #     (LLO-visible). ---
    for h in range(num_heads):
        qk = jnp.dot(xn, wqk_ref[h], preferred_element_type=jnp.float32)   # (M, 2*hd)
        q3 = qk[:, :hd].reshape(bb, n_tok, hd).astype(mxu_dtype)   # q-scale folded in
        k3 = qk[:, hd:].reshape(bb, n_tok, hd).astype(mxu_dtype)
        v3 = vflat[:, h * hd:(h + 1) * hd].reshape(bb, n_tok, hd).astype(mxu_dtype)

        s = jnp.einsum("bqd,bkd->bqk", q3, k3,
                       preferred_element_type=jnp.float32)                 # (bb,N,N) f32
        smax = jnp.max(s, axis=-1, keepdims=True)
        p = jnp.exp(s - smax)                                              # EUP
        denom = jnp.sum(p, axis=-1, keepdims=True)
        p = p * pl.reciprocal(denom, approx=approx_recip)                  # EUP vrcp
        oh = jnp.einsum("bqk,bkd->bqd", p.astype(mxu_dtype), v3,
                        preferred_element_type=jnp.float32)                # (bb,N,hd)
        acc = acc + jnp.dot(oh.reshape(m, hd).astype(mxu_dtype), wo_ref[h],
                            preferred_element_type=jnp.float32)            # (M, D)

    o_ref[...] = acc.reshape(bb, n_tok, d_out).astype(o_ref.dtype)


def ln_mha(x, p, *, num_heads, batch_block=None, mxu_dtype=jnp.bfloat16):
    """LayerNorm + Attention on a (B, N, C) token tensor -> (B, N, in_dim)."""
    B, N, C = x.shape
    H = num_heads
    hd = p["wo"].shape[1]
    D = H * hd
    if batch_block is None:
        # multi-batch block per step, but keep grid extent >= 2 (megacore sharding).
        batch_block = B // 2 if (B % 2 == 0 and B >= 2) else B
    assert B % batch_block == 0
    grid = (B // batch_block,)

    M = B * N
    flops = 2 * M * (3 * C * D + 2 * N * D + D * D)
    transcendentals = B * H * N * N
    operands = (x, p["ln_g"], p["ln_b"], p["wqk"], p["wv_flat"], p["wo"], p["bo"])
    bytes_accessed = int(sum(int(a.size) * a.dtype.itemsize for a in operands)
                         + M * D * 4)

    kernel = functools.partial(
        _ln_mha_kernel, num_heads=H, mxu_dtype=mxu_dtype,
        approx_recip=(mxu_dtype != jnp.float32))

    return pl.pallas_call(
        kernel,
        out_shape=jax.ShapeDtypeStruct((B, N, D), jnp.float32),
        grid_spec=pltpu.PrefetchScalarGridSpec(
            num_scalar_prefetch=0,
            grid=grid,
            in_specs=[
                pl.BlockSpec((batch_block, N, C), lambda i: (i, 0, 0)),
                pl.BlockSpec((1, C), lambda i: (0, 0)),
                pl.BlockSpec((1, C), lambda i: (0, 0)),
                pl.BlockSpec((H, C, 2 * hd), lambda i: (0, 0, 0)),
                pl.BlockSpec((C, D), lambda i: (0, 0)),
                pl.BlockSpec((H, hd, D), lambda i: (0, 0, 0)),
                pl.BlockSpec((1, D), lambda i: (0, 0)),
            ],
            out_specs=pl.BlockSpec((batch_block, N, D), lambda i: (i, 0, 0)),
        ),
        compiler_params=pltpu.CompilerParams(
            dimension_semantics=("parallel",),
            vmem_limit_bytes=48 * 1024 * 1024),
        cost_estimate=pl.CostEstimate(flops=flops,
                                      transcendentals=transcendentals,
                                      bytes_accessed=bytes_accessed),
    )(*operands)


# ---------------------------------------------------------------------------
# Kernel 2: fused LayerNorm + Mlp + residual:  out = y + fc2(relu(fc1(LN(y))))
# ---------------------------------------------------------------------------
def _ln_mlp_res_kernel(y_ref, g_ref, beta_ref, w1_ref, b1_ref, w2_ref, b2_ref,
                       o_ref, *, mxu_dtype):
    y = y_ref[...].astype(jnp.float32)                         # (rows, D)
    mu = jnp.mean(y, axis=-1, keepdims=True)
    yc = y - mu
    var = jnp.mean(yc * yc, axis=-1, keepdims=True)
    yn = (yc * lax.rsqrt(var + _LN_EPS) * g_ref[...] + beta_ref[...]).astype(mxu_dtype)
    h = jnp.dot(yn, w1_ref[...], preferred_element_type=jnp.float32) + b1_ref[...]
    h = jnp.maximum(h, 0.0).astype(mxu_dtype)                  # act_layer = nn.ReLU
    out = y + jnp.dot(h, w2_ref[...], preferred_element_type=jnp.float32) + b2_ref[...]
    o_ref[...] = out.astype(o_ref.dtype)


def ln_mlp_residual(y, p, *, row_block=None, mxu_dtype=jnp.bfloat16):
    B, N, D = y.shape
    M = B * N
    Dh = p["w1"].shape[-1]
    y2 = y.reshape(M, D)                 # lane-dense 2-D slab presented to Pallas
    if row_block is None:
        row_block = M // 2 if (M % 2 == 0 and (M // 2) % 8 == 0) else M
    assert M % row_block == 0
    grid = (M // row_block,)

    flops = 2 * M * D * Dh * 2
    operands = (y2, p["ln_g"], p["ln_b"], p["w1"], p["b1"], p["w2"], p["b2"])
    bytes_accessed = int(sum(int(a.size) * a.dtype.itemsize for a in operands)
                         + M * D * 4)

    out2 = pl.pallas_call(
        functools.partial(_ln_mlp_res_kernel, mxu_dtype=mxu_dtype),
        out_shape=jax.ShapeDtypeStruct((M, D), jnp.float32),
        grid_spec=pltpu.PrefetchScalarGridSpec(
            num_scalar_prefetch=0,
            grid=grid,
            in_specs=[
                pl.BlockSpec((row_block, D), lambda i: (i, 0)),
                pl.BlockSpec((1, D), lambda i: (0, 0)),
                pl.BlockSpec((1, D), lambda i: (0, 0)),
                pl.BlockSpec((D, Dh), lambda i: (0, 0)),
                pl.BlockSpec((1, Dh), lambda i: (0, 0)),
                pl.BlockSpec((Dh, D), lambda i: (0, 0)),
                pl.BlockSpec((1, D), lambda i: (0, 0)),
            ],
            out_specs=pl.BlockSpec((row_block, D), lambda i: (i, 0)),
        ),
        compiler_params=pltpu.CompilerParams(
            dimension_semantics=("parallel",),
            vmem_limit_bytes=48 * 1024 * 1024),
        cost_estimate=pl.CostEstimate(flops=flops, transcendentals=0,
                                      bytes_accessed=bytes_accessed),
    )(*operands)
    return out2.reshape(B, N, D)


# ---------------------------------------------------------------------------
# Data movement (nn.Unfold / nn.Fold / reshape_out) - pure XLA reshapes.
# ---------------------------------------------------------------------------
def _unfold_tokens(x, resolution, k):
    """nn.Unfold(kernel=k, stride=k) on the (B,C,R,R) view + permute(0,2,1)."""
    B, N, C = x.shape
    g = resolution // k
    t = x.reshape(B, g, k, g, k, C)             # (B, ph, i, pw, j, C)
    t = t.transpose(0, 1, 3, 5, 2, 4)           # (B, ph, pw, C, i, j)
    return t.reshape(B, g * g, C * k * k)


def _fold_tokens(a, resolution, k):
    """nn.Fold(output_size=(R,R), kernel=k, stride=k) followed by reshape_out."""
    B, L, D = a.shape
    g = resolution // k
    c_in = D // (k * k)
    t = a.reshape(B, g, g, c_in, k, k)          # (B, ph, pw, c, i, j)
    t = t.transpose(0, 1, 4, 2, 5, 3)           # (B, ph, i, pw, j, c)
    return t.reshape(B, resolution * resolution, c_in)


# ---------------------------------------------------------------------------
# Full Multi_Gran_Transformer forward.
# ---------------------------------------------------------------------------
def multi_gran_transformer(x, kparams, *, num_heads, num_levels, input_resolution,
                           mxu_dtype=jnp.bfloat16, batch_block=None):
    # level 0: self.attn(self.norm1(x))  (LayerNorm fused into the kernel)
    y = ln_mha(x, kparams["attn_main"], num_heads=num_heads,
               batch_block=batch_block, mxu_dtype=mxu_dtype)
    # multi-granularity branches: unfold -> LN+Attention -> fold, summed onto y.
    for i in range(1, num_levels):
        k = 2 ** i
        tok = _unfold_tokens(x, input_resolution, k)
        a = ln_mha(tok, kparams[f"attn_lvl{i}"], num_heads=num_heads,
                   batch_block=batch_block, mxu_dtype=mxu_dtype)
        y = y + _fold_tokens(a, input_resolution, k)
    # x = x + drop_path(mlp(norm2(x)))   (drop_path is identity at p = 0)
    return ln_mlp_residual(y, kparams["mlp"], mxu_dtype=mxu_dtype)


# ---------------------------------------------------------------------------
# Parameters (deterministic) + host-side weight preparation.
# ---------------------------------------------------------------------------
def init_params(key, *, dim, in_dim, num_heads, num_levels, mlp_ratio=1.0):
    """Logical f32 parameters for all sub-modules used by forward().
    (attentions[0] of the reference __init__ is never called in forward and is
    therefore not created.)"""
    def attn(k, c, d):
        ks = jax.random.split(k, 7)
        hd = d // num_heads
        return dict(
            ln_g=1.0 + 0.1 * jax.random.normal(ks[0], (c,), jnp.float32),
            ln_b=0.05 * jax.random.normal(ks[1], (c,), jnp.float32),
            wq=jax.random.normal(ks[2], (num_heads, c, hd), jnp.float32) / jnp.sqrt(c),
            wk=jax.random.normal(ks[3], (num_heads, c, hd), jnp.float32) / jnp.sqrt(c),
            wv=jax.random.normal(ks[4], (num_heads, c, hd), jnp.float32) / jnp.sqrt(c),
            wo=jax.random.normal(ks[5], (num_heads, hd, d), jnp.float32) / jnp.sqrt(d),
            bo=0.02 * jax.random.normal(ks[6], (d,), jnp.float32),
        )

    keys = jax.random.split(key, num_levels + 1)
    params = {"attn_main": attn(keys[0], dim, in_dim)}
    for i in range(1, num_levels):
        f = 4 ** i
        params[f"attn_lvl{i}"] = attn(keys[i], dim * f, in_dim * f)
    hidden = int(in_dim * mlp_ratio)
    km = jax.random.split(keys[num_levels], 6)
    params["mlp"] = dict(
        ln_g=1.0 + 0.1 * jax.random.normal(km[0], (in_dim,), jnp.float32),
        ln_b=0.05 * jax.random.normal(km[1], (in_dim,), jnp.float32),
        w1=jax.random.normal(km[2], (in_dim, hidden), jnp.float32) / jnp.sqrt(in_dim),
        b1=0.02 * jax.random.normal(km[3], (hidden,), jnp.float32),
        w2=jax.random.normal(km[4], (hidden, in_dim), jnp.float32) / jnp.sqrt(hidden),
        b2=0.02 * jax.random.normal(km[5], (in_dim,), jnp.float32),
    )
    return params


def prepare_kernel_params(params, mxu_dtype=jnp.bfloat16):
    """One-time host transform: fold q-scale into the q half of the packed qk weights,
    build the flat v-projection (residual + per-head v slices), reshape vectors to
    (1, C), cast MXU operands."""
    out = {}
    for name, p in params.items():
        if name == "mlp":
            out[name] = dict(
                ln_g=p["ln_g"].reshape(1, -1), ln_b=p["ln_b"].reshape(1, -1),
                w1=p["w1"].astype(mxu_dtype), b1=p["b1"].reshape(1, -1),
                w2=p["w2"].astype(mxu_dtype), b2=p["b2"].reshape(1, -1))
            continue
        H, C, hd = p["wq"].shape
        D = H * hd
        wqk = jnp.concatenate([p["wq"] * (hd ** -0.5), p["wk"]], axis=-1)  # (H,C,2hd)
        wv_flat = jnp.transpose(p["wv"], (1, 0, 2)).reshape(C, D)
        out[name] = dict(
            ln_g=p["ln_g"].reshape(1, -1), ln_b=p["ln_b"].reshape(1, -1),
            wqk=wqk.astype(mxu_dtype),
            wv_flat=wv_flat.astype(mxu_dtype),
            wo=p["wo"].astype(mxu_dtype),
            bo=p["bo"].reshape(1, -1))
    return out


# ---------------------------------------------------------------------------
# Pure-JAX f32 reference (mirrors the PyTorch forward, eval mode).
# ---------------------------------------------------------------------------
def _layernorm_ref(x, g, b):
    mu = jnp.mean(x, axis=-1, keepdims=True)
    var = jnp.mean((x - mu) ** 2, axis=-1, keepdims=True)
    return (x - mu) * lax.rsqrt(var + _LN_EPS) * g + b


def _attention_ref(x, p):
    B, N, _ = x.shape
    hd = p["wq"].shape[-1]
    xn = _layernorm_ref(x, p["ln_g"], p["ln_b"])
    q = jnp.einsum("bnc,hcd->bhnd", xn, p["wq"]) * (hd ** -0.5)
    k = jnp.einsum("bnc,hcd->bhnd", xn, p["wk"])
    v = jnp.einsum("bnc,hcd->bhnd", xn, p["wv"])
    s = jnp.einsum("bhqd,bhkd->bhqk", q, k)
    a = jax.nn.softmax(s, axis=-1)
    o = jnp.einsum("bhqk,bhkd->bhqd", a, v)
    proj = jnp.einsum("bhnd,hde->bne", o, p["wo"]) + p["bo"]
    v_cat = v.transpose(0, 2, 1, 3).reshape(B, N, -1)
    return v_cat + proj                              # "x = v.squeeze(1) + x"


def _mlp_residual_ref(y, p):
    yn = _layernorm_ref(y, p["ln_g"], p["ln_b"])
    h = jnp.maximum(yn @ p["w1"] + p["b1"], 0.0)
    return y + h @ p["w2"] + p["b2"]


def multi_gran_transformer_ref(x, params, *, num_levels, input_resolution):
    y = _attention_ref(x, params["attn_main"])
    for i in range(1, num_levels):
        k = 2 ** i
        tok = _unfold_tokens(x, input_resolution, k)
        y = y + _fold_tokens(_attention_ref(tok, params[f"attn_lvl{i}"]),
                             input_resolution, k)
    return _mlp_residual_ref(y, params["mlp"])


# ---------------------------------------------------------------------------
if __name__ == "__main__":
    # Small but layout-friendly shapes: N = 8*8 tokens, dim=64, in_dim=128 so every
    # kernel output block is lane-dense (last dim a multiple of 128).  num_levels=2
    # adds one unfold/fold granularity branch (token dim 256 -> 512).
    B, R, DIM, IN_DIM, HEADS, LEVELS = 4, 8, 64, 128, 4, 2
    N = R * R

    key = jax.random.PRNGKey(0)
    kx, kp = jax.random.split(key)
    x = jax.random.normal(kx, (B, N, DIM), dtype=jnp.float32)
    params = init_params(kp, dim=DIM, in_dim=IN_DIM, num_heads=HEADS,
                         num_levels=LEVELS, mlp_ratio=1.0)
    ref = multi_gran_transformer_ref(x, params, num_levels=LEVELS,
                                     input_resolution=R)

    # 1) exact-arithmetic configuration (f32 MXU inputs, exact reciprocal):
    #    tight structural check against the pure-JAX reference.
    kp_f32 = prepare_kernel_params(params, mxu_dtype=jnp.float32)
    out_f32 = multi_gran_transformer(x, kp_f32, num_heads=HEADS, num_levels=LEVELS,
                                     input_resolution=R, mxu_dtype=jnp.float32)
    out_f32 = jax.block_until_ready(out_f32)
    assert out_f32.shape == (B, N, IN_DIM)
    rel_f32 = jnp.linalg.norm(out_f32 - ref) / jnp.linalg.norm(ref)
    assert float(rel_f32) < 1e-2, f"f32 path mismatch: rel_l2={float(rel_f32)}"

    # 2) performance configuration (bf16 MXU inputs, f32 accumulation, approx recip).
    kp_bf16 = prepare_kernel_params(params, mxu_dtype=jnp.bfloat16)
    out_bf16 = multi_gran_transformer(x, kp_bf16, num_heads=HEADS, num_levels=LEVELS,
                                      input_resolution=R, mxu_dtype=jnp.bfloat16)
    out_bf16 = jax.block_until_ready(out_bf16)
    assert out_bf16.shape == (B, N, IN_DIM)
    rel_bf16 = jnp.linalg.norm(out_bf16 - ref) / jnp.linalg.norm(ref)
    max_abs = jnp.max(jnp.abs(out_bf16 - ref))
    assert float(rel_bf16) < 2e-2, f"bf16 path mismatch: rel_l2={float(rel_bf16)}"
    assert float(max_abs) < 0.25, f"bf16 path max-abs error too large: {float(max_abs)}"

    print("KERNEL_OK")
</pallas_src>

<mosaic_0001>
module attributes {stable_mosaic.version = 11 : i64} {
  func.func @_ln_mha_kernel(%arg0: i32, %arg1: memref<2x64x64xf32, #tpu.memory_space<vmem>>, %arg2: memref<1x64xf32, #tpu.memory_space<vmem>>, %arg3: memref<1x64xf32, #tpu.memory_space<vmem>>, %arg4: memref<4x64x64xf32, #tpu.memory_space<vmem>>, %arg5: memref<64x128xf32, #tpu.memory_space<vmem>>, %arg6: memref<4x32x128xf32, #tpu.memory_space<vmem>>, %arg7: memref<1x128xf32, #tpu.memory_space<vmem>>, %arg8: memref<2x64x128xf32, #tpu.memory_space<vmem>>) attributes {dimension_semantics = [#tpu.dimension_semantics<parallel>], iteration_bounds = array<i64: 2>, scalar_prefetch = 0 : i64, scratch_operands = 0 : i64, tpu.core_type = #tpu.core_type<tc>, window_params = [{transform_indices = @transform_0, window_bounds = array<i64: 2, 64, 64>}, {pipeline_mode = #tpu.pipeline_mode<synchronous>, transform_indices = @transform_1, window_bounds = array<i64: 1, 64>}, {pipeline_mode = #tpu.pipeline_mode<synchronous>, transform_indices = @transform_2, window_bounds = array<i64: 1, 64>}, {pipeline_mode = #tpu.pipeline_mode<synchronous>, transform_indices = @transform_3, window_bounds = array<i64: 4, 64, 64>}, {pipeline_mode = #tpu.pipeline_mode<synchronous>, transform_indices = @transform_4, window_bounds = array<i64: 64, 128>}, {pipeline_mode = #tpu.pipeline_mode<synchronous>, transform_indices = @transform_5, window_bounds = array<i64: 4, 32, 128>}, {pipeline_mode = #tpu.pipeline_mode<synchronous>, transform_indices = @transform_6, window_bounds = array<i64: 1, 128>}, {transform_indices = @transform_7, window_bounds = array<i64: 2, 64, 128>}]} {
    %c0 = arith.constant 0 : index
    %c0_0 = arith.constant 0 : index
    %c0_1 = arith.constant 0 : index
    %0 = vector.load %arg1[%c0, %c0_0, %c0_1] : memref<2x64x64xf32, #tpu.memory_space<vmem>>, vector<2x64x64xf32>
    %1 = vector.shape_cast %0 : vector<2x64x64xf32> to vector<128x64xf32>
    %cst = arith.constant dense<0.000000e+00> : vector<128xf32>
    %2 = vector.multi_reduction <add>, %1, %cst [1] : vector<128x64xf32> to vector<128xf32>
    %3 = vector.shape_cast %2 : vector<128xf32> to vector<128x1xf32>
    %cst_2 = arith.constant 6.400000e+01 : f32
    %4 = vector.broadcast %cst_2 : f32 to vector<128x1xf32>
    %5 = arith.divf %3, %4 : vector<128x1xf32>
    %6 = vector.broadcast %5 : vector<128x1xf32> to vector<128x64xf32>
    %7 = arith.subf %1, %6 : vector<128x64xf32>
    %8 = arith.mulf %7, %7 : vector<128x64xf32>
    %cst_3 = arith.constant dense<0.000000e+00> : vector<128xf32>
    %9 = vector.multi_reduction <add>, %8, %cst_3 [1] : vector<128x64xf32> to vector<128xf32>
    %10 = vector.shape_cast %9 : vector<128xf32> to vector<128x1xf32>
    %cst_4 = arith.constant 6.400000e+01 : f32
    %11 = vector.broadcast %cst_4 : f32 to vector<128x1xf32>
    %12 = arith.divf %10, %11 : vector<128x1xf32>
    %cst_5 = arith.constant 9.99999974E-6 : f32
    %13 = vector.broadcast %cst_5 : f32 to vector<128x1xf32>
    %14 = arith.addf %12, %13 : vector<128x1xf32>
    %15 = math.rsqrt %14 : vector<128x1xf32>
    %16 = vector.broadcast %15 : vector<128x1xf32> to vector<128x64xf32>
    %17 = arith.mulf %7, %16 : vector<128x64xf32>
    %c0_6 = arith.constant 0 : index
    %c0_7 = arith.constant 0 : index
    %18 = vector.load %arg2[%c0_6, %c0_7] : memref<1x64xf32, #tpu.memory_space<vmem>>, vector<1x64xf32>
    %19 = vector.broadcast %18 : vector<1x64xf32> to vector<128x64xf32>
    %20 = arith.mulf %17, %19 : vector<128x64xf32>
    %c0_8 = arith.constant 0 : index
    %c0_9 = arith.constant 0 : index
    %21 = vector.load %arg3[%c0_8, %c0_9] : memref<1x64xf32, #tpu.memory_space<vmem>>, vector<1x64xf32>
    %22 = vector.broadcast %21 : vector<1x64xf32> to vector<128x64xf32>
    %23 = arith.addf %20, %22 : vector<128x64xf32>
    %c0_10 = arith.constant 0 : index
    %c0_11 = arith.constant 0 : index
    %24 = vector.load %arg5[%c0_10, %c0_11] : memref<64x128xf32, #tpu.memory_space<vmem>>, vector<64x128xf32>
    %cst_12 = arith.constant dense<0.000000e+00> : vector<128x128xf32>
    %25 = tpu.matmul %23, %24, %cst_12 {dimension_numbers = #tpu.dot_dimension_numbers<[1], [0], [0], [1], [0, 0, 1, 1], [], []>} : vector<128x64xf32>, vector<64x128xf32>, vector<128x128xf32> -> vector<128x128xf32>
    %c0_13 = arith.constant 0 : index
    %c0_14 = arith.constant 0 : index
    %26 = vector.load %arg7[%c0_13, %c0_14] : memref<1x128xf32, #tpu.memory_space<vmem>>, vector<1x128xf32>
    %27 = vector.broadcast %26 : vector<1x128xf32> to vector<128x128xf32>
    %28 = arith.addf %27, %25 : vector<128x128xf32>
    %c0_15 = arith.constant 0 : index
    %c0_16 = arith.constant 0 : index
    %c0_17 = arith.constant 0 : index
    %29 = vector.load %arg4[%c0_15, %c0_16, %c0_17] : memref<4x64x64xf32, #tpu.memory_space<vmem>>, vector<1x64x64xf32>
    %30 = vector.shape_cast %29 : vector<1x64x64xf32> to vector<64x64xf32>
    %cst_18 = arith.constant dense<0.000000e+00> : vector<128x64xf32>
    %31 = tpu.matmul %23, %30, %cst_18 {dimension_numbers = #tpu.dot_dimension_numbers<[1], [0], [0], [1], [0, 0, 1, 1], [], []>} : vector<128x64xf32>, vector<64x64xf32>, vector<128x64xf32> -> vector<128x64xf32>
    %32 = vector.extract_strided_slice %31 {offsets = [0, 0], sizes = [128, 32], strides = [1, 1]} : vector<128x64xf32> to vector<128x32xf32>
    %33 = vector.shape_cast %32 : vector<128x32xf32> to vector<2x64x32xf32>
    %34 = vector.extract_strided_slice %31 {offsets = [0, 32], sizes = [128, 32], strides = [1, 1]} : vector<128x64xf32> to vector<128x32xf32>
    %35 = vector.shape_cast %34 : vector<128x32xf32> to vector<2x64x32xf32>
    %36 = vector.extract_strided_slice %25 {offsets = [0, 0], sizes = [128, 32], strides = [1, 1]} : vector<128x128xf32> to vector<128x32xf32>
    %37 = vector.shape_cast %36 : vector<128x32xf32> to vector<2x64x32xf32>
    "tpu.trace_start"() <{level = 10 : i32, message = "bqd,bkd->bqk"}> : () -> ()
    %cst_19 = arith.constant dense<0.000000e+00> : vector<2x64x64xf32>
    %38 = tpu.matmul %33, %35, %cst_19 {dimension_numbers = #tpu.dot_dimension_numbers<[2], [2], [1], [1], [0, 0, 0, 1, 1, 1], [0], [0]>} : vector<2x64x32xf32>, vector<2x64x32xf32>, vector<2x64x64xf32> -> vector<2x64x64xf32>
    "tpu.trace_stop"() : () -> ()
    %cst_20 = arith.constant dense<0xFF800000> : vector<2x64xf32>
    %39 = vector.multi_reduction <maximumf>, %38, %cst_20 [2] : vector<2x64x64xf32> to vector<2x64xf32>
    %40 = vector.shape_cast %39 : vector<2x64xf32> to vector<2x64x1xf32>
    %41 = vector.broadcast %40 : vector<2x64x1xf32> to vector<2x64x64xf32>
    %42 = arith.subf %38, %41 : vector<2x64x64xf32>
    %43 = math.exp %42 : vector<2x64x64xf32>
    %cst_21 = arith.constant dense<0.000000e+00> : vector<2x64xf32>
    %44 = vector.multi_reduction <add>, %43, %cst_21 [2] : vector<2x64x64xf32> to vector<2x64xf32>
    %45 = vector.shape_cast %44 : vector<2x64xf32> to vector<2x64x1xf32>
    %46 = tpu.reciprocal %45 : vector<2x64x1xf32> -> vector<2x64x1xf32>
    %47 = vector.broadcast %46 : vector<2x64x1xf32> to vector<2x64x64xf32>
    %48 = arith.mulf %43, %47 : vector<2x64x64xf32>
    "tpu.trace_start"() <{level = 10 : i32, message = "bqk,bkd->bqd"}> : () -> ()
    %cst_22 = arith.constant dense<0.000000e+00> : vector<2x64x32xf32>
    %49 = tpu.matmul %48, %37, %cst_22 {dimension_numbers = #tpu.dot_dimension_numbers<[2], [1], [1], [2], [0, 0, 0, 1, 1, 2], [0], [0]>} : vector<2x64x64xf32>, vector<2x64x32xf32>, vector<2x64x32xf32> -> vector<2x64x32xf32>
    "tpu.trace_stop"() : () -> ()
    %50 = vector.shape_cast %49 : vector<2x64x32xf32> to vector<128x32xf32>
    %c0_23 = arith.constant 0 : index
    %c0_24 = arith.constant 0 : index
    %c0_25 = arith.constant 0 : index
    %51 = vector.load %arg6[%c0_23, %c0_24, %c0_25] : memref<4x32x128xf32, #tpu.memory_space<vmem>>, vector<1x32x128xf32>
    %52 = vector.shape_cast %51 : vector<1x32x128xf32> to vector<32x128xf32>
    %cst_26 = arith.constant dense<0.000000e+00> : vector<128x128xf32>
    %53 = tpu.matmul %50, %52, %cst_26 {dimension_numbers = #tpu.dot_dimension_numbers<[1], [0], [0], [1], [0, 0, 1, 1], [], []>} : vector<128x32xf32>, vector<32x128xf32>, vector<128x128xf32> -> vector<128x128xf32>
    %54 = arith.addf %28, %53 : vector<128x128xf32>
    %c1 = arith.constant 1 : index
    %c0_27 = arith.constant 0 : index
    %c0_28 = arith.constant 0 : index
    %55 = vector.load %arg4[%c1, %c0_27, %c0_28] : memref<4x64x64xf32, #tpu.memory_space<vmem>>, vector<1x64x64xf32>
    %56 = vector.shape_cast %55 : vector<1x64x64xf32> to vector<64x64xf32>
    %cst_29 = arith.constant dense<0.000000e+00> : vector<128x64xf32>
    %57 = tpu.matmul %23, %56, %cst_29 {dimension_numbers = #tpu.dot_dimension_numbers<[1], [0], [0], [1], [0, 0, 1, 1], [], []>} : vector<128x64xf32>, vector<64x64xf32>, vector<128x64xf32> -> vector<128x64xf32>
    %58 = vector.extract_strided_slice %57 {offsets = [0, 0], sizes = [128, 32], strides = [1, 1]} : vector<128x64xf32> to vector<128x32xf32>
    %59 = vector.shape_cast %58 : vector<128x32xf32> to vector<2x64x32xf32>
    %60 = vector.extract_strided_slice %57 {offsets = [0, 32], sizes = [128, 32], strides = [1, 1]} : vector<128x64xf32> to vector<128x32xf32>
    %61 = vector.shape_cast %60 : vector<128x32xf32> to vector<2x64x32xf32>
    %62 = vector.extract_strided_slice %25 {offsets = [0, 32], sizes = [128, 32], strides = [1, 1]} : vector<128x128xf32> to vector<128x32xf32>
    %63 = vector.shape_cast %62 : vector<128x32xf32> to vector<2x64x32xf32>
    "tpu.trace_start"() <{level = 10 : i32, message = "bqd,bkd->bqk"}> : () -> ()
    %cst_30 = arith.constant dense<0.000000e+00> : vector<2x64x64xf32>
    %64 = tpu.matmul %59, %61, %cst_30 {dimension_numbers = #tpu.dot_dimension_numbers<[2], [2], [1], [1], [0, 0, 0, 1, 1, 1], [0], [0]>} : vector<2x64x32xf32>, vector<2x64x32xf32>, vector<2x64x64xf32> -> vector<2x64x64xf32>
    "tpu.trace_stop"() : () -> ()
    %cst_31 = arith.constant dense<0xFF800000> : vector<2x64xf32>
    %65 = vector.multi_reduction <maximumf>, %64, %cst_31 [2] : vector<2x64x64xf32> to vector<2x64xf32>
    %66 = vector.shape_cast %65 : vector<2x64xf32> to vector<2x64x1xf32>
    %67 = vector.broadcast %66 : vector<2x64x1xf32> to vector<2x64x64xf32>
    %68 = arith.subf %64, %67 : vector<2x64x64xf32>
    %69 = math.exp %68 : vector<2x64x64xf32>
    %cst_32 = arith.constant dense<0.000000e+00> : vector<2x64xf32>
    %70 = vector.multi_reduction <add>, %69, %cst_32 [2] : vector<2x64x64xf32> to vector<2x64xf32>
    %71 = vector.shape_cast %70 : vector<2x64xf32> to vector<2x64x1xf32>
    %72 = tpu.reciprocal %71 : vector<2x64x1xf32> -> vector<2x64x1xf32>
    %73 = vector.broadcast %72 : vector<2x64x1xf32> to vector<2x64x64xf32>
    %74 = arith.mulf %69, %73 : vector<2x64x64xf32>
    "tpu.trace_start"() <{level = 10 : i32, message = "bqk,bkd->bqd"}> : () -> ()
    %cst_33 = arith.constant dense<0.000000e+00> : vector<2x64x32xf32>
    %75 = tpu.matmul %74, %63, %cst_33 {dimension_numbers = #tpu.dot_dimension_numbers<[2], [1], [1], [2], [0, 0, 0, 1, 1, 2], [0], [0]>} : vector<2x64x64xf32>, vector<2x64x32xf32>, vector<2x64x32xf32> -> vector<2x64x32xf32>
    "tpu.trace_stop"() : () -> ()
    %76 = vector.shape_cast %75 : vector<2x64x32xf32> to vector<128x32xf32>
    %c1_34 = arith.constant 1 : index
    %c0_35 = arith.constant 0 : index
    %c0_36 = arith.constant 0 : index
    %77 = vector.load %arg6[%c1_34, %c0_35, %c0_36] : memref<4x32x128xf32, #tpu.memory_space<vmem>>, vector<1x32x128xf32>
    %78 = vector.shape_cast %77 : vector<1x32x128xf32> to vector<32x128xf32>
    %cst_37 = arith.constant dense<0.000000e+00> : vector<128x128xf32>
    %79 = tpu.matmul %76, %78, %cst_37 {dimension_numbers = #tpu.dot_dimension_numbers<[1], [0], [0], [1], [0, 0, 1, 1], [], []>} : vector<128x32xf32>, vector<32x128xf32>, vector<128x128xf32> -> vector<128x128xf32>
    %80 = arith.addf %54, %79 : vector<128x128xf32>
    %c2 = arith.constant 2 : index
    %c0_38 = arith.constant 0 : index
    %c0_39 = arith.constant 0 : index
    %81 = vector.load %arg4[%c2, %c0_38, %c0_39] : memref<4x64x64xf32, #tpu.memory_space<vmem>>, vector<1x64x64xf32>
    %82 = vector.shape_cast %81 : vector<1x64x64xf32> to vector<64x64xf32>
    %cst_40 = arith.constant dense<0.000000e+00> : vector<128x64xf32>
    %83 = tpu.matmul %23, %82, %cst_40 {dimension_numbers = #tpu.dot_dimension_numbers<[1], [0], [0], [1], [0, 0, 1, 1], [], []>} : vector<128x64xf32>, vector<64x64xf32>, vector<128x64xf32> -> vector<128x64xf32>
    %84 = vector.extract_strided_slice %83 {offsets = [0, 0], sizes = [128, 32], strides = [1, 1]} : vector<128x64xf32> to vector<128x32xf32>
    %85 = vector.shape_cast %84 : vector<128x32xf32> to vector<2x64x32xf32>
    %86 = vector.extract_strided_slice %83 {offsets = [0, 32], sizes = [128, 32], strides = [1, 1]} : vector<128x64xf32> to vector<128x32xf32>
    %87 = vector.shape_cast %86 : vector<128x32xf32> to vector<2x64x32xf32>
    %88 = vector.extract_strided_slice %25 {offsets = [0, 64], sizes = [128, 32], strides = [1, 1]} : vector<128x128xf32> to vector<128x32xf32>
    %89 = vector.shape_cast %88 : vector<128x32xf32> to vector<2x64x32xf32>
    "tpu.trace_start"() <{level = 10 : i32, message = "bqd,bkd->bqk"}> : () -> ()
    %cst_41 = arith.constant dense<0.000000e+00> : vector<2x64x64xf32>
    %90 = tpu.matmul %85, %87, %cst_41 {dimension_numbers = #tpu.dot_dimension_numbers<[2], [2], [1], [1], [0, 0, 0, 1, 1, 1], [0], [0]>} : vector<2x64x32xf32>, vector<2x64x32xf32>, vector<2x64x64xf32> -> vector<2x64x64xf32>
    "tpu.trace_stop"() : () -> ()
    %cst_42 = arith.constant dense<0xFF800000> : vector<2x64xf32>
    %91 = vector.multi_reduction <maximumf>, %90, %cst_42 [2] : vector<2x64x64xf32> to vector<2x64xf32>
    %92 = vector.shape_cast %91 : vector<2x64xf32> to vector<2x64x1xf32>
    %93 = vector.broadcast %92 : vector<2x64x1xf32> to vector<2x64x64xf32>
    %94 = arith.subf %90, %93 : vector<2x64x64xf32>
    %95 = math.exp %94 : vector<2x64x64xf32>
    %cst_43 = arith.constant dense<0.000000e+00> : vector<2x64xf32>
    %96 = vector.multi_reduction <add>, %95, %cst_43 [2] : vector<2x64x64xf32> to vector<2x64xf32>
    %97 = vector.shape_cast %96 : vector<2x64xf32> to vector<2x64x1xf32>
    %98 = tpu.reciprocal %97 : vector<2x64x1xf32> -> vector<2x64x1xf32>
    %99 = vector.broadcast %98 : vector<2x64x1xf32> to vector<2x64x64xf32>
    %100 = arith.mulf %95, %99 : vector<2x64x64xf32>
    "tpu.trace_start"() <{level = 10 : i32, message = "bqk,bkd->bqd"}> : () -> ()
    %cst_44 = arith.constant dense<0.000000e+00> : vector<2x64x32xf32>
    %101 = tpu.matmul %100, %89, %cst_44 {dimension_numbers = #tpu.dot_dimension_numbers<[2], [1], [1], [2], [0, 0, 0, 1, 1, 2], [0], [0]>} : vector<2x64x64xf32>, vector<2x64x32xf32>, vector<2x64x32xf32> -> vector<2x64x32xf32>
    "tpu.trace_stop"() : () -> ()
    %102 = vector.shape_cast %101 : vector<2x64x32xf32> to vector<128x32xf32>
    %c2_45 = arith.constant 2 : index
    %c0_46 = arith.constant 0 : index
    %c0_47 = arith.constant 0 : index
    %103 = vector.load %arg6[%c2_45, %c0_46, %c0_47] : memref<4x32x128xf32, #tpu.memory_space<vmem>>, vector<1x32x128xf32>
    %104 = vector.shape_cast %103 : vector<1x32x128xf32> to vector<32x128xf32>
    %cst_48 = arith.constant dense<0.000000e+00> : vector<128x128xf32>
    %105 = tpu.matmul %102, %104, %cst_48 {dimension_numbers = #tpu.dot_dimension_numbers<[1], [0], [0], [1], [0, 0, 1, 1], [], []>} : vector<128x32xf32>, vector<32x128xf32>, vector<128x128xf32> -> vector<128x128xf32>
    %106 = arith.addf %80, %105 : vector<128x128xf32>
    %c3 = arith.constant 3 : index
    %c0_49 = arith.constant 0 : index
    %c0_50 = arith.constant 0 : index
    %107 = vector.load %arg4[%c3, %c0_49, %c0_50] : memref<4x64x64xf32, #tpu.memory_space<vmem>>, vector<1x64x64xf32>
    %108 = vector.shape_cast %107 : vector<1x64x64xf32> to vector<64x64xf32>
    %cst_51 = arith.constant dense<0.000000e+00> : vector<128x64xf32>
    %109 = tpu.matmul %23, %108, %cst_51 {dimension_numbers = #tpu.dot_dimension_numbers<[1], [0], [0], [1], [0, 0, 1, 1], [], []>} : vector<128x64xf32>, vector<64x64xf32>, vector<128x64xf32> -> vector<128x64xf32>
    %110 = vector.extract_strided_slice %109 {offsets = [0, 0], sizes = [128, 32], strides = [1, 1]} : vector<128x64xf32> to vector<128x32xf32>
    %111 = vector.shape_cast %110 : vector<128x32xf32> to vector<2x64x32xf32>
    %112 = vector.extract_strided_slice %109 {offsets = [0, 32], sizes = [128, 32], strides = [1, 1]} : vector<128x64xf32> to vector<128x32xf32>
    %113 = vector.shape_cast %112 : vector<128x32xf32> to vector<2x64x32xf32>
    %114 = vector.extract_strided_slice %25 {offsets = [0, 96], sizes = [128, 32], strides = [1, 1]} : vector<128x128xf32> to vector<128x32xf32>
    %115 = vector.shape_cast %114 : vector<128x32xf32> to vector<2x64x32xf32>
    "tpu.trace_start"() <{level = 10 : i32, message = "bqd,bkd->bqk"}> : () -> ()
    %cst_52 = arith.constant dense<0.000000e+00> : vector<2x64x64xf32>
    %116 = tpu.matmul %111, %113, %cst_52 {dimension_numbers = #tpu.dot_dimension_numbers<[2], [2], [1], [1], [0, 0, 0, 1, 1, 1], [0], [0]>} : vector<2x64x32xf32>, vector<2x64x32xf32>, vector<2x64x64xf32> -> vector<2x64x64xf32>
    "tpu.trace_stop"() : () -> ()
    %cst_53 = arith.constant dense<0xFF800000> : vector<2x64xf32>
    %117 = vector.multi_reduction <maximumf>, %116, %cst_53 [2] : vector<2x64x64xf32> to vector<2x64xf32>
    %118 = vector.shape_cast %117 : vector<2x64xf32> to vector<2x64x1xf32>
    %119 = vector.broadcast %118 : vector<2x64x1xf32> to vector<2x64x64xf32>
    %120 = arith.subf %116, %119 : vector<2x64x64xf32>
    %121 = math.exp %120 : vector<2x64x64xf32>
    %cst_54 = arith.constant dense<0.000000e+00> : vector<2x64xf32>
    %122 = vector.multi_reduction <add>, %121, %cst_54 [2] : vector<2x64x64xf32> to vector<2x64xf32>
    %123 = vector.shape_cast %122 : vector<2x64xf32> to vector<2x64x1xf32>
    %124 = tpu.reciprocal %123 : vector<2x64x1xf32> -> vector<2x64x1xf32>
    %125 = vector.broadcast %124 : vector<2x64x1xf32> to vector<2x64x64xf32>
    %126 = arith.mulf %121, %125 : vector<2x64x64xf32>
    "tpu.trace_start"() <{level = 10 : i32, message = "bqk,bkd->bqd"}> : () -> ()
    %cst_55 = arith.constant dense<0.000000e+00> : vector<2x64x32xf32>
    %127 = tpu.matmul %126, %115, %cst_55 {dimension_numbers = #tpu.dot_dimension_numbers<[2], [1], [1], [2], [0, 0, 0, 1, 1, 2], [0], [0]>} : vector<2x64x64xf32>, vector<2x64x32xf32>, vector<2x64x32xf32> -> vector<2x64x32xf32>
    "tpu.trace_stop"() : () -> ()
    %128 = vector.shape_cast %127 : vector<2x64x32xf32> to vector<128x32xf32>
    %c3_56 = arith.constant 3 : index
    %c0_57 = arith.constant 0 : index
    %c0_58 = arith.constant 0 : index
    %129 = vector.load %arg6[%c3_56, %c0_57, %c0_58] : memref<4x32x128xf32, #tpu.memory_space<vmem>>, vector<1x32x128xf32>
    %130 = vector.shape_cast %129 : vector<1x32x128xf32> to vector<32x128xf32>
    %cst_59 = arith.constant dense<0.000000e+00> : vector<128x128xf32>
    %131 = tpu.matmul %128, %130, %cst_59 {dimension_numbers = #tpu.dot_dimension_numbers<[1], [0], [0], [1], [0, 0, 1, 1], [], []>} : vector<128x32xf32>, vector<32x128xf32>, vector<128x128xf32> -> vector<128x128xf32>
    %132 = arith.addf %106, %131 : vector<128x128xf32>
    %133 = vector.shape_cast %132 : vector<128x128xf32> to vector<2x64x128xf32>
    %c0_60 = arith.constant 0 : index
    %c0_61 = arith.constant 0 : index
    %c0_62 = arith.constant 0 : index
    %134 = vector.load %arg8[%c0_60, %c0_61, %c0_62] : memref<2x64x128xf32, #tpu.memory_space<vmem>>, vector<2x64x128xf32>
    tpu.vector_store %arg8[%c0_60, %c0_61, %c0_62], %133 {strides = array<i32>} : memref<2x64x128xf32, #tpu.memory_space<vmem>>, vector<2x64x128xf32>,
    return
  }
  func.func @transform_0(%arg0: i32) -> (i32, i32, i32) {
    %c0_i32 = arith.constant 0 : i32
    %c0_i32_0 = arith.constant 0 : i32
    %c0_i32_1 = arith.constant 0 : i32
    return %arg0, %c0_i32, %c0_i32_0 : i32, i32, i32
  }
  func.func @transform_1(%arg0: i32) -> (i32, i32) {
    %c0_i32 = arith.constant 0 : i32
    %c0_i32_0 = arith.constant 0 : i32
    %c0_i32_1 = arith.constant 0 : i32
    return %c0_i32, %c0_i32_0 : i32, i32
  }
  func.func @transform_2(%arg0: i32) -> (i32, i32) {
    %c0_i32 = arith.constant 0 : i32
    %c0_i32_0 = arith.constant 0 : i32
    %c0_i32_1 = arith.constant 0 : i32
    return %c0_i32, %c0_i32_0 : i32, i32
  }
  func.func @transform_3(%arg0: i32) -> (i32, i32, i32) {
    %c0_i32 = arith.constant 0 : i32
    %c0_i32_0 = arith.constant 0 : i32
    %c0_i32_1 = arith.constant 0 : i32
    %c0_i32_2 = arith.constant 0 : i32
    return %c0_i32, %c0_i32_0, %c0_i32_1 : i32, i32, i32
  }
  func.func @transform_4(%arg0: i32) -> (i32, i32) {
    %c0_i32 = arith.constant 0 : i32
    %c0_i32_0 = arith.constant 0 : i32
    %c0_i32_1 = arith.constant 0 : i32
    return %c0_i32, %c0_i32_0 : i32, i32
  }
  func.func @transform_5(%arg0: i32) -> (i32, i32, i32) {
    %c0_i32 = arith.constant 0 : i32
    %c0_i32_0 = arith.constant 0 : i32
    %c0_i32_1 = arith.constant 0 : i32
    %c0_i32_2 = arith.constant 0 : i32
    return %c0_i32, %c0_i32_0, %c0_i32_1 : i32, i32, i32
  }
  func.func @transform_6(%arg0: i32) -> (i32, i32) {
    %c0_i32 = arith.constant 0 : i32
    %c0_i32_0 = arith.constant 0 : i32
    %c0_i32_1 = arith.constant 0 : i32
    return %c0_i32, %c0_i32_0 : i32, i32
  }
  func.func @transform_7(%arg0: i32) -> (i32, i32, i32) {
    %c0_i32 = arith.constant 0 : i32
    %c0_i32_0 = arith.constant 0 : i32
    %c0_i32_1 = arith.constant 0 : i32
    return %arg0, %c0_i32, %c0_i32_0 : i32, i32, i32
  }
}

</mosaic_0001>

<bundles_post_ra>
// kernel: tpu_custom_call.1
= control target key start
LH: loop header
LB: loop body
LE: loop exit
PB: predicated region body
PF: predicated region fallthrough
CT: control target
= control target key end

     0   :  { %12 = vsyncpa [#allocation3], 0  ;;  %s10646_s0 = inlined_call_operand.hbm [shape: f32[4,64,64], index: 0, kind: input, shape index: {}]   ;;  %s10647_s1 = inlined_call_operand.vmem [shape: f32[1,64], index: 1, kind: input, shape index: {}]   ;;  %s10648_s2 = inlined_call_operand.vmem [shape: f32[1,64], index: 2, kind: input, shape index: {}]   ;;  %s10649_s3 = inlined_call_operand.hbm [shape: f32[4,64,64], index: 3, kind: input, shape index: {}]   ;;  %s10650_s4 = inlined_call_operand.hbm [shape: f32[64,128], index: 4, kind: input, shape index: {}]   ;;  %s10651_s5 = inlined_call_operand.hbm [shape: f32[4,32,128], index: 5, kind: input, shape index: {}]   ;;  %s10652_s6 = inlined_call_operand.vmem [shape: f32[1,128], index: 6, kind: input, shape index: {}]   ;;  %s10653_s7 = inlined_call_operand.hbm [shape: f32[4,64,128], index: 7, kind: output, shape index: {}]  }
   0x1   :  { %14 = vsyncpa [#allocation3 + $0x1], 0 }
   0x2   :  { %15 = vsyncpa [#allocation6], 0 }
   0x3   :  { %16 = vsyncpa [#allocation9], 0 }
   0x4   :  { %17 = vsyncpa [#allocation4], 0 }
   0x5   :  { %19 = vsyncpa [#allocation4 + $0x1], 0  ;;  %s8616_s24 = smov 0   ;;  %s8618_s25 = smov 0  }
   0x6   :  { %s8620_s26 = smov 0   ;;  %s8622_s27 = smov 0  }
   0x7 LB: > { %s8637_s28 = sadd.s32 4294967295, %s8562_s27   ;;  %s5628_s29 = sadd.s32 4294967294, %s8562_s27   ;;  %s8562_s27 = sphi %s8622_s27, %s10721_s27   ;;  %s8558_s26 = sphi %s8620_s26, %s10720_s26   ;;  %s8554_s25 = sphi %s8618_s25, %s10719_s25   ;;  %s8550_s24 = sphi %s8616_s24, %s10718_s24  }
   0x8   : > { %p45_p0 = scmp.ne.s32.totalorder %s8554_s25, %s8550_s24  ;;  %p10654_p1 = scmp.eq.s32.totalorder %s8637_s28, 0 }
   0x9   : > { %p201_p3 = scmp.eq.s32.totalorder %s5628_s29, 1  ;;  %p5629_p5 = scmp.ge.s32.totalorder %s8562_s27, 1 }
   0xa   : > { %p8646_p4 = por %p10654_p1, %p45_p0  ;;  %p208_p7 = scmp.lt.s32.totalorder %s8562_s27, 3 }
   0xb   : > { %p8651_p6 = por %p201_p3, %p45_p0  ;;  %s8564_s10 = smov [#allocation5]  }
   0xc   : > { %s10664_s30 = scalar_select %p8646_p4, 1, 0 }
   0xd   : > { %s10665_s8 = scalar_select %p8651_p6, 1, 0 }
   0xe   : > { %p8656_p8 = pnand %p5629_p5, %p208_p7  ;;  %s226_s11 = sshll.u32 %s8564_s10, 4  ;;  %s8660_s11 = int_to_ptr.vmem [resolvable:$true] %s226_s11 }
   0xf   : > { %10666 = sst [smem:[#allocation15_spill]] %s10665_s8  ;;  %s8565_s13 = smov [#allocation7]  }
  0x10   : > { %s10667_s9 = scalar_select %p8656_p8, 1, 0 }
  0x11   : > { %p7737_p9 = pneg %p8656_p8  ;;  %s239_s14 = sshll.u32 %s8565_s13, 4  ;;  %s8671_s14 = int_to_ptr.vmem [resolvable:$true] %s239_s14 }
  0x12   : > { %s8566_s15 = smov [#allocation8]   ;;  %s8374_s19 = scalar_lea.hbm %s10649_s3, 4096 }
  0x13   : > { %p8667_p11 = pnand %p7737_p9, %p10654_p1  ;;  %s8673_s16 = sshll.u32 %s8566_s15, 4  ;;  %s253_s16 = int_to_ptr.vmem [resolvable:$true] %s8673_s16 }
  0x14   : > { %p8375_p12 = scmp.ne.s32.totalorder %s10649_s3, %s8374_s19  ;;  %p8381_p5 = scmp.lt.u32.totalorder %s8374_s19, %s10649_s3 }
  0x15   : > { %p8683_p13 = pneg %p8667_p11 }
  0x17   : > { %p8377_p0 = pnand %p8683_p13, %p8375_p12 }
  0x19   : > { %p8378_p3 = pneg %p8377_p0 }
  0x1b   : > { %p8383_p7 = pnand %p8381_p5, %p8378_p3 }
  0x1d   : > { %8386 = shalt.err (!%p8383_p7)
}
  0x1e   : > { %s8387_s10 = scalar_lea.vmem %s8660_s11, 4096  ;;  %p8395_p2 = scmp.lt.s32.totalorder %s8660_s11, %s8660_s11 }
  0x1f   : > { %p8388_p9 = scmp.ne.s32.totalorder %s8660_s11, %s8387_s10  ;;  %p8396_p6 = scmp.lt.s32.totalorder %s8387_s10, %s8387_s10 }
  0x21   : > { %p8390_p10 = pnand %p8388_p9, %p8683_p13  ;;  %p8397_p12 = por %p8396_p6, %p8395_p2 }
  0x23   : > { %p8391_p1 = pneg %p8390_p10 }
  0x25   : > { %p8398_p0 = pnand %p8397_p12, %p8391_p1 }
  0x27   : > { %8401 = shalt.err (!%p8398_p0)
}
  0x28   : > { %s8567_s13 = smov 128   ;;  %s8568_s15 = smov 8  }
  0x29   : > { %7740 = dma.hbm_to_vmem [thread:$0]  (!%p8667_p11), %s10649_s3, 4096, %s8660_s11, [#allocation6], %s8567_s13, %s8567_s13, %s8568_s15  }
  0x2a   : > { %s8402_s21 = scalar_lea.hbm %s10650_s4, 1024 }
  0x2b   : > { %p8403_p1 = scmp.ne.s32.totalorder %s10650_s4, %s8402_s21  ;;  %p8409_p10 = scmp.lt.u32.totalorder %s8402_s21, %s10650_s4 }
  0x2d   : > { %p8405_p2 = pnand %p8403_p1, %p8683_p13 }
  0x2f   : > { %p8406_p6 = pneg %p8405_p2 }
  0x31   : > { %p8411_p3 = pnand %p8409_p10, %p8406_p6 }
  0x33   : > { %8414 = shalt.err (!%p8411_p3)
}
  0x34   : > { %s8415_s11 = scalar_lea.vmem %s8671_s14, 1024  ;;  %p8423_p12 = scmp.lt.s32.totalorder %s8671_s14, %s8671_s14 }
  0x35   : > { %p8416_p5 = scmp.ne.s32.totalorder %s8671_s14, %s8415_s11  ;;  %p8424_p0 = scmp.lt.s32.totalorder %s8415_s11, %s8415_s11 }
  0x37   : > { %p8418_p7 = pnand %p8416_p5, %p8683_p13  ;;  %p8425_p1 = por %p8424_p0, %p8423_p12 }
  0x39   : > { %p8419_p9 = pneg %p8418_p7 }
  0x3b   : > { %p8426_p2 = pnand %p8425_p1, %p8419_p9 }
  0x3d   : > { %8429 = shalt.err (!%p8426_p2)
}
  0x3e   : > { %7743 = dma.hbm_to_vmem [thread:$0]  (!%p8667_p11), %s10650_s4, 1024, %s8671_s14, [#allocation6], %s8567_s13, %s8567_s13, %s8568_s15  }
  0x3f   : > { %s8430_s20 = scalar_lea.hbm %s10651_s5, 2048 }
  0x40   : > { %p8431_p6 = scmp.ne.s32.totalorder %s10651_s5, %s8430_s20  ;;  %p8437_p5 = scmp.lt.u32.totalorder %s8430_s20, %s10651_s5 }
  0x42   : > { %p8433_p10 = pnand %p8431_p6, %p8683_p13 }
  0x44   : > { %p8434_p3 = pneg %p8433_p10 }
  0x46   : > { %p8439_p7 = pnand %p8437_p5, %p8434_p3 }
  0x48   : > { %8442 = shalt.err (!%p8439_p7)
}
  0x49   : > { %s8443_s11 = scalar_lea.vmem %s253_s16, 2048  ;;  %p8451_p1 = scmp.lt.s32.totalorder %s253_s16, %s253_s16 }
  0x4a   : > { %p8444_p9 = scmp.ne.s32.totalorder %s253_s16, %s8443_s11  ;;  %p8452_p2 = scmp.lt.s32.totalorder %s8443_s11, %s8443_s11 }
  0x4c   : > { %p8446_p12 = pnand %p8444_p9, %p8683_p13  ;;  %p8453_p4 = por %p8452_p2, %p8451_p1 }
  0x4e   : > { %p8447_p0 = pneg %p8446_p12 }
  0x50   : > { %p8454_p8 = pnand %p8453_p4, %p8447_p0 }
  0x52   : > { %8457 = shalt.err (!%p8454_p8)
}
  0x53   : > { %7746 = dma.hbm_to_vmem [thread:$0]  (!%p8667_p11), %s10651_s5, 2048, %s253_s16, [#allocation9], %s8567_s13, %s8567_s13, %s8568_s15  }
  0x54   : > { %s8756_s22 = sadd.s32 1, %s8562_s27   ;;  %s32_s17 = sadd.s32 1, %s8558_s26 }
  0x55   : > { %s29_s12 = ssub.s32 %s8562_s27, %s8756_s22  ;;  %p39_p8 = scmp.ne.s32.totalorder %s8558_s26, %s8554_s25 }
  0x56   : > { %p30_p4 = scmp.eq.s32.totalorder %s29_s12, 0  ;;  %p40_p13 = scmp.eq.s32.totalorder %s8562_s27, 0 }
  0x57   : > { %p7758_p6 = scmp.lt.s32.totalorder %s8562_s27, 2  ;;  %p10670_p3 = scmp.eq.s32.totalorder %s8637_s28, 1 }
  0x58   : > { %s8766_s18 = scalar_select %p30_p4, %s8558_s26, %s32_s17  }
  0x59   : > { %p41_p10 = por %p40_p13, %p39_p8  ;;  %p8770_p5 = por %p10670_p3, %p39_p8 }
  0x5a   : > { %s269_s20 = sand.u32 1, %s8558_s26   ;;  %s5990_s21 = sshll.u32 %s8562_s27, 11 }
  0x5b   : > { %s5634_s16 = sshll.u32 %s269_s20, 7  ;;  %s8779_s10 = scalar_lea.hbm %s10646_s0, %s5990_s21 }
  0x5c   : > { %s273_s11 = scalar_lea.vmem [#allocation2], %s5634_s16  ;;  %p8781_p11 = pnand %p7758_p6, %p41_p10 }
  0x5d   : > { %s281_s14 = sshll.u32 %s273_s11, 4  ;;  %s8787_s12 = scalar_lea.sflag [#allocation3], %s269_s20  ;;  %s8785_s14 = int_to_ptr.vmem [resolvable:$true] %s281_s14 }
  0x5e   : > { %s8458_s17 = scalar_lea.hbm %s8779_s10, 2048  ;;  %p8460_p9 = pneg %p8781_p11 }
  0x5f   : > { %p8459_p7 = scmp.ne.s32.totalorder %s8779_s10, %s8458_s17  ;;  %s8463_s23 = scalar_lea.hbm %s10646_s0, 4096 }
  0x60   : > { %p8464_p1 = scmp.lt.u32.totalorder %s8779_s10, %s10646_s0  ;;  %p8465_p2 = scmp.lt.u32.totalorder %s8463_s23, %s8458_s17 }
  0x61   : > { %p8461_p12 = pnand %p8460_p9, %p8459_p7  ;;  %p8467_p8 = scmp.lt.u32.totalorder %s8458_s17, %s8779_s10 }
  0x62   : > { %p8466_p4 = por %p8465_p2, %p8464_p1 }
  0x63   : > { %p8462_p0 = pneg %p8461_p12 }
  0x64   : > { %p8468_p13 = por %p8467_p8, %p8466_p4 }
  0x66   : > { %p8469_p6 = pnand %p8468_p13, %p8462_p0 }
  0x68   : > { %8472 = shalt.err (!%p8469_p6)
}
  0x69   : > { %s8473_s20 = scalar_lea.vmem %s8785_s14, 2048  ;;  %s8569_s21 = smov [#allocation2]  }
  0x6a   : > { %p8474_p10 = scmp.ne.s32.totalorder %s8785_s14, %s8473_s20  ;;  %s8478_s16 = sshll.u32 %s8569_s21, 4  ;;  %s8479_s16 = int_to_ptr.vmem [resolvable:$false] %s8478_s16 }
  0x6b   : > { %s8480_s29 = scalar_lea.vmem %s8479_s16, 4096  ;;  %p8481_p12 = scmp.lt.s32.totalorder %s8785_s14, %s8479_s16 }
  0x6c   : > { %p8476_p3 = pnand %p8474_p10, %p8460_p9  ;;  %p8482_p1 = scmp.lt.s32.totalorder %s8480_s29, %s8473_s20 }
  0x6e   : > { %p8477_p7 = pneg %p8476_p3  ;;  %p8483_p2 = por %p8482_p1, %p8481_p12 }
  0x70   : > { %p8484_p4 = pnand %p8483_p2, %p8477_p7 }
  0x72   : > { %8487 = shalt.err (!%p8484_p4)
}
  0x73   : > { %7750 = dma.hbm_to_vmem [thread:$0]  (!%p8781_p11), %s8779_s10, 2048, %s8785_s14, %s8787_s12, %s8567_s13, %s8567_s13, %s8568_s15  }
  0x74   : > { %p10673_p9 = scmp.ne.s32.totalorder %s10667_s9, 0 }
  0x76   : > { %293 = sbr.rel (%p10673_p9) target bundleno = 4792 (0x12b8), region = 48 }
  0x7d   : > { %s8821_s17 = sand.u32 1, %s8554_s25   ;;  %p10674_p0 = scmp.ne.s32.totalorder %s10664_s30, 0 }
  0x7e   : > { %s5639_s23 = sshll.u32 %s8821_s17, 7  ;;  %s296_s11 = scalar_lea.sflag [#allocation3], %s8821_s17 }
  0x7f   : > { %s8827_s8 = scalar_lea.vmem [#allocation2], %s5639_s23 }
  0x80   : > { %8533 = dma.done.wait (%p10674_p0), %s296_s11, 2048  }
  0x81   : > { %8535 = vsyncadd (%p10674_p0), %s296_s11, 4294965248  ;;  %p10675_p11 = scmp.eq.s32.totalorder %s8637_s28, 0 }
  0x83   : > { %8537 = dma.done.wait (%p10675_p11), [#allocation6], 5120   ;;  %p10676_p8 = pmov %p10675_p11 }
  0x85   : > { %8539 = vsyncadd (%p10676_p8), [#allocation6], 4294962176  ;;  %p10677_p13 = pmov %p10676_p8 }
  0x86   : > { %p10678_p6 = pmov %p10676_p8 }
  0x87   : > { %8541 = dma.done.wait (%p10677_p13), [#allocation9], 2048  }
  0x88   : > { %8543 = vsyncadd (%p10678_p6), [#allocation9], 4294965248  ;;  %vm360_vm0 = vcmask 523264   ;;  %v344_v0 = vld [vmem:[%s8827_s8] sm:$0xff]  ;;  %v346_v1 = vld [vmem:[%s8827_s8 + $0x10] sm:$0xff]  ;;  %vm1017_vm1 = vcmask 261120  }
  0x89   : > { %v345_v2 = vld [vmem:[%s8827_s8 + $0x8] sm:$0xff]  ;;  %v361_v3 = vsel %vm360_vm0, %v344_v0, 0.0  ;;  %v367_v4 = vsel %vm360_vm0, %v346_v1, 0.0  ;;  %v347_v5 = vld [vmem:[%s8827_s8 + $0x18] sm:$0xff]  ;;  %v348_v8 = vld [vmem:[%s8827_s8 + $0x20] sm:$0xff]  ;;  %s8570_s10 = smov 96  }
  0x8a   : > { %362 = vadd.xlane.f32.xlu0 %v361_v3  ;;  %368 = vadd.xlane.f32.xlu1 %v367_v4  ;;  %v364_v6 = vsel %vm360_vm0, %v345_v2, 0.0  ;;  %v370_v7 = vsel %vm360_vm0, %v347_v5, 0.0  ;;  %v349_v9 = vld [vmem:[%s8827_s8 + $0x28] sm:$0xff]  ;;  %v373_v10 = vsel %vm360_vm0, %v348_v8, 0.0  ;;  %v8854_v12 = vld [vmem:[%s8827_s8 + $0x30] sm:$0xff]  ;;  %v8857_v13 = vld [vmem:[%s8827_s8 + $0x38] sm:$0xff] }
  0x8b   : > { %v376_v11 = vsel %vm360_vm0, %v349_v9, 0.0  ;;  %v379_v14 = vsel %vm360_vm0, %v8854_v12, 0.0  ;;  %v382_v15 = vsel %vm360_vm0, %v8857_v13, 0.0  ;;  %v8864_v16 = vld [vmem:[%s8827_s8 + $0x40] sm:$0xff]  ;;  %v8867_v17 = vld [vmem:[%s8827_s8 + $0x48] sm:$0xff]  ;;  %v8874_v20 = vld [vmem:[%s8827_s8 + $0x50] sm:$0xff] }
  0x8c   : > { %v385_v18 = vsel %vm360_vm0, %v8864_v16, 0.0  ;;  %v388_v19 = vsel %vm360_vm0, %v8867_v17, 0.0  ;;  %v8877_v21 = vld [vmem:[%s8827_s8 + $0x58] sm:$0xff]  ;;  %v391_v22 = vsel %vm360_vm0, %v8874_v20, 0.0  ;;  %v8884_v24 = vld [vmem:[%s8827_s8 + $0x60] sm:$0xff]  ;;  %v8887_v25 = vld [vmem:[%s8827_s8 + $0x68] sm:$0xff] }
  0x8d   : > { %v394_v23 = vsel %vm360_vm0, %v8877_v21, 0.0  ;;  %v397_v26 = vsel %vm360_vm0, %v8884_v24, 0.0  ;;  %v400_v27 = vsel %vm360_vm0, %v8887_v25, 0.0  ;;  %v8894_v28 = vld [vmem:[%s8827_s8 + $0x70] sm:$0xff]  ;;  %v8897_v29 = vld [vmem:[%s8827_s8 + $0x78] sm:$0xff]  ;;  %vm9284_vm2 = vmpackc.low %vm1017_vm1, %vm1017_vm1  ;;  %s8571_s20 = smov 64  }
  0x8e   : > { %365 = vadd.xlane.f32.xlu0 %v364_v6  ;;  %371 = vadd.xlane.f32.xlu1 %v370_v7  ;;  %v403_v30 = vsel %vm360_vm0, %v8894_v28, 0.0  ;;  %v406_v31 = vsel %vm360_vm0, %v8897_v29, 0.0  ;;  %s8572_s21 = smov 32   ;;  %s10563_s11 = scalar_lea.vmem [#allocation10], %s5639_s23 }
  0x8f   : > { %s5992_s23 = sshll.u32 %s8637_s28, 11  ;;  %s5526_s8 = sshll.u32 %s10563_s11, 4  ;;  %s10599_s8 = int_to_ptr.vmem [resolvable:$true] %s5526_s8 }
  0x90   : > { %s10597_s13 = scalar_lea.hbm %s10653_s7, %s5992_s23  ;;  %s5512_s28 = scalar_lea.sflag [#allocation4], %s8821_s17 }
  0x91   : > { %s8488_s15 = scalar_lea.vmem %s10599_s8, 2048 }
  0x92   : > { %374 = vadd.xlane.f32.xlu0 %v373_v10  ;;  %377 = vadd.xlane.f32.xlu1 %v376_v11  ;;  %p8489_p10 = scmp.ne.s32.totalorder %s10599_s8, %s8488_s15 }
  0x94   : > { %p8490_p3 = pnand %p8489_p10, %p8770_p5 }
  0x96   : > { %380 = vadd.xlane.f32.xlu0 %v379_v14  ;;  %383 = vadd.xlane.f32.xlu1 %v382_v15  ;;  %p8491_p7 = pneg %p8490_p3 }
  0x9a   : > { %386 = vadd.xlane.f32.xlu0 %v385_v18  ;;  %389 = vadd.xlane.f32.xlu1 %v388_v19 }
  0x9e   : > { %392 = vadd.xlane.f32.xlu0 %v391_v22  ;;  %395 = vadd.xlane.f32.xlu1 %v394_v23 }
  0xa2   : > { %398 = vadd.xlane.f32.xlu0 %v397_v26  ;;  %401 = vadd.xlane.f32.xlu1 %v400_v27 }
  0xa6   : > { %404 = vadd.xlane.f32.xlu0 %v403_v30  ;;  %407 = vadd.xlane.f32.xlu1 %v406_v31 }
 0x117   : > { %v363_v32 = vpop.xlane.xlu0 %362  ;;  %v369_v33 = vpop.xlane.xlu1 %368 }
 0x118   : > { %v410_v34 = vmul.f32 0.015625, %v363_v32  ;;  %v412_v35 = vmul.f32 0.015625, %v369_v33 }
 0x11a   : > { %v8903_v36 = vsub.f32 %v344_v0, %v410_v34  ;;  %v8905_v37 = vsub.f32 %v346_v1, %v412_v35 }
 0x11b   : > { %v366_v38 = vpop.xlane.xlu0 %365  ;;  %v372_v39 = vpop.xlane.xlu1 %371 }
 0x11c   : > { %v411_v40 = vmul.f32 0.015625, %v366_v38  ;;  %v413_v41 = vmul.f32 0.015625, %v372_v39  ;;  %v442_v42 = vmul.f32 %v8903_v36, %v8903_v36  ;;  %v444_v43 = vmul.f32 %v8905_v37, %v8905_v37 }
 0x11e   : > { %v8911_v44 = vsub.f32 %v345_v2, %v411_v40  ;;  %v8913_v45 = vsub.f32 %v347_v5, %v413_v41  ;;  %v458_v46 = vsel %vm360_vm0, %v442_v42, 0.0  ;;  %v464_v49 = vsel %vm360_vm0, %v444_v43, 0.0 }
 0x11f   : > { %459 = vadd.xlane.f32.xlu0 %v458_v46  ;;  %v375_v47 = vpop.xlane.xlu0 %374  ;;  %v378_v48 = vpop.xlane.xlu1 %377 }
 0x120   : > { %v414_v50 = vmul.f32 0.015625, %v375_v47  ;;  %v415_v51 = vmul.f32 0.015625, %v378_v48  ;;  %v443_v52 = vmul.f32 %v8911_v44, %v8911_v44  ;;  %v445_v53 = vmul.f32 %v8913_v45, %v8913_v45  ;;  %v616_v47 = vld [vmem:[#allocation7] sm:$0xff]  ;;  %v617_v48 = vld [vmem:[#allocation7 + $0x8] sm:$0xff] }
 0x122   : > { %v8921_v54 = vsub.f32 %v348_v8, %v414_v50  ;;  %v8923_v55 = vsub.f32 %v349_v9, %v415_v51  ;;  %v461_v56 = vsel %vm360_vm0, %v443_v52, 0.0  ;;  %v467_v59 = vsel %vm360_vm0, %v445_v53, 0.0  ;;  %v841_v50 = vld [vmem:[#allocation5 + $0x8] sm:$0xff] }
 0x123   : > { %465 = vadd.xlane.f32.xlu0 %v464_v49  ;;  %462 = vadd.xlane.f32.xlu1 %v461_v56  ;;  %v381_v57 = vpop.xlane.xlu0 %380  ;;  %v384_v58 = vpop.xlane.xlu1 %383  ;;  %v7225_v49 = vpack.c.bf16 %v617_v48, %v616_v47 }
 0x124   : > { %v416_v60 = vmul.f32 0.015625, %v381_v57  ;;  %v417_v61 = vmul.f32 0.015625, %v384_v58  ;;  %v446_v62 = vmul.f32 %v8921_v54, %v8921_v54  ;;  %v447_v63 = vmul.f32 %v8923_v55, %v8923_v55 }
 0x125   : > { %7226 = vmatprep.subr.bf16.mxu0 %v7225_v49 }
 0x126   : > { %v8932_v0 = vsub.f32 %v8854_v12, %v416_v60  ;;  %v8935_v1 = vsub.f32 %v8857_v13, %v417_v61  ;;  %v470_v2 = vsel %vm360_vm0, %v446_v62, 0.0  ;;  %v473_v5 = vsel %vm360_vm0, %v447_v63, 0.0  ;;  %v618_v60 = vld [vmem:[#allocation7 + $0x10] sm:$0xff]  ;;  %7228 = vmatpush3.bf16.msra.mxu0 %v7225_v49  ;;  %v843_v62 = vld [vmem:[#allocation5 + $0x18] sm:$0xff] }
 0x127   : > { %468 = vadd.xlane.f32.xlu1 %v467_v59  ;;  %471 = vadd.xlane.f32.xlu0 %v470_v2  ;;  %v387_v3 = vpop.xlane.xlu0 %386  ;;  %v390_v4 = vpop.xlane.xlu1 %389  ;;  %v842_v61 = vld [vmem:[#allocation5 + $0x10] sm:$0xff] }
 0x128   : > { %v418_v6 = vmul.f32 0.015625, %v387_v3  ;;  %v419_v7 = vmul.f32 0.015625, %v390_v4  ;;  %v448_v8 = vmul.f32 %v8932_v0, %v8932_v0  ;;  %v449_v9 = vmul.f32 %v8935_v1, %v8935_v1  ;;  %v620_v4 = vld [vmem:[#allocation7 + $0x20] sm:$0xff] }
 0x129   : > { %v7245_v2 = vpack.c.bf16 %v843_v62, %v842_v61 }
 0x12a   : > { %v8944_v10 = vsub.f32 %v8864_v16, %v418_v6  ;;  %v8947_v11 = vsub.f32 %v8867_v17, %v419_v7  ;;  %v476_v12 = vsel %vm360_vm0, %v448_v8, 0.0  ;;  %v479_v15 = vsel %vm360_vm0, %v449_v9, 0.0  ;;  %v844_v6 = vld [vmem:[#allocation5 + $0x20] sm:$0xff]  ;;  %v845_v8 = vld [vmem:[#allocation5 + $0x28] sm:$0xff] }
 0x12b   : > { %474 = vadd.xlane.f32.xlu1 %v473_v5  ;;  %477 = vadd.xlane.f32.xlu0 %v476_v12  ;;  %v393_v13 = vpop.xlane.xlu0 %392  ;;  %v396_v14 = vpop.xlane.xlu1 %395  ;;  %v621_v5 = vld [vmem:[#allocation7 + $0x28] sm:$0xff]  ;;  %v7249_v9 = vpack.c.bf16 %v845_v8, %v844_v6  ;;  %v622_v12 = vld [vmem:[#allocation7 + $0x30] sm:$0xff] }
 0x12c   : > { %v420_v18 = vmul.f32 0.015625, %v393_v13  ;;  %v421_v19 = vmul.f32 0.015625, %v396_v14  ;;  %v450_v22 = vmul.f32 %v8944_v10, %v8944_v10  ;;  %v451_v16 = vmul.f32 %v8947_v11, %v8947_v11  ;;  %v623_v13 = vld [vmem:[#allocation7 + $0x38] sm:$0xff] }
 0x12d   : > { %v7233_v7 = vpack.c.bf16 %v621_v5, %v620_v4  ;;  %v7237_v14 = vpack.c.bf16 %v623_v13, %v622_v12 }
 0x12e   : > { %v8956_v23 = vsub.f32 %v8874_v20, %v420_v18  ;;  %v8959_v17 = vsub.f32 %v8877_v21, %v421_v19  ;;  %v482_v26 = vsel %vm360_vm0, %v450_v22, 0.0  ;;  %v485_v31 = vsel %vm360_vm0, %v451_v16, 0.0  ;;  %v847_v18 = vld [vmem:[#allocation5 + $0x38] sm:$0xff] }
 0x12f   : > { %480 = vadd.xlane.f32.xlu1 %v479_v15  ;;  %483 = vadd.xlane.f32.xlu0 %v482_v26  ;;  %v399_v27 = vpop.xlane.xlu0 %398  ;;  %v402_v30 = vpop.xlane.xlu1 %401  ;;  %v846_v15 = vld [vmem:[#allocation5 + $0x30] sm:$0xff] }
 0x130   : > { %v422_v32 = vmul.f32 0.015625, %v399_v27  ;;  %v423_v33 = vmul.f32 0.015625, %v402_v30  ;;  %v452_v34 = vmul.f32 %v8956_v23, %v8956_v23  ;;  %v453_v20 = vmul.f32 %v8959_v17, %v8959_v17 }
 0x131   : > { %v7253_v19 = vpack.c.bf16 %v847_v18, %v846_v15 }
 0x132   : > { %v8968_v35 = vsub.f32 %v8884_v24, %v422_v32  ;;  %v8971_v21 = vsub.f32 %v8887_v25, %v423_v33  ;;  %v488_v38 = vsel %vm360_vm0, %v452_v34, 0.0  ;;  %v491_v41 = vsel %vm360_vm0, %v453_v20, 0.0  ;;  %v840_v25 = vld [vmem:[#allocation5] sm:$0xff] }
 0x133   : > { %486 = vadd.xlane.f32.xlu1 %v485_v31  ;;  %489 = vadd.xlane.f32.xlu0 %v488_v38  ;;  %v405_v39 = vpop.xlane.xlu0 %404  ;;  %v408_v40 = vpop.xlane.xlu1 %407  ;;  %v7241_v56 = vpack.c.bf16 %v841_v50, %v840_v25  ;;  %v8996_v50 = vld [vmem:[%s10647_s1] ss:$0 sm:$0xff] }
 0x134   : > { %v424_v42 = vmul.f32 0.015625, %v405_v39  ;;  %v425_v43 = vmul.f32 0.015625, %v408_v40  ;;  %v454_v46 = vmul.f32 %v8968_v35, %v8968_v35  ;;  %v455_v24 = vmul.f32 %v8971_v21, %v8971_v21 }
 0x135   : > { %7242 = vmatprep.subr.bf16.mxu1 %v7241_v56 }
 0x136   : > { %v8980_v51 = vsub.f32 %v8894_v28, %v424_v42  ;;  %v8983_v52 = vsub.f32 %v8897_v29, %v425_v43  ;;  %v494_v53 = vsel %vm360_vm0, %v454_v46, 0.0  ;;  %v497_v57 = vsel %vm360_vm0, %v455_v24, 0.0  ;;  %v619_v28 = vld [vmem:[#allocation7 + $0x18] sm:$0xff]  ;;  %7244 = vmatpush3.bf16.msra.mxu1 %v7241_v56 }
 0x137   : > { %492 = vadd.xlane.f32.xlu1 %v491_v41  ;;  %495 = vadd.xlane.f32.xlu0 %v494_v53  ;;  %v7229_v29 = vpack.c.bf16 %v619_v28, %v618_v60  ;;  %v9002_v60 = vld [vmem:[%s10648_s2] ss:$0 sm:$0xff] }
 0x138   : > { %v456_v58 = vmul.f32 %v8980_v51, %v8980_v51  ;;  %v457_v59 = vmul.f32 %v8983_v52, %v8983_v52  ;;  %7246 = vmatprep.subr.bf16.mxu1 %v7245_v2 }
 0x139   : > { %7230 = vmatprep.subr.bf16.mxu0 %v7229_v29 }
 0x13a   : > { %v500_v63 = vsel %vm360_vm0, %v456_v58, 0.0  ;;  %v503_v3 = vsel %vm360_vm0, %v457_v59, 0.0  ;;  %7232 = vmatpush3.bf16.msra.mxu0 %v7229_v29  ;;  %7248 = vmatpush3.bf16.msra.mxu1 %v7245_v2 }
 0x13b   : > { %498 = vadd.xlane.f32.xlu1 %v497_v57  ;;  %501 = vadd.xlane.f32.xlu0 %v500_v63 }
 0x13c   : > { %7234 = vmatprep.subr.bf16.mxu0 %v7233_v7  ;;  %7250 = vmatprep.subr.bf16.mxu1 %v7249_v9 }
 0x13e   : > { %7236 = vmatpush3.bf16.msra.mxu0 %v7233_v7  ;;  %7252 = vmatpush3.bf16.msra.mxu1 %v7249_v9 }
 0x13f   : > { %504 = vadd.xlane.f32.xlu1 %v503_v3  ;;  %7238 = vmatprep.subr.bf16.mxu0 %v7237_v14 }
 0x140   : > { %7254 = vmatprep.subr.bf16.mxu1 %v7253_v19 }
 0x142   : > { %7240 = vmatpush3.bf16.msra.mxu0 %v7237_v14  ;;  %7256 = vmatpush3.bf16.msra.mxu1 %v7253_v19 }
 0x1ac   : > { %v460_v22 = vpop.xlane.xlu0 %459 }
 0x1ad   : > { %v506_v16 = vmul.f32 0.015625, %v460_v22 }
 0x1af   : > { %v522_v26 = vadd.f32 1e-05, %v506_v16 }
 0x1b0   : > { %v463_v27 = vpop.xlane.xlu1 %462  ;;  %v466_v30 = vpop.xlane.xlu0 %465 }
 0x1b1   : > { %8085 = vrsqrt.f32 %v522_v26  ;;  %v507_v31 = vmul.f32 0.015625, %v463_v27  ;;  %v508_v32 = vmul.f32 0.015625, %v466_v30 }
 0x1b3   : > { %v523_v33 = vadd.f32 1e-05, %v507_v31  ;;  %v524_v34 = vadd.f32 1e-05, %v508_v32 }
 0x1b4   : > { %v469_v20 = vpop.xlane.xlu1 %468  ;;  %v472_v38 = vpop.xlane.xlu0 %471 }
 0x1b5   : > { %8087 = vrsqrt.f32 %v523_v33  ;;  %v509_v39 = vmul.f32 0.015625, %v469_v20  ;;  %v510_v40 = vmul.f32 0.015625, %v472_v38 }
 0x1b6   : > { %8089 = vrsqrt.f32 %v524_v34 }
 0x1b7   : > { %v525_v41 = vadd.f32 1e-05, %v509_v39  ;;  %v526_v42 = vadd.f32 1e-05, %v510_v40 }
 0x1b8   : > { %v475_v43 = vpop.xlane.xlu1 %474  ;;  %v478_v46 = vpop.xlane.xlu0 %477 }
 0x1b9   : > { %8091 = vrsqrt.f32 %v525_v41  ;;  %v511_v24 = vmul.f32 0.015625, %v475_v43  ;;  %v512_v47 = vmul.f32 0.015625, %v478_v46 }
 0x1ba   : > { %8093 = vrsqrt.f32 %v526_v42 }
 0x1bb   : > { %v8086_v48 = vpop.eup %8085  ;;  %v527_v25 = vadd.f32 1e-05, %v511_v24  ;;  %v528_v49 = vadd.f32 1e-05, %v512_v47 }
 0x1bc   : > { %v554_v53 = vmul.f32 %v8086_v48, %v8903_v36  ;;  %v481_v56 = vpop.xlane.xlu1 %480  ;;  %v484_v57 = vpop.xlane.xlu0 %483 }
 0x1bd   : > { %8095 = vrsqrt.f32 %v527_v25  ;;  %v513_v58 = vmul.f32 0.015625, %v481_v56  ;;  %v514_v59 = vmul.f32 0.015625, %v484_v57 }
 0x1be   : > { %8097 = vrsqrt.f32 %v528_v49  ;;  %v577_v28 = vmul.f32 %v8996_v50, %v554_v53 }
 0x1bf   : > { %v8088_v61 = vpop.eup %8087  ;;  %v529_v29 = vadd.f32 1e-05, %v513_v58  ;;  %v530_v62 = vadd.f32 1e-05, %v514_v59 }
 0x1c0   : > { %v8090_v63 = vpop.eup %8089  ;;  %v555_v2 = vmul.f32 %v8088_v61, %v8911_v44  ;;  %v487_v36 = vpop.xlane.xlu1 %486  ;;  %v9007_v4 = vadd.f32 %v9002_v60, %v577_v28 }
 0x1c1   : > { %v490_v3 = vpop.xlane.xlu0 %489  ;;  %v556_v5 = vmul.f32 %v8090_v63, %v8905_v37  ;;  %8099 = vrsqrt.f32 %v529_v29  ;;  %v515_v6 = vmul.f32 0.015625, %v487_v36 }
 0x1c2   : > { %v516_v7 = vmul.f32 0.015625, %v490_v3  ;;  %8101 = vrsqrt.f32 %v530_v62  ;;  %6465 = vmatprep.mubr.msk.f32.mxu0 %vm360_vm0, %v9007_v4  ;;  %6505 = vmatprep.mubr.msk.f32.mxu1 %vm360_vm0, %v9007_v4  ;;  %v578_v8 = vmul.f32 %v8996_v50, %v555_v2 }
 0x1c3   : > { %v8092_v44 = vpop.eup %8091  ;;  %v531_v9 = vadd.f32 1e-05, %v515_v6  ;;  %v579_v13 = vmul.f32 %v8996_v50, %v556_v5 }
 0x1c4   : > { %v532_v12 = vadd.f32 1e-05, %v516_v7  ;;  %v8094_v14 = vpop.eup %8093  ;;  %v557_v37 = vmul.f32 %v8092_v44, %v8913_v45  ;;  %v493_v15 = vpop.xlane.xlu1 %492  ;;  %v9018_v19 = vadd.f32 %v9002_v60, %v578_v8 }
 0x1c5   : > { %v496_v18 = vpop.xlane.xlu0 %495  ;;  %v558_v22 = vmul.f32 %v8094_v14, %v8921_v54  ;;  %8103 = vrsqrt.f32 %v531_v9  ;;  %v517_v16 = vmul.f32 0.015625, %v493_v15  ;;  %v9026_v27 = vadd.f32 %v9002_v60, %v579_v13 }
 0x1c6   : > { %v518_v26 = vmul.f32 0.015625, %v496_v18  ;;  %8105 = vrsqrt.f32 %v532_v12  ;;  %6466 = vmatmul.mubr.msk.f32.vlgmr.msra.gmra.mrb[0].mxu0 %vm360_vm0, %v9018_v19  ;;  %6506 = vmatmul.mubr.msk.f32.vlgmr.msra.gmra.mrb[0].mxu1 %vm360_vm0, %v9018_v19  ;;  %v580_v45 = vmul.f32 %v8996_v50, %v557_v37 }
 0x1c7   : > { %v8096_v30 = vpop.eup %8095  ;;  %v533_v31 = vadd.f32 1e-05, %v517_v16  ;;  %v581_v54 = vmul.f32 %v8996_v50, %v558_v22  ;;  %6468 = vmatprep.mubr.msk.f32.mxu0 %vm360_vm0, %v9026_v27  ;;  %6508 = vmatprep.mubr.msk.f32.mxu1 %vm360_vm0, %v9026_v27 }
 0x1c8   : > { %v534_v32 = vadd.f32 1e-05, %v518_v26  ;;  %v8098_v33 = vpop.eup %8097  ;;  %v559_v34 = vmul.f32 %v8096_v30, %v8923_v55  ;;  %v499_v20 = vpop.xlane.xlu1 %498  ;;  %v9036_v39 = vadd.f32 %v9002_v60, %v580_v45 }
 0x1c9   : > { %v502_v38 = vpop.xlane.xlu0 %501  ;;  %v560_v40 = vmul.f32 %v8098_v33, %v8932_v0  ;;  %8107 = vrsqrt.f32 %v533_v31  ;;  %v519_v41 = vmul.f32 0.015625, %v499_v20  ;;  %v9044_v55 = vadd.f32 %v9002_v60, %v581_v54 }
 0x1ca   : > { %v520_v42 = vmul.f32 0.015625, %v502_v38  ;;  %8109 = vrsqrt.f32 %v534_v32  ;;  %6469 = vmatmul.mubr.msk.f32.gmra.mrb[2].mxu0 %vm360_vm0, %v9036_v39  ;;  %6509 = vmatmul.mubr.msk.f32.gmra.mrb[2].mxu1 %vm360_vm0, %v9036_v39  ;;  %v582_v43 = vmul.f32 %v8996_v50, %v559_v34 }
 0x1cb   : > { %v8100_v46 = vpop.eup %8099  ;;  %v535_v24 = vadd.f32 1e-05, %v519_v41  ;;  %v583_v0 = vmul.f32 %v8996_v50, %v560_v40  ;;  %6471 = vmatprep.mubr.msk.f32.mxu0 %vm360_vm0, %v9044_v55  ;;  %6511 = vmatprep.mubr.msk.f32.mxu1 %vm360_vm0, %v9044_v55 }
 0x1cc   : > { %v536_v47 = vadd.f32 1e-05, %v520_v42  ;;  %v8102_v48 = vpop.eup %8101  ;;  %v561_v25 = vmul.f32 %v8100_v46, %v8935_v1  ;;  %v505_v49 = vpop.xlane.xlu1 %504  ;;  %v9054_v53 = vadd.f32 %v9002_v60, %v582_v43 }
 0x1cd   : > { %v562_v56 = vmul.f32 %v8102_v48, %v8944_v10  ;;  %8111 = vrsqrt.f32 %v535_v24  ;;  %v521_v57 = vmul.f32 0.015625, %v505_v49  ;;  %v9058_v58 = vadd.f32 %v9002_v60, %v583_v0 }
 0x1ce   : > { %8113 = vrsqrt.f32 %v536_v47  ;;  %6472 = vmatmul.mubr.msk.f32.gmra.mrb[4].mxu0 %vm360_vm0, %v9054_v53  ;;  %6512 = vmatmul.mubr.msk.f32.gmra.mrb[4].mxu1 %vm360_vm0, %v9054_v53  ;;  %v584_v1 = vmul.f32 %v8996_v50, %v561_v25 }
 0x1cf   : > { %v8104_v59 = vpop.eup %8103  ;;  %v537_v28 = vadd.f32 1e-05, %v521_v57  ;;  %6474 = vmatprep.mubr.msk.f32.mxu0 %vm360_vm0, %v9058_v58  ;;  %6514 = vmatprep.mubr.msk.f32.mxu1 %vm360_vm0, %v9058_v58  ;;  %v585_v10 = vmul.f32 %v8996_v50, %v562_v56 }
 0x1d0   : > { %v8106_v61 = vpop.eup %8105  ;;  %v563_v29 = vmul.f32 %v8104_v59, %v8947_v11  ;;  %v9072_v62 = vadd.f32 %v9002_v60, %v584_v1 }
 0x1d1   : > { %v564_v63 = vmul.f32 %v8106_v61, %v8956_v23  ;;  %8115 = vrsqrt.f32 %v537_v28  ;;  %v9076_v2 = vadd.f32 %v9002_v60, %v585_v10 }
 0x1d2   : > { %6475 = vmatmul.mubr.msk.f32.gmra.mrb[6].mxu0 %vm360_vm0, %v9072_v62  ;;  %6515 = vmatmul.mubr.msk.f32.gmra.mrb[6].mxu1 %vm360_vm0, %v9072_v62  ;;  %v586_v36 = vmul.f32 %v8996_v50, %v563_v29 }
 0x1d3   : > { %v8108_v3 = vpop.eup %8107  ;;  %6477 = vmatprep.mubr.msk.f32.mxu0 %vm360_vm0, %v9076_v2  ;;  %6517 = vmatprep.mubr.msk.f32.mxu1 %vm360_vm0, %v9076_v2  ;;  %v587_v11 = vmul.f32 %v8996_v50, %v564_v63  ;;  %v5662_v63 = vld [vmem:[%s10652_s6] ss:$0 sm:$0xff] }
 0x1d4   : > { %v8110_v23 = vpop.eup %8109  ;;  %v565_v5 = vmul.f32 %v8108_v3, %v8959_v17  ;;  %v9090_v6 = vadd.f32 %v9002_v60, %v586_v36 }
 0x1d5   : > { %v566_v7 = vmul.f32 %v8110_v23, %v8968_v35  ;;  %v9094_v8 = vadd.f32 %v9002_v60, %v587_v11 }
 0x1d6   : > { %6478 = vmatmul.mubr.msk.f32.gmra.mrb[8].mxu0 %vm360_vm0, %v9090_v6  ;;  %6518 = vmatmul.mubr.msk.f32.gmra.mrb[8].mxu1 %vm360_vm0, %v9090_v6  ;;  %v588_v44 = vmul.f32 %v8996_v50, %v565_v5 }
 0x1d7   : > { %v8112_v9 = vpop.eup %8111  ;;  %6480 = vmatprep.mubr.msk.f32.mxu0 %vm360_vm0, %v9094_v8  ;;  %6520 = vmatprep.mubr.msk.f32.mxu1 %vm360_vm0, %v9094_v8  ;;  %v589_v17 = vmul.f32 %v8996_v50, %v566_v7 }
 0x1d8   : > { %v8114_v35 = vpop.eup %8113  ;;  %v567_v12 = vmul.f32 %v8112_v9, %v8971_v21  ;;  %v9108_v13 = vadd.f32 %v9002_v60, %v588_v44 }
 0x1d9   : > { %v568_v14 = vmul.f32 %v8114_v35, %v8980_v51  ;;  %v9112_v37 = vadd.f32 %v9002_v60, %v589_v17 }
 0x1da   : > { %6481 = vmatmul.mubr.msk.f32.gmra.mrb[10].mxu0 %vm360_vm0, %v9108_v13  ;;  %6521 = vmatmul.mubr.msk.f32.gmra.mrb[10].mxu1 %vm360_vm0, %v9108_v13  ;;  %v590_v15 = vmul.f32 %v8996_v50, %v567_v12 }
 0x1db   : > { %v8116_v18 = vpop.eup %8115  ;;  %6483 = vmatprep.mubr.msk.f32.mxu0 %vm360_vm0, %v9112_v37  ;;  %6523 = vmatprep.mubr.msk.f32.mxu1 %vm360_vm0, %v9112_v37  ;;  %v591_v21 = vmul.f32 %v8996_v50, %v568_v14 }
 0x1dc   : > { %v569_v51 = vmul.f32 %v8116_v18, %v8983_v52  ;;  %v9126_v22 = vadd.f32 %v9002_v60, %v590_v15 }
 0x1dd   : > { %v9129_v16 = vadd.f32 %v9002_v60, %v591_v21 }
 0x1de   : > { %6484 = vmatmul.mubr.msk.f32.gmra.mrb[12].mxu0 %vm360_vm0, %v9126_v22  ;;  %6524 = vmatmul.mubr.msk.f32.gmra.mrb[12].mxu1 %vm360_vm0, %v9126_v22  ;;  %v592_v26 = vmul.f32 %v8996_v50, %v569_v51 }
 0x1df   : > { %6486 = vmatprep.mubr.msk.f32.mxu0 %vm360_vm0, %v9129_v16  ;;  %6526 = vmatprep.mubr.msk.f32.mxu1 %vm360_vm0, %v9129_v16 }
 0x1e0   : > { %v9141_v52 = vadd.f32 %v9002_v60, %v592_v26 }
 0x1e2   : > { %6487 = vmatmul.mubr.msk.f32.gmra.mrb[14].mxu0 %vm360_vm0, %v9141_v52  ;;  %6527 = vmatmul.mubr.msk.f32.gmra.mrb[14].mxu1 %vm360_vm0, %v9141_v52 }
 0x299   : > { %v9147_v45 = vpop.f32.mrb[0].mxu0  ;;  %v9149_v30 = vpop.f32.mrb[0].mxu1 }
 0x29a   : > { %v9151_v50 = vpop.f32.mrb[1].mxu0  ;;  %v914_v31 = vpop.f32.mrb[1].mxu1 }
 0x29b   : > { %v7805_v32 = vpack.i.bf16 %v9149_v30, %v914_v31  ;;  %6545 = vmatprep.mubr.msk.f32.mxu0 %vm1017_vm1, %v914_v31  ;;  %v9157_v60 = vpack.c.bf16 %v9147_v45, %v9151_v50  ;;  %v9161_v54 = vpack.i.bf16 %v9147_v45, %v9151_v50 }
 0x29d   : > { %7806 = vrot.lane.b32.xlu0 %v7805_v32, %s8570_s10  ;;  %v9164_v33 = vpop.f32.mrb[2].mxu0  ;;  %v9166_v34 = vpop.f32.mrb[2].mxu1 }
 0x29e   : > { %10679 = vst [vmem:[#allocation16_spill] sm:$0xff] %v9164_v33  ;;  %v9168_v20 = vpop.f32.mrb[3].mxu0  ;;  %v9170_v38 = vpop.f32.mrb[3].mxu1 }
 0x29f   : > { %10680 = vst [vmem:[#allocation17_spill] sm:$0xff] %v9168_v20  ;;  %v7810_v40 = vpack.i.bf16 %v9166_v34, %v9170_v38  ;;  %v9176_v41 = vpack.c.bf16 %v9164_v33, %v9168_v20  ;;  %v9180_v42 = vpack.i.bf16 %v9164_v33, %v9168_v20 }
 0x2a1   : > { %7811 = vrot.lane.b32.xlu1 %v7810_v40, %s8570_s10  ;;  %v9183_v43 = vpop.f32.mrb[4].mxu0  ;;  %v9185_v46 = vpop.f32.mrb[4].mxu1 }
 0x2a2   : > { %10681 = vst [vmem:[#allocation18_spill] sm:$0xff] %v9183_v43  ;;  %v9187_v24 = vpop.f32.mrb[5].mxu0  ;;  %v9189_v47 = vpop.f32.mrb[5].mxu1 }
 0x2a3   : > { %10682 = vst [vmem:[#allocation19_spill] sm:$0xff] %v9187_v24  ;;  %v7815_v0 = vpack.i.bf16 %v9185_v46, %v9189_v47  ;;  %v9195_v48 = vpack.c.bf16 %v9183_v43, %v9187_v24  ;;  %v9199_v25 = vpack.i.bf16 %v9183_v43, %v9187_v24 }
 0x2a5   : > { %7816 = vrot.lane.b32.xlu1 %v7815_v0, %s8570_s10  ;;  %v9202_v49 = vpop.f32.mrb[6].mxu0  ;;  %v9204_v56 = vpop.f32.mrb[6].mxu1 }
 0x2a6   : > { %10683 = vst [vmem:[#allocation20_spill] sm:$0xff] %v9202_v49  ;;  %v9206_v57 = vpop.f32.mrb[7].mxu0  ;;  %v9208_v1 = vpop.f32.mrb[7].mxu1 }
 0x2a7   : > { %10684 = vst [vmem:[#allocation21_spill] sm:$0xff] %v9206_v57  ;;  %v7825_v59 = vpack.i.bf16 %v9204_v56, %v9208_v1  ;;  %v9214_v28 = vpack.c.bf16 %v9202_v49, %v9206_v57  ;;  %v9218_v10 = vpack.i.bf16 %v9202_v49, %v9206_v57 }
 0x2a9   : > { %7826 = vrot.lane.b32.xlu0 %v7825_v59, %s8570_s10  ;;  %v6479_v61 = vpop.f32.mrb[8].mxu0  ;;  %v9221_v29 = vpop.f32.mrb[8].mxu1 }
 0x2aa   : > { %v778_v36 = vpop.f32.mrb[9].mxu0  ;;  %v954_v3 = vpop.f32.mrb[9].mxu1  ;;  %v9226_v11 = vadd.f32 %v6479_v61, %v5662_v63 }
 0x2ab   : > { %v7820_v23 = vpack.i.bf16 %v9221_v29, %v954_v3  ;;  %6573 = vmatprep.mubr.msk.f32.mxu1 %vm1017_vm1, %v954_v3  ;;  %v9230_v5 = vpack.c.bf16 %v6479_v61, %v778_v36  ;;  %v9232_v7 = vpack.i.bf16 %v6479_v61, %v778_v36  ;;  %v9234_v44 = vadd.f32 %v5662_v63, %v778_v36 }
 0x2ac   : > { %10685 = vst [vmem:[#allocation22_spill] sm:$0xff] %v9226_v11 }
 0x2ad   : > { %10686 = vst [vmem:[#allocation23_spill] sm:$0xff] %v9234_v44  ;;  %7821 = vrot.lane.b32.xlu1 %v7820_v23, %s8570_s10  ;;  %v6482_v9 = vpop.f32.mrb[10].mxu0  ;;  %v9237_v17 = vpop.f32.mrb[10].mxu1 }
 0x2ae   : > { %v788_v35 = vpop.f32.mrb[11].mxu0  ;;  %v9239_v12 = vpop.f32.mrb[11].mxu1  ;;  %v9241_v14 = vadd.f32 %v6482_v9, %v5662_v63 }
 0x2af   : > { %v7830_v15 = vpack.i.bf16 %v9237_v17, %v9239_v12  ;;  %v9245_v18 = vpack.c.bf16 %v6482_v9, %v788_v35  ;;  %v9247_v21 = vpack.i.bf16 %v6482_v9, %v788_v35  ;;  %v9249_v51 = vadd.f32 %v5662_v63, %v788_v35 }
 0x2b0   : > { %10687 = vst [vmem:[#allocation24_spill] sm:$0xff] %v9241_v14 }
 0x2b1   : > { %10688 = vst [vmem:[#allocation25_spill] sm:$0xff] %v9249_v51  ;;  %7831 = vrot.lane.b32.xlu1 %v7830_v15, %s8570_s10  ;;  %v6485_v26 = vpop.f32.mrb[12].mxu0  ;;  %v9252_v31 = vpop.f32.mrb[12].mxu1 }
 0x2b2   : > { %v798_v32 = vpop.f32.mrb[13].mxu0  ;;  %v9254_v40 = vpop.f32.mrb[13].mxu1  ;;  %v9256_v0 = vadd.f32 %v6485_v26, %v5662_v63 }
 0x2b3   : > { %v7835_v59 = vpack.i.bf16 %v9252_v31, %v9254_v40  ;;  %v9260_v61 = vpack.c.bf16 %v6485_v26, %v798_v32  ;;  %v9262_v36 = vpack.i.bf16 %v6485_v26, %v798_v32  ;;  %v9264_v3 = vadd.f32 %v5662_v63, %v798_v32 }
 0x2b4   : > { %10689 = vst [vmem:[#allocation26_spill] sm:$0xff] %v9256_v0 }
 0x2b5   : > { %10690 = vst [vmem:[#allocation27_spill] sm:$0xff] %v9264_v3  ;;  %7836 = vrot.lane.b32.xlu0 %v7835_v59, %s8570_s10  ;;  %v6488_v23 = vpop.f32.mrb[14].mxu0  ;;  %v9267_v9 = vpop.f32.mrb[14].mxu1 }
 0x2b6   : > { %v808_v35 = vpop.f32.mrb[15].mxu0  ;;  %v9269_v15 = vpop.f32.mrb[15].mxu1  ;;  %v9271_v51 = vadd.f32 %v6488_v23, %v5662_v63 }
 0x2b7   : > { %v7840_v0 = vpack.i.bf16 %v9267_v9, %v9269_v15  ;;  %v9275_v14 = vpack.c.bf16 %v6488_v23, %v808_v35  ;;  %v9277_v44 = vpack.i.bf16 %v6488_v23, %v808_v35  ;;  %v9279_v26 = vadd.f32 %v5662_v63, %v808_v35 }
 0x2b8   : > { %10691 = vst [vmem:[#allocation28_spill] sm:$0xff] %v9271_v51 }
 0x2b9   : > { %10692 = vst [vmem:[#allocation29_spill] sm:$0xff] %v9279_v26  ;;  %7841 = vrot.lane.b32.xlu1 %v7840_v0, %s8570_s10 }
 0x30f   : > { %v7807_v32 = vpop.permute.xlu0 %7806 }
 0x310   : > { %v7809_v59 = vunpack.i.h.bf16 %v7807_v32  ;;  %v7808_v3 = vunpack.i.l.bf16 %v7807_v32 }
 0x312   : > { %v7257_v51 = vpack.c.bf16 %v7809_v59, %v7808_v3 }
 0x313   : > { %v7812_v57 = vpop.permute.xlu1 %7811 }
 0x314   : > { %v7814_v49 = vunpack.i.h.bf16 %v7812_v57  ;;  %v7813_v24 = vunpack.i.l.bf16 %v7812_v57  ;;  %7259 = vmatprep.subr.msk.bf16.mxu0 %vm9284_vm2, %v7257_v51 }
 0x315   : > { %7262 = vmatpush3.bf16.xpose.msk.msra.mxu0 %vm9284_vm2, %v7257_v51 }
 0x316   : > { %v7263_v63 = vpack.c.bf16 %v7814_v49, %v7813_v24 }
 0x317   : > { %v7817_v0 = vpop.permute.xlu1 %7816 }
 0x318   : > { %v7819_v23 = vunpack.i.h.bf16 %v7817_v0  ;;  %v7818_v35 = vunpack.i.l.bf16 %v7817_v0  ;;  %7265 = vmatprep.subr.msk.bf16.mxu0 %vm9284_vm2, %v7263_v63 }
 0x31a   : > { %v7269_v32 = vpack.c.bf16 %v7819_v23, %v7818_v35 }
 0x31b   : > { %v7827_v26 = vpop.permute.xlu0 %7826 }
 0x31c   : > { %v7829_v3 = vunpack.i.h.bf16 %v7827_v26  ;;  %v7828_v59 = vunpack.i.l.bf16 %v7827_v26 }
 0x31d   : > { %7268 = vmatpush3.bf16.xpose.msk.msra.mxu0 %vm9284_vm2, %v7263_v63 }
 0x31e   : > { %7271 = vmatprep.subr.msk.bf16.mxu0 %vm9284_vm2, %v7269_v32  ;;  %v7275_v20 = vpack.c.bf16 %v7829_v3, %v7828_v59 }
 0x31f   : > { %v7822_v57 = vpop.permute.xlu1 %7821 }
 0x320   : > { %v7824_v43 = vunpack.i.h.bf16 %v7822_v57  ;;  %v7823_v51 = vunpack.i.l.bf16 %v7822_v57 }
 0x322   : > { %v7281_v24 = vpack.c.bf16 %v7824_v43, %v7823_v51 }
 0x323   : > { %v7832_v49 = vpop.permute.xlu1 %7831 }
 0x324   : > { %v7834_v0 = vunpack.i.h.bf16 %v7832_v49  ;;  %v7833_v33 = vunpack.i.l.bf16 %v7832_v49  ;;  %7283 = vmatprep.subr.msk.bf16.mxu1 %vm9284_vm2, %v7281_v24 }
 0x325   : > { %7274 = vmatpush3.bf16.xpose.msk.msra.mxu0 %vm9284_vm2, %v7269_v32  ;;  %7286 = vmatpush3.bf16.xpose.msk.msra.mxu1 %vm9284_vm2, %v7281_v24 }
 0x326   : > { %v7287_v63 = vpack.c.bf16 %v7834_v0, %v7833_v33  ;;  %7277 = vmatprep.subr.msk.bf16.mxu0 %vm9284_vm2, %v7275_v20 }
 0x327   : > { %v7837_v26 = vpop.permute.xlu0 %7836 }
 0x328   : > { %v7839_v23 = vunpack.i.h.bf16 %v7837_v26  ;;  %v7838_v43 = vunpack.i.l.bf16 %v7837_v26  ;;  %7289 = vmatprep.subr.msk.bf16.mxu1 %vm9284_vm2, %v7287_v63 }
 0x32a   : > { %v7293_v35 = vpack.c.bf16 %v7839_v23, %v7838_v43 }
 0x32b   : > { %v7842_v57 = vpop.permute.xlu1 %7841 }
 0x32c   : > { %v7844_v33 = vunpack.i.h.bf16 %v7842_v57  ;;  %v7843_v32 = vunpack.i.l.bf16 %v7842_v57 }
 0x32d   : > { %7280 = vmatpush3.bf16.xpose.msk.msra.mxu0 %vm9284_vm2, %v7275_v20  ;;  %7292 = vmatpush3.bf16.xpose.msk.msra.mxu1 %vm9284_vm2, %v7287_v63 }
 0x32e   : > { %7295 = vmatprep.subr.msk.bf16.mxu1 %vm9284_vm2, %v7293_v35  ;;  %v7299_v3 = vpack.c.bf16 %v7844_v33, %v7843_v32 }
 0x334   : > { %6546 = vmatmul.mubr.msk.f32.vlgmr.msra.gmra.mrb[16].mxu0 %vm1017_vm1, %v9149_v30 }
 0x335   : > { %6548 = vmatprep.mubr.msk.f32.mxu0 %vm1017_vm1, %v9170_v38  ;;  %7298 = vmatpush3.bf16.xpose.msk.msra.mxu1 %vm9284_vm2, %v7293_v35 }
 0x336   : > { %7301 = vmatprep.subr.msk.bf16.mxu1 %vm9284_vm2, %v7299_v3 }
 0x338   : > { %6549 = vmatmul.mubr.msk.f32.gmra.mrb[18].mxu0 %vm1017_vm1, %v9166_v34 }
 0x339   : > { %6551 = vmatprep.mubr.msk.f32.mxu0 %vm1017_vm1, %v9189_v47 }
 0x33c   : > { %6552 = vmatmul.mubr.msk.f32.gmra.mrb[20].mxu0 %vm1017_vm1, %v9185_v46 }
 0x33d   : > { %6554 = vmatprep.mubr.msk.f32.mxu0 %vm1017_vm1, %v9208_v1  ;;  %7304 = vmatpush3.bf16.xpose.msk.msra.mxu1 %vm9284_vm2, %v7299_v3 }
 0x33e   : > { %7306 = vmatprep.subr.bf16.mxu1 %v9157_v60 }
 0x340   : > { %6555 = vmatmul.mubr.msk.f32.gmra.mrb[22].mxu0 %vm1017_vm1, %v9204_v56 }
 0x344   : > { %6574 = vmatmul.mubr.msk.f32.vlgmr.msra.gmra.mrb[16].mxu1 %vm1017_vm1, %v9221_v29 }
 0x345   : > { %6576 = vmatprep.mubr.msk.f32.mxu1 %vm1017_vm1, %v9239_v12  ;;  %7308 = vmatpush3.bf16.msra.mxu1 %v9157_v60 }
 0x346   : > { %7310 = vmatprep.subr.bf16.mxu1 %v9176_v41 }
 0x348   : > { %6577 = vmatmul.mubr.msk.f32.gmra.mrb[18].mxu1 %vm1017_vm1, %v9237_v17 }
 0x349   : > { %6579 = vmatprep.mubr.msk.f32.mxu1 %vm1017_vm1, %v9254_v40  ;;  %7312 = vmatpush3.bf16.msra.mxu1 %v9176_v41 }
 0x34a   : > { %7314 = vmatprep.subr.bf16.mxu1 %v9195_v48 }
 0x34c   : > { %6580 = vmatmul.mubr.msk.f32.gmra.mrb[20].mxu1 %vm1017_vm1, %v9252_v31 }
 0x34d   : > { %6582 = vmatprep.mubr.msk.f32.mxu1 %vm1017_vm1, %v9269_v15  ;;  %7316 = vmatpush3.bf16.msra.mxu1 %v9195_v48 }
 0x34e   : > { %7318 = vmatprep.subr.bf16.mxu1 %v9214_v28 }
 0x350   : > { %6583 = vmatmul.mubr.msk.f32.gmra.mrb[22].mxu1 %vm1017_vm1, %v9267_v9 }
 0x351   : > { %7320 = vmatpush3.bf16.msra.mxu1 %v9214_v28 }
 0x352   : > { %7322 = vmatprep.subr.bf16.mxu1 %v9230_v5 }
 0x407   : > { %v6547_v30 = vpop.f32.mrb[16].mxu0 }
 0x408   : > { %v1116_v60 = vpop.f32.mrb[17].mxu0  ;;  %v1319_v34 = vsel %vm360_vm0, %v6547_v30, -inf }
 0x409   : > { %1320 = vmax.xlane.f32.xlu1 %v1319_v34  ;;  %v1316_v20 = vsel %vm360_vm0, %v1116_v60, -inf }
 0x40a   : > { %1317 = vmax.xlane.f32.xlu0 %v1316_v20 }
 0x40b   : > { %v6550_v38 = vpop.f32.mrb[18].mxu0 }
 0x40c   : > { %v1126_v41 = vpop.f32.mrb[19].mxu0  ;;  %v1325_v46 = vsel %vm360_vm0, %v6550_v38, -inf }
 0x40d   : > { %v1322_v1 = vsel %vm360_vm0, %v1126_v41, -inf }
 0x40e   : > { %1326 = vmax.xlane.f32.xlu0 %v1325_v46 }
 0x40f   : > { %v6553_v47 = vpop.f32.mrb[20].mxu0 }
 0x410   : > { %v9360_v48 = vpop.f32.mrb[21].mxu0  ;;  %v1331_v56 = vsel %vm360_vm0, %v6553_v47, -inf }
 0x411   : > { %1332 = vmax.xlane.f32.xlu1 %v1331_v56  ;;  %v1328_v12 = vsel %vm360_vm0, %v9360_v48, -inf }
 0x412   : > { %1323 = vmax.xlane.f32.xlu0 %v1322_v1 }
 0x413   : > { %v6556_v28 = vpop.f32.mrb[22].mxu0 }
 0x414   : > { %v9364_v29 = vpop.f32.mrb[23].mxu0  ;;  %v1337_v17 = vsel %vm360_vm0, %v6556_v28, -inf }
 0x415   : > { %1338 = vmax.xlane.f32.xlu1 %v1337_v17  ;;  %v1334_v15 = vsel %vm360_vm0, %v9364_v29, -inf }
 0x416   : > { %1329 = vmax.xlane.f32.xlu0 %v1328_v12 }
 0x417   : > { %v9369_v31 = vpop.f32.mrb[16].mxu1 }
 0x418   : > { %v9371_v40 = vpop.f32.mrb[17].mxu1  ;;  %v1343_v9 = vsel %vm360_vm0, %v9369_v31, -inf }
 0x419   : > { %1344 = vmax.xlane.f32.xlu1 %v1343_v9  ;;  %v1340_v49 = vsel %vm360_vm0, %v9371_v40, -inf }
 0x41a   : > { %1335 = vmax.xlane.f32.xlu0 %v1334_v15 }
 0x41b   : > { %v9377_v59 = vpop.f32.mrb[18].mxu1 }
 0x41c   : > { %v9379_v51 = vpop.f32.mrb[19].mxu1  ;;  %v1349_v24 = vsel %vm360_vm0, %v9377_v59, -inf }
 0x41d   : > { %1350 = vmax.xlane.f32.xlu1 %v1349_v24  ;;  %v1346_v23 = vsel %vm360_vm0, %v9379_v51, -inf }
 0x41e   : > { %1341 = vmax.xlane.f32.xlu0 %v1340_v49 }
 0x41f   : > { %v9385_v0 = vpop.f32.mrb[20].mxu1 }
 0x420   : > { %v9387_v63 = vpop.f32.mrb[21].mxu1  ;;  %v1355_v26 = vsel %vm360_vm0, %v9385_v0, -inf }
 0x421   : > { %1356 = vmax.xlane.f32.xlu1 %v1355_v26  ;;  %v1352_v33 = vsel %vm360_vm0, %v9387_v63, -inf }
 0x422   : > { %1347 = vmax.xlane.f32.xlu0 %v1346_v23 }
 0x423   : > { %v9393_v43 = vpop.f32.mrb[22].mxu1 }
 0x424   : > { %v9395_v35 = vpop.f32.mrb[23].mxu1  ;;  %v1361_v57 = vsel %vm360_vm0, %v9393_v43, -inf }
 0x425   : > { %1362 = vmax.xlane.f32.xlu1 %v1361_v57  ;;  %v1358_v32 = vsel %vm360_vm0, %v9395_v35, -inf }
 0x426   : > { %1353 = vmax.xlane.f32.xlu0 %v1352_v33 }
 0x42a   : > { %1359 = vmax.xlane.f32.xlu0 %v1358_v32 }
 0x496   : > { %v1321_v3 = vpop.xlane.xlu1 %1320 }
 0x497   : > { %v1365_v34 = vsub.f32 %v6547_v30, %v1321_v3  ;;  %v1318_v20 = vpop.xlane.xlu0 %1317 }
 0x498   : > { %v1364_v46 = vsub.f32 %v1116_v60, %v1318_v20 }
 0x499   : > { %v1382_v56 = vmul.f32 1.442695, %v1365_v34 }
 0x49a   : > { %v1380_v1 = vmul.f32 1.442695, %v1364_v46 }
 0x49b   : > { %8117 = vpow2.f32 %v1382_v56  ;;  %v1327_v17 = vpop.xlane.xlu0 %1326 }
 0x49c   : > { %8119 = vpow2.f32 %v1380_v1  ;;  %v1367_v12 = vsub.f32 %v6550_v38, %v1327_v17 }
 0x49e   : > { %v1386_v9 = vmul.f32 1.442695, %v1367_v12  ;;  %v1333_v15 = vpop.xlane.xlu1 %1332 }
 0x49f   : > { %v1369_v24 = vsub.f32 %v6553_v47, %v1333_v15  ;;  %v1324_v49 = vpop.xlane.xlu0 %1323 }
 0x4a0   : > { %8121 = vpow2.f32 %v1386_v9  ;;  %v1366_v26 = vsub.f32 %v1126_v41, %v1324_v49 }
 0x4a1   : > { %v1390_v23 = vmul.f32 1.442695, %v1369_v24 }
 0x4a2   : > { %v1384_v57 = vmul.f32 1.442695, %v1366_v26  ;;  %v1339_v33 = vpop.xlane.xlu1 %1338 }
 0x4a3   : > { %8123 = vpow2.f32 %v1390_v23  ;;  %v1371_v32 = vsub.f32 %v6556_v28, %v1339_v33  ;;  %v1330_v30 = vpop.xlane.xlu0 %1329 }
 0x4a4   : > { %8125 = vpow2.f32 %v1384_v57  ;;  %v1368_v60 = vsub.f32 %v9360_v48, %v1330_v30 }
 0x4a5   : > { %v9404_v3 = vpop.eup %8117  ;;  %v1394_v34 = vmul.f32 1.442695, %v1371_v32 }
 0x4a6   : > { %v9406_v20 = vpop.eup %8119  ;;  %v1388_v38 = vmul.f32 1.442695, %v1368_v60  ;;  %v1345_v46 = vpop.xlane.xlu1 %1344  ;;  %v1415_v47 = vsel %vm360_vm0, %v9404_v3, 0.0 }
 0x4a7   : > { %8127 = vpow2.f32 %v1394_v34  ;;  %v1373_v41 = vsub.f32 %v9369_v31, %v1345_v46  ;;  %1416 = vadd.xlane.f32.xlu1 %v1415_v47  ;;  %v1336_v56 = vpop.xlane.xlu0 %1335  ;;  %v1412_v28 = vsel %vm360_vm0, %v9406_v20, 0.0 }
 0x4a8   : > { %8129 = vpow2.f32 %v1388_v38  ;;  %v1370_v48 = vsub.f32 %v9364_v29, %v1336_v56  ;;  %1413 = vadd.xlane.f32.xlu0 %v1412_v28 }
 0x4a9   : > { %v1398_v1 = vmul.f32 1.442695, %v1373_v41 }
 0x4aa   : > { %v9414_v17 = vpop.eup %8121  ;;  %v1392_v12 = vmul.f32 1.442695, %v1370_v48  ;;  %v1351_v9 = vpop.xlane.xlu1 %1350 }
 0x4ab   : > { %8131 = vpow2.f32 %v1398_v1  ;;  %v1375_v15 = vsub.f32 %v9377_v59, %v1351_v9  ;;  %v1342_v24 = vpop.xlane.xlu0 %1341  ;;  %v1421_v31 = vsel %vm360_vm0, %v9414_v17, 0.0 }
 0x4ac   : > { %8133 = vpow2.f32 %v1392_v12  ;;  %v1372_v49 = vsub.f32 %v9371_v40, %v1342_v24  ;;  %1422 = vadd.xlane.f32.xlu1 %v1421_v31 }
 0x4ad   : > { %v9420_v26 = vpop.eup %8123  ;;  %v1402_v29 = vmul.f32 1.442695, %v1375_v15 }
 0x4ae   : > { %v9422_v23 = vpop.eup %8125  ;;  %v1396_v57 = vmul.f32 1.442695, %v1372_v49  ;;  %v1357_v33 = vpop.xlane.xlu1 %1356  ;;  %v1427_v32 = vsel %vm360_vm0, %v9420_v26, 0.0 }
 0x4af   : > { %8135 = vpow2.f32 %v1402_v29  ;;  %v1377_v59 = vsub.f32 %v9385_v0, %v1357_v33  ;;  %v1348_v30 = vpop.xlane.xlu0 %1347  ;;  %v1418_v60 = vsel %vm360_vm0, %v9422_v23, 0.0 }
 0x4b0   : > { %8137 = vpow2.f32 %v1396_v57  ;;  %v1374_v40 = vsub.f32 %v9379_v51, %v1348_v30  ;;  %1428 = vadd.xlane.f32.xlu1 %v1427_v32  ;;  %1419 = vadd.xlane.f32.xlu0 %v1418_v60 }
 0x4b1   : > { %v9430_v34 = vpop.eup %8127  ;;  %v1406_v38 = vmul.f32 1.442695, %v1377_v59 }
 0x4b2   : > { %v9432_v46 = vpop.eup %8129  ;;  %v1400_v47 = vmul.f32 1.442695, %v1374_v40  ;;  %v1363_v41 = vpop.xlane.xlu1 %1362  ;;  %v1433_v56 = vsel %vm360_vm0, %v9430_v34, 0.0 }
 0x4b3   : > { %8139 = vpow2.f32 %v1406_v38  ;;  %v1379_v0 = vsub.f32 %v9393_v43, %v1363_v41  ;;  %v1354_v28 = vpop.xlane.xlu0 %1353  ;;  %v1424_v48 = vsel %vm360_vm0, %v9432_v46, 0.0 }
 0x4b4   : > { %8141 = vpow2.f32 %v1400_v47  ;;  %v1376_v51 = vsub.f32 %v9387_v63, %v1354_v28  ;;  %1434 = vadd.xlane.f32.xlu1 %v1433_v56  ;;  %1425 = vadd.xlane.f32.xlu0 %v1424_v48  ;;  %v1750_v28 = vld [vmem:[#allocation8] sm:$0xff]  ;;  %v1751_v48 = vld [vmem:[#allocation8 + $0x8] sm:$0xff] }
 0x4b5   : > { %v9440_v1 = vpop.eup %8131  ;;  %v1410_v12 = vmul.f32 1.442695, %v1379_v0 }
 0x4b6   : > { %v9442_v9 = vpop.eup %8133  ;;  %v1404_v15 = vmul.f32 1.442695, %v1376_v51  ;;  %v1439_v24 = vsel %vm360_vm0, %v9440_v1, 0.0  ;;  %v1752_v51 = vld [vmem:[#allocation8 + $0x10] sm:$0xff] }
 0x4b7   : > { %8143 = vpow2.f32 %v1410_v12  ;;  %v1360_v43 = vpop.xlane.xlu0 %1359  ;;  %v1430_v31 = vsel %vm360_vm0, %v9442_v9, 0.0  ;;  %v7337_v12 = vpack.c.bf16 %v1751_v48, %v1750_v28 }
 0x4b8   : > { %8145 = vpow2.f32 %v1404_v15  ;;  %v1378_v49 = vsub.f32 %v9395_v35, %v1360_v43  ;;  %1440 = vadd.xlane.f32.xlu1 %v1439_v24  ;;  %1431 = vadd.xlane.f32.xlu0 %v1430_v31  ;;  %v1753_v15 = vld [vmem:[#allocation8 + $0x18] sm:$0xff] }
 0x4b9   : > { %v9449_v63 = vpop.eup %8135  ;;  %v7341_v24 = vpack.c.bf16 %v1753_v15, %v1752_v51  ;;  %7338 = vmatprep.subr.bf16.mxu0 %v7337_v12 }
 0x4ba   : > { %v9451_v29 = vpop.eup %8137  ;;  %v1408_v57 = vmul.f32 1.442695, %v1378_v49  ;;  %v1445_v33 = vsel %vm360_vm0, %v9449_v63, 0.0  ;;  %7340 = vmatpush3.bf16.msra.mxu0 %v7337_v12 }
 0x4bb   : > { %v1436_v32 = vsel %vm360_vm0, %v9451_v29, 0.0  ;;  %7342 = vmatprep.subr.bf16.mxu0 %v7341_v24 }
 0x4bc   : > { %8147 = vpow2.f32 %v1408_v57  ;;  %1446 = vadd.xlane.f32.xlu1 %v1445_v33  ;;  %1437 = vadd.xlane.f32.xlu0 %v1436_v32 }
 0x4bd   : > { %v9457_v59 = vpop.eup %8139 }
 0x4be   : > { %v9459_v30 = vpop.eup %8141  ;;  %v1451_v35 = vsel %vm360_vm0, %v9457_v59, 0.0  ;;  %7344 = vmatpush3.bf16.msra.mxu0 %v7341_v24 }
 0x4bf   : > { %v1442_v60 = vsel %vm360_vm0, %v9459_v30, 0.0 }
 0x4c0   : > { %1452 = vadd.xlane.f32.xlu1 %v1451_v35  ;;  %1443 = vadd.xlane.f32.xlu0 %v1442_v60 }
 0x4c1   : > { %v9465_v40 = vpop.eup %8143 }
 0x4c2   : > { %v9467_v38 = vpop.eup %8145  ;;  %v1457_v47 = vsel %vm360_vm0, %v9465_v40, 0.0 }
 0x4c3   : > { %v1448_v41 = vsel %vm360_vm0, %v9467_v38, 0.0 }
 0x4c4   : > { %1458 = vadd.xlane.f32.xlu1 %v1457_v47  ;;  %1449 = vadd.xlane.f32.xlu0 %v1448_v41 }
 0x4c6   : > { %v9473_v56 = vpop.eup %8147 }
 0x4c7   : > { %v1454_v0 = vsel %vm360_vm0, %v9473_v56, 0.0 }
 0x4c8   : > { %1455 = vadd.xlane.f32.xlu0 %v1454_v0 }
 0x534   : > { %v1417_v43 = vpop.xlane.xlu1 %1416 }
 0x535   : > { %8149 = vrcp.f32 %v1417_v43  ;;  %v1414_v31 = vpop.xlane.xlu0 %1413  ;;  %v1964_v43 = vld [vmem:[#allocation5 + $0x40] sm:$0xff] }
 0x536   : > { %8151 = vrcp.f32 %v1414_v31  ;;  %v1965_v31 = vld [vmem:[#allocation5 + $0x48] sm:$0xff] }
 0x539   : > { %v1423_v49 = vpop.xlane.xlu1 %1422 }
 0x53a   : > { %8153 = vrcp.f32 %v1423_v49 }
 0x53d   : > { %v1429_v57 = vpop.xlane.xlu1 %1428  ;;  %v1420_v33 = vpop.xlane.xlu0 %1419 }
 0x53e   : > { %8155 = vrcp.f32 %v1420_v33 }
 0x53f   : > { %v8150_v32 = vpop.eup %8149  ;;  %8157 = vrcp.f32 %v1429_v57 }
 0x540   : > { %v8152_v35 = vpop.eup %8151  ;;  %v1477_v0 = vmul.f32 %v8150_v32, %v9404_v3 }
 0x541   : > { %v1435_v60 = vpop.xlane.xlu1 %1434  ;;  %v1426_v47 = vpop.xlane.xlu0 %1425  ;;  %v1476_v41 = vmul.f32 %v8152_v35, %v9406_v20 }
 0x542   : > { %8159 = vrcp.f32 %v1426_v47 }
 0x543   : > { %6601 = vmatprep.mubr.msk.f32.mxu1 %vm360_vm0, %v1476_v41  ;;  %8161 = vrcp.f32 %v1435_v60 }
 0x544   : > { %6602 = vmatmul.mubr.msk.f32.vlgmr.msra.gmra.mrb[24].mxu1 %vm360_vm0, %v1477_v0  ;;  %v8154_v51 = vpop.eup %8153  ;;  %v1967_v0 = vld [vmem:[#allocation5 + $0x58] sm:$0xff] }
 0x545   : > { %7324 = vmatpush3.bf16.msra.mxu1 %v9230_v5  ;;  %v1441_v28 = vpop.xlane.xlu1 %1440  ;;  %v1432_v48 = vpop.xlane.xlu0 %1431  ;;  %v1479_v5 = vmul.f32 %v8154_v51, %v9414_v17 }
 0x546   : > { %7326 = vmatprep.subr.bf16.mxu1 %v9245_v18  ;;  %8163 = vrcp.f32 %v1432_v48 }
 0x547   : > { %8165 = vrcp.f32 %v1441_v28 }
 0x548   : > { %v8156_v12 = vpop.eup %8155 }
 0x549   : > { %7328 = vmatpush3.bf16.msra.mxu1 %v9245_v18  ;;  %v1447_v20 = vpop.xlane.xlu1 %1446  ;;  %v1438_v3 = vpop.xlane.xlu0 %1437  ;;  %v1478_v15 = vmul.f32 %v8156_v12, %v9422_v23  ;;  %v7345_v23 = vpack.c.bf16 %v1965_v31, %v1964_v43 }
 0x54a   : > { %7330 = vmatprep.subr.bf16.mxu1 %v9260_v61  ;;  %8167 = vrcp.f32 %v1438_v3  ;;  %v8158_v24 = vpop.eup %8157 }
 0x54b   : > { %6604 = vmatprep.mubr.msk.f32.mxu1 %vm360_vm0, %v1478_v15  ;;  %8169 = vrcp.f32 %v1447_v20  ;;  %v1481_v17 = vmul.f32 %v8158_v24, %v9420_v26  ;;  %v1966_v26 = vld [vmem:[#allocation5 + $0x50] sm:$0xff]  ;;  %v1969_v20 = vld [vmem:[#allocation5 + $0x68] sm:$0xff] }
 0x54c   : > { %v8160_v49 = vpop.eup %8159  ;;  %6605 = vmatmul.mubr.msk.f32.gmra.mrb[26].mxu1 %vm360_vm0, %v1479_v5 }
 0x54d   : > { %v1453_v57 = vpop.xlane.xlu1 %1452  ;;  %v1444_v18 = vpop.xlane.xlu0 %1443  ;;  %7332 = vmatpush3.bf16.msra.mxu1 %v9260_v61  ;;  %v1480_v33 = vmul.f32 %v8160_v49, %v9432_v46 }
 0x54e   : > { %7334 = vmatprep.subr.bf16.mxu1 %v9275_v14  ;;  %8171 = vrcp.f32 %v1444_v18  ;;  %v8162_v32 = vpop.eup %8161 }
 0x54f   : > { %6607 = vmatprep.mubr.msk.f32.mxu1 %vm360_vm0, %v1480_v33  ;;  %8173 = vrcp.f32 %v1453_v57  ;;  %v1483_v46 = vmul.f32 %v8162_v32, %v9430_v34  ;;  %v1968_v34 = vld [vmem:[#allocation5 + $0x60] sm:$0xff] }
 0x550   : > { %v8164_v35 = vpop.eup %8163  ;;  %6608 = vmatmul.mubr.msk.f32.gmra.mrb[28].mxu1 %vm360_vm0, %v1481_v17  ;;  %v7353_v24 = vpack.c.bf16 %v1969_v20, %v1968_v34 }
 0x551   : > { %v1450_v60 = vpop.xlane.xlu0 %1449  ;;  %7336 = vmatpush3.bf16.msra.mxu1 %v9275_v14  ;;  %v1459_v47 = vpop.xlane.xlu1 %1458  ;;  %v1482_v61 = vmul.f32 %v8164_v35, %v9442_v9  ;;  %v7349_v9 = vpack.c.bf16 %v1967_v0, %v1966_v26 }
 0x552   : > { %8175 = vrcp.f32 %v1450_v60  ;;  %7346 = vmatprep.subr.bf16.mxu1 %v7345_v23  ;;  %v8166_v41 = vpop.eup %8165 }
 0x553   : > { %6610 = vmatprep.mubr.msk.f32.mxu1 %vm360_vm0, %v1482_v61  ;;  %8177 = vrcp.f32 %v1459_v47  ;;  %v1485_v51 = vmul.f32 %v8166_v41, %v9440_v1  ;;  %v1970_v1 = vld [vmem:[#allocation5 + $0x70] sm:$0xff] }
 0x554   : > { %v8168_v28 = vpop.eup %8167  ;;  %6611 = vmatmul.mubr.msk.f32.gmra.mrb[30].mxu1 %vm360_vm0, %v1483_v46 }
 0x555   : > { %v1456_v48 = vpop.xlane.xlu0 %1455  ;;  %v1484_v14 = vmul.f32 %v8168_v28, %v9451_v29  ;;  %v8170_v12 = vpop.eup %8169  ;;  %v1971_v29 = vld [vmem:[#allocation5 + $0x78] sm:$0xff] }
 0x556   : > { %8179 = vrcp.f32 %v1456_v48  ;;  %v1487_v5 = vmul.f32 %v8170_v12, %v9449_v63 }
 0x557   : > { %6629 = vmatprep.mubr.msk.f32.mxu1 %vm360_vm0, %v1484_v14 }
 0x558   : > { %v8172_v3 = vpop.eup %8171  ;;  %6630 = vmatmul.mubr.msk.f32.vlgmr.msra.gmra.mrb[32].mxu1 %vm360_vm0, %v1485_v51 }
 0x559   : > { %7348 = vmatpush3.bf16.msra.mxu1 %v7345_v23  ;;  %v1486_v15 = vmul.f32 %v8172_v3, %v9459_v30  ;;  %v8174_v43 = vpop.eup %8173  ;;  %v7357_v30 = vpack.c.bf16 %v1971_v29, %v1970_v1 }
 0x55a   : > { %7350 = vmatprep.subr.bf16.mxu1 %v7349_v9  ;;  %v1489_v18 = vmul.f32 %v8174_v43, %v9457_v59 }
 0x55b   : > { %6632 = vmatprep.mubr.msk.f32.mxu1 %vm360_vm0, %v1486_v15 }
 0x55c   : > { %v8176_v31 = vpop.eup %8175  ;;  %6633 = vmatmul.mubr.msk.f32.gmra.mrb[34].mxu1 %vm360_vm0, %v1487_v5 }
 0x55d   : > { %7352 = vmatpush3.bf16.msra.mxu1 %v7349_v9  ;;  %v1488_v49 = vmul.f32 %v8176_v31, %v9467_v38  ;;  %v8178_v57 = vpop.eup %8177 }
 0x55e   : > { %7354 = vmatprep.subr.bf16.mxu1 %v7353_v24  ;;  %v1491_v17 = vmul.f32 %v8178_v57, %v9465_v40 }
 0x55f   : > { %6635 = vmatprep.mubr.msk.f32.mxu1 %vm360_vm0, %v1488_v49 }
 0x560   : > { %v8180_v33 = vpop.eup %8179  ;;  %6636 = vmatmul.mubr.msk.f32.gmra.mrb[36].mxu1 %vm360_vm0, %v1489_v18 }
 0x561   : > { %v1490_v63 = vmul.f32 %v8180_v33, %v9473_v56  ;;  %7356 = vmatpush3.bf16.msra.mxu1 %v7353_v24 }
 0x562   : > { %7358 = vmatprep.subr.bf16.mxu1 %v7357_v30 }
 0x563   : > { %6638 = vmatprep.mubr.msk.f32.mxu1 %vm360_vm0, %v1490_v63 }
 0x564   : > { %6639 = vmatmul.mubr.msk.f32.gmra.mrb[38].mxu1 %vm360_vm0, %v1491_v17 }
 0x565   : > { %7360 = vmatpush3.bf16.msra.mxu1 %v7357_v30  ;;  %6689 = vmatprep.mubr.msk.f32.mxu1 %vm360_vm0, %v9007_v4 }
 0x568   : > { %6690 = vmatmul.mubr.msk.f32.vlgmr.msra.gmra.mrb[40].mxu1 %vm360_vm0, %v9018_v19 }
 0x569   : > { %6692 = vmatprep.mubr.msk.f32.mxu1 %vm360_vm0, %v9026_v27 }
 0x56c   : > { %6693 = vmatmul.mubr.msk.f32.gmra.mrb[42].mxu1 %vm360_vm0, %v9036_v39 }
 0x56d   : > { %6695 = vmatprep.mubr.msk.f32.mxu1 %vm360_vm0, %v9044_v55 }
 0x570   : > { %6696 = vmatmul.mubr.msk.f32.gmra.mrb[44].mxu1 %vm360_vm0, %v9054_v53 }
 0x571   : > { %6698 = vmatprep.mubr.msk.f32.mxu1 %vm360_vm0, %v9058_v58 }
 0x574   : > { %6699 = vmatmul.mubr.msk.f32.gmra.mrb[46].mxu1 %vm360_vm0, %v9072_v62 }
 0x575   : > { %6701 = vmatprep.mubr.msk.f32.mxu1 %vm360_vm0, %v9076_v2 }
 0x578   : > { %6702 = vmatmul.mubr.msk.f32.gmra.mrb[48].mxu1 %vm360_vm0, %v9090_v6 }
 0x579   : > { %6704 = vmatprep.mubr.msk.f32.mxu1 %vm360_vm0, %v9094_v8 }
 0x57c   : > { %6705 = vmatmul.mubr.msk.f32.gmra.mrb[50].mxu1 %vm360_vm0, %v9108_v13 }
 0x57d   : > { %6707 = vmatprep.mubr.msk.f32.mxu1 %vm360_vm0, %v9112_v37 }
 0x580   : > { %6708 = vmatmul.mubr.msk.f32.gmra.mrb[52].mxu1 %vm360_vm0, %v9126_v22 }
 0x581   : > { %6710 = vmatprep.mubr.msk.f32.mxu1 %vm360_vm0, %v9129_v16 }
 0x584   : > { %6711 = vmatmul.mubr.msk.f32.gmra.mrb[54].mxu1 %vm360_vm0, %v9141_v52 }
 0x617   : > { %v6603_v59 = vpop.f32.mrb[24].mxu1 }
 0x618   : > { %v1582_v40 = vpop.f32.mrb[25].mxu1 }
 0x619   : > { %6649 = vmatprep.mubr.msk.f32.mxu0 %vm1017_vm1, %v1582_v40 }
 0x61a   : > { %6650 = vmatmul.mubr.msk.f32.vlgmr.msra.gmra.mrb[24].mxu0 %vm1017_vm1, %v6603_v59 }
 0x61f   : > { %v6606_v38 = vpop.f32.mrb[26].mxu1 }
 0x620   : > { %v1592_v56 = vpop.f32.mrb[27].mxu1 }
 0x621   : > { %6652 = vmatprep.mubr.msk.f32.mxu0 %vm1017_vm1, %v1592_v56 }
 0x622   : > { %6653 = vmatmul.mubr.msk.f32.gmra.mrb[26].mxu0 %vm1017_vm1, %v6606_v38 }
 0x623   : > { %v6609_v23 = vpop.f32.mrb[28].mxu1 }
 0x624   : > { %v1602_v32 = vpop.f32.mrb[29].mxu1 }
 0x625   : > { %6655 = vmatprep.mubr.msk.f32.mxu0 %vm1017_vm1, %v1602_v32 }
 0x626   : > { %6656 = vmatmul.mubr.msk.f32.gmra.mrb[28].mxu0 %vm1017_vm1, %v6609_v23 }
 0x627   : > { %v6612_v35 = vpop.f32.mrb[30].mxu1 }
 0x628   : > { %v1612_v60 = vpop.f32.mrb[31].mxu1 }
 0x629   : > { %6658 = vmatprep.mubr.msk.f32.mxu0 %vm1017_vm1, %v1612_v60 }
 0x62a   : > { %6659 = vmatmul.mubr.msk.f32.gmra.mrb[30].mxu0 %vm1017_vm1, %v6612_v35 }
 0x62b   : > { %v6631_v47 = vpop.f32.mrb[32].mxu1 }
 0x62c   : > { %v1711_v61 = vpop.f32.mrb[33].mxu1 }
 0x62d   : > { %6661 = vmatprep.mubr.msk.f32.mxu0 %vm1017_vm1, %v1711_v61 }
 0x62e   : > { %6662 = vmatmul.mubr.msk.f32.gmra.mrb[32].mxu0 %vm1017_vm1, %v6631_v47 }
 0x62f   : > { %v6634_v46 = vpop.f32.mrb[34].mxu1 }
 0x630   : > { %v1721_v41 = vpop.f32.mrb[35].mxu1 }
 0x631   : > { %6664 = vmatprep.mubr.msk.f32.mxu0 %vm1017_vm1, %v1721_v41 }
 0x632   : > { %6665 = vmatmul.mubr.msk.f32.gmra.mrb[34].mxu0 %vm1017_vm1, %v6634_v46 }
 0x633   : > { %v6637_v26 = vpop.f32.mrb[36].mxu1 }
 0x634   : > { %v1731_v0 = vpop.f32.mrb[37].mxu1 }
 0x635   : > { %6667 = vmatprep.mubr.msk.f32.mxu0 %vm1017_vm1, %v1731_v0 }
 0x636   : > { %6668 = vmatmul.mubr.msk.f32.gmra.mrb[36].mxu0 %vm1017_vm1, %v6637_v26 }
 0x637   : > { %v6640_v28 = vpop.f32.mrb[38].mxu1 }
 0x638   : > { %v1741_v48 = vpop.f32.mrb[39].mxu1 }
 0x639   : > { %6670 = vmatprep.mubr.msk.f32.mxu0 %vm1017_vm1, %v1741_v48 }
 0x63a   : > { %6671 = vmatmul.mubr.msk.f32.gmra.mrb[38].mxu0 %vm1017_vm1, %v6640_v28 }
 0x63b   : > { %v9564_v14 = vpop.f32.mrb[40].mxu1 }
 0x63c   : > { %v2038_v51 = vpop.f32.mrb[41].mxu1 }
 0x63d   : > { %v7865_v9 = vpack.i.bf16 %v9564_v14, %v2038_v51  ;;  %6729 = vmatprep.mubr.msk.f32.mxu0 %vm1017_vm1, %v2038_v51 }
 0x63f   : > { %v9568_v12 = vpop.f32.mrb[42].mxu1 }
 0x640   : > { %v9570_v34 = vpop.f32.mrb[43].mxu1 }
 0x641   : > { %v7870_v20 = vpack.i.bf16 %v9568_v12, %v9570_v34 }
 0x643   : > { %v9574_v3 = vpop.f32.mrb[44].mxu1 }
 0x644   : > { %v9576_v15 = vpop.f32.mrb[45].mxu1 }
 0x645   : > { %v7875_v5 = vpack.i.bf16 %v9574_v3, %v9576_v15 }
 0x647   : > { %v9580_v24 = vpop.f32.mrb[46].mxu1 }
 0x648   : > { %v9582_v43 = vpop.f32.mrb[47].mxu1 }
 0x649   : > { %v7880_v1 = vpack.i.bf16 %v9580_v24, %v9582_v43 }
 0x64b   : > { %v9586_v29 = vpop.f32.mrb[48].mxu1 }
 0x64c   : > { %v2078_v31 = vpop.f32.mrb[49].mxu1 }
 0x64d   : > { %v7845_v49 = vpack.i.bf16 %v9586_v29, %v2078_v31  ;;  %6757 = vmatprep.mubr.msk.f32.mxu1 %vm1017_vm1, %v2078_v31 }
 0x64f   : > { %7846 = vrot.lane.b32.xlu0 %v7845_v49, %s8570_s10  ;;  %v9591_v57 = vpop.f32.mrb[50].mxu1 }
 0x650   : > { %v9593_v18 = vpop.f32.mrb[51].mxu1 }
 0x651   : > { %v7850_v30 = vpack.i.bf16 %v9591_v57, %v9593_v18 }
 0x653   : > { %7866 = vrot.lane.b32.xlu0 %v7865_v9, %s8570_s10  ;;  %7851 = vrot.lane.b32.xlu1 %v7850_v30, %s8570_s10  ;;  %v9599_v33 = vpop.f32.mrb[52].mxu1 }
 0x654   : > { %v2098_v63 = vpop.f32.mrb[53].mxu1 }
 0x655   : > { %v7855_v17 = vpack.i.bf16 %v9599_v33, %v2098_v63 }
 0x657   : > { %7876 = vrot.lane.b32.xlu0 %v7875_v5, %s8570_s10  ;;  %7856 = vrot.lane.b32.xlu1 %v7855_v17, %s8570_s10  ;;  %v9604_v59 = vpop.f32.mrb[54].mxu1 }
 0x658   : > { %v2108_v40 = vpop.f32.mrb[55].mxu1 }
 0x659   : > { %v7860_v38 = vpack.i.bf16 %v9604_v59, %v2108_v40 }
 0x65b   : > { %7861 = vrot.lane.b32.xlu1 %v7860_v38, %s8570_s10 }
 0x65f   : > { %7871 = vrot.lane.b32.xlu1 %v7870_v20, %s8570_s10 }
 0x663   : > { %7881 = vrot.lane.b32.xlu1 %v7880_v1, %s8570_s10 }
 0x6c1   : > { %v7847_v56 = vpop.permute.xlu0 %7846 }
 0x6c2   : > { %v7849_v23 = vunpack.i.h.bf16 %v7847_v56  ;;  %v7848_v32 = vunpack.i.l.bf16 %v7847_v56 }
 0x6c4   : > { %v7385_v35 = vpack.c.bf16 %v7849_v23, %v7848_v32 }
 0x6c5   : > { %v7867_v60 = vpop.permute.xlu0 %7866  ;;  %v7852_v47 = vpop.permute.xlu1 %7851 }
 0x6c6   : > { %v7869_v61 = vunpack.i.h.bf16 %v7867_v60  ;;  %v7868_v46 = vunpack.i.l.bf16 %v7867_v60  ;;  %v7854_v41 = vunpack.i.h.bf16 %v7852_v47  ;;  %v7853_v26 = vunpack.i.l.bf16 %v7852_v47  ;;  %7387 = vmatprep.subr.msk.bf16.mxu1 %vm9284_vm2, %v7385_v35 }
 0x6c7   : > { %7390 = vmatpush3.bf16.xpose.msk.msra.mxu1 %vm9284_vm2, %v7385_v35 }
 0x6c8   : > { %v7361_v0 = vpack.c.bf16 %v7869_v61, %v7868_v46  ;;  %v7391_v28 = vpack.c.bf16 %v7854_v41, %v7853_v26 }
 0x6c9   : > { %v7857_v48 = vpop.permute.xlu1 %7856  ;;  %v7877_v5 = vpop.permute.xlu0 %7876 }
 0x6ca   : > { %v7859_v51 = vunpack.i.h.bf16 %v7857_v48  ;;  %v7858_v9 = vunpack.i.l.bf16 %v7857_v48  ;;  %7363 = vmatprep.subr.msk.bf16.mxu0 %vm9284_vm2, %v7361_v0  ;;  %7393 = vmatprep.subr.msk.bf16.mxu1 %vm9284_vm2, %v7391_v28  ;;  %v7879_v31 = vunpack.i.h.bf16 %v7877_v5  ;;  %v7878_v49 = vunpack.i.l.bf16 %v7877_v5 }
 0x6cb   : > { %7366 = vmatpush3.bf16.xpose.msk.msra.mxu0 %vm9284_vm2, %v7361_v0 }
 0x6cc   : > { %v7397_v1 = vpack.c.bf16 %v7859_v51, %v7858_v9  ;;  %v7373_v35 = vpack.c.bf16 %v7879_v31, %v7878_v49 }
 0x6cd   : > { %v7862_v20 = vpop.permute.xlu1 %7861 }
 0x6ce   : > { %v7864_v17 = vunpack.i.h.bf16 %v7862_v20  ;;  %v7863_v38 = vunpack.i.l.bf16 %v7862_v20 }
 0x6cf   : > { %7396 = vmatpush3.bf16.xpose.msk.msra.mxu1 %vm9284_vm2, %v7391_v28 }
 0x6d0   : > { %7399 = vmatprep.subr.msk.bf16.mxu1 %vm9284_vm2, %v7397_v1  ;;  %v7403_v60 = vpack.c.bf16 %v7864_v17, %v7863_v38 }
 0x6d1   : > { %v7872_v30 = vpop.permute.xlu1 %7871 }
 0x6d2   : > { %v7874_v56 = vunpack.i.h.bf16 %v7872_v30  ;;  %v7873_v23 = vunpack.i.l.bf16 %v7872_v30 }
 0x6d4   : > { %v7367_v32 = vpack.c.bf16 %v7874_v56, %v7873_v23 }
 0x6d5   : > { %v7882_v47 = vpop.permute.xlu1 %7881 }
 0x6d6   : > { %7369 = vmatprep.subr.msk.bf16.mxu0 %vm9284_vm2, %v7367_v32  ;;  %v7884_v61 = vunpack.i.h.bf16 %v7882_v47  ;;  %v7883_v46 = vunpack.i.l.bf16 %v7882_v47 }
 0x6d7   : > { %7372 = vmatpush3.bf16.xpose.msk.msra.mxu0 %vm9284_vm2, %v7367_v32  ;;  %7402 = vmatpush3.bf16.xpose.msk.msra.mxu1 %vm9284_vm2, %v7397_v1 }
 0x6d8   : > { %7375 = vmatprep.subr.msk.bf16.mxu0 %vm9284_vm2, %v7373_v35  ;;  %7405 = vmatprep.subr.msk.bf16.mxu1 %vm9284_vm2, %v7403_v60  ;;  %v7379_v41 = vpack.c.bf16 %v7884_v61, %v7883_v46 }
 0x6df   : > { %7378 = vmatpush3.bf16.xpose.msk.msra.mxu0 %vm9284_vm2, %v7373_v35  ;;  %7408 = vmatpush3.bf16.xpose.msk.msra.mxu1 %vm9284_vm2, %v7403_v60 }
 0x6e0   : > { %7381 = vmatprep.subr.msk.bf16.mxu0 %vm9284_vm2, %v7379_v41 }
 0x6e6   : > { %6758 = vmatmul.mubr.msk.f32.vlgmr.msra.gmra.mrb[56].mxu1 %vm1017_vm1, %v9586_v29 }
 0x6e7   : > { %7384 = vmatpush3.bf16.xpose.msk.msra.mxu0 %vm9284_vm2, %v7379_v41  ;;  %6760 = vmatprep.mubr.msk.f32.mxu1 %vm1017_vm1, %v9593_v18 }
 0x6ea   : > { %6761 = vmatmul.mubr.msk.f32.gmra.mrb[58].mxu1 %vm1017_vm1, %v9591_v57 }
 0x6eb   : > { %6763 = vmatprep.mubr.msk.f32.mxu1 %vm1017_vm1, %v2098_v63 }
 0x6ee   : > { %6730 = vmatmul.mubr.msk.f32.vlgmr.msra.gmra.mrb[40].mxu0 %vm1017_vm1, %v9564_v14  ;;  %6764 = vmatmul.mubr.msk.f32.gmra.mrb[60].mxu1 %vm1017_vm1, %v9599_v33 }
 0x6ef   : > { %6732 = vmatprep.mubr.msk.f32.mxu0 %vm1017_vm1, %v9570_v34  ;;  %6766 = vmatprep.mubr.msk.f32.mxu1 %vm1017_vm1, %v2108_v40 }
 0x6f2   : > { %6733 = vmatmul.mubr.msk.f32.gmra.mrb[42].mxu0 %vm1017_vm1, %v9568_v12  ;;  %6767 = vmatmul.mubr.msk.f32.gmra.mrb[62].mxu1 %vm1017_vm1, %v9604_v59 }
 0x6f3   : > { %6735 = vmatprep.mubr.msk.f32.mxu0 %vm1017_vm1, %v9576_v15 }
 0x6f6   : > { %6736 = vmatmul.mubr.msk.f32.gmra.mrb[44].mxu0 %vm1017_vm1, %v9574_v3 }
 0x6f7   : > { %6738 = vmatprep.mubr.msk.f32.mxu0 %vm1017_vm1, %v9582_v43 }
 0x6fa   : > { %6739 = vmatmul.mubr.msk.f32.gmra.mrb[46].mxu0 %vm1017_vm1, %v9580_v24 }
 0x7b9   : > { %v6759_v14 = vpop.f32.mrb[56].mxu1 }
 0x7ba   : > { %v2400_v34 = vpop.f32.mrb[57].mxu1  ;;  %v2466_v29 = vsel %vm360_vm0, %v6759_v14, -inf }
 0x7bb   : > { %2467 = vmax.xlane.f32.xlu1 %v2466_v29  ;;  %v2463_v12 = vsel %vm360_vm0, %v2400_v34, -inf }
 0x7bc   : > { %2464 = vmax.xlane.f32.xlu0 %v2463_v12 }
 0x7bd   : > { %v6762_v57 = vpop.f32.mrb[58].mxu1 }
 0x7be   : > { %v2410_v18 = vpop.f32.mrb[59].mxu1  ;;  %v2472_v15 = vsel %vm360_vm0, %v6762_v57, -inf }
 0x7bf   : > { %v2469_v59 = vsel %vm360_vm0, %v2410_v18, -inf }
 0x7c0   : > { %2473 = vmax.xlane.f32.xlu0 %v2472_v15 }
 0x7c1   : > { %v9671_v3 = vpop.f32.mrb[40].mxu0  ;;  %v6765_v33 = vpop.f32.mrb[60].mxu1 }
 0x7c2   : > { %v9673_v43 = vpop.f32.mrb[41].mxu0  ;;  %v2420_v63 = vpop.f32.mrb[61].mxu1  ;;  %v2478_v24 = vsel %vm360_vm0, %v6765_v33, -inf }
 0x7c3   : > { %2479 = vmax.xlane.f32.xlu1 %v2478_v24  ;;  %v2475_v51 = vsel %vm360_vm0, %v2420_v63, -inf }
 0x7c4   : > { %2470 = vmax.xlane.f32.xlu0 %v2469_v59 }
 0x7c5   : > { %v9677_v40 = vpop.f32.mrb[42].mxu0  ;;  %v6768_v26 = vpop.f32.mrb[62].mxu1 }
 0x7c6   : > { %v9679_v0 = vpop.f32.mrb[43].mxu0  ;;  %v2430_v28 = vpop.f32.mrb[63].mxu1  ;;  %v2484_v48 = vsel %vm360_vm0, %v6768_v26, -inf }
 0x7c7   : > { %2485 = vmax.xlane.f32.xlu1 %v2484_v48  ;;  %v2481_v5 = vsel %vm360_vm0, %v2430_v28, -inf }
 0x7c8   : > { %2476 = vmax.xlane.f32.xlu0 %v2475_v51 }
 0x7c9   : > { %v9683_v9 = vpop.f32.mrb[44].mxu0 }
 0x7ca   : > { %v9685_v20 = vpop.f32.mrb[45].mxu0 }
 0x7cc   : > { %2482 = vmax.xlane.f32.xlu0 %v2481_v5 }
 0x7cd   : > { %v9688_v1 = vpop.f32.mrb[46].mxu0 }
 0x7ce   : > { %v9690_v31 = vpop.f32.mrb[47].mxu0 }
 0x7d8   : > { %7891 = vrot.lane.b32.xlu1 %v9247_v21, %s8570_s10 }
 0x7e2   : > { %7886 = vrot.lane.b32.xlu0 %v9232_v7, %s8570_s10 }
 0x848   : > { %v2468_v49 = vpop.xlane.xlu1 %2467 }
 0x849   : > { %v2496_v30 = vsub.f32 %v6759_v14, %v2468_v49  ;;  %v2465_v17 = vpop.xlane.xlu0 %2464 }
 0x84a   : > { %v2495_v38 = vsub.f32 %v2400_v34, %v2465_v17 }
 0x84b   : > { %v2521_v56 = vmul.f32 1.442695, %v2496_v30 }
 0x84c   : > { %v2519_v23 = vmul.f32 1.442695, %v2495_v38 }
 0x84d   : > { %8181 = vpow2.f32 %v2521_v56  ;;  %v2474_v32 = vpop.xlane.xlu0 %2473 }
 0x84e   : > { %8183 = vpow2.f32 %v2519_v23  ;;  %v2498_v35 = vsub.f32 %v6762_v57, %v2474_v32 }
 0x850   : > { %v2525_v60 = vmul.f32 1.442695, %v2498_v35  ;;  %v2480_v47 = vpop.xlane.xlu1 %2479 }
 0x851   : > { %v2500_v61 = vsub.f32 %v6765_v33, %v2480_v47  ;;  %v2471_v46 = vpop.xlane.xlu0 %2470 }
 0x852   : > { %8185 = vpow2.f32 %v2525_v60  ;;  %v2497_v41 = vsub.f32 %v2410_v18, %v2471_v46 }
 0x853   : > { %v2529_v29 = vmul.f32 1.442695, %v2500_v61 }
 0x854   : > { %v2523_v12 = vmul.f32 1.442695, %v2497_v41  ;;  %v2486_v15 = vpop.xlane.xlu1 %2485 }
 0x855   : > { %8187 = vpow2.f32 %v2529_v29  ;;  %v2502_v24 = vsub.f32 %v6768_v26, %v2486_v15  ;;  %v2477_v14 = vpop.xlane.xlu0 %2476 }
 0x856   : > { %8189 = vpow2.f32 %v2523_v12  ;;  %v2499_v34 = vsub.f32 %v2420_v63, %v2477_v14 }
 0x857   : > { %v9696_v59 = vpop.eup %8181  ;;  %v2533_v48 = vmul.f32 1.442695, %v2502_v24 }
 0x858   : > { %v9698_v51 = vpop.eup %8183  ;;  %v2527_v57 = vmul.f32 1.442695, %v2499_v34  ;;  %v2562_v33 = vsel %vm360_vm0, %v9696_v59, 0.0  ;;  %v7892_v63 = vpop.permute.xlu1 %7891 }
 0x859   : > { %8191 = vpow2.f32 %v2533_v48  ;;  %2563 = vadd.xlane.f32.xlu1 %v2562_v33  ;;  %v2483_v18 = vpop.xlane.xlu0 %2482  ;;  %v2559_v5 = vsel %vm360_vm0, %v9698_v51, 0.0  ;;  %v7894_v35 = vunpack.i.h.bf16 %v7892_v63  ;;  %v7893_v60 = vunpack.i.l.bf16 %v7892_v63 }
 0x85a   : > { %8193 = vpow2.f32 %v2527_v57  ;;  %v2501_v26 = vsub.f32 %v2430_v28, %v2483_v18  ;;  %2560 = vadd.xlane.f32.xlu0 %v2559_v5  ;;  %v2439_v48 = vsel %vm360_vm0, %v9673_v43, -inf  ;;  %v2442_v57 = vsel %vm360_vm0, %v9671_v3, -inf }
 0x85b   : > { %v7429_v29 = vpack.c.bf16 %v7894_v35, %v7893_v60  ;;  %v2445_v33 = vsel %vm360_vm0, %v9679_v0, -inf  ;;  %v2448_v18 = vsel %vm360_vm0, %v9677_v40, -inf  ;;  %v2454_v5 = vsel %vm360_vm0, %v9683_v9, -inf }
 0x85c   : > { %v9704_v49 = vpop.eup %8185  ;;  %v2531_v30 = vmul.f32 1.442695, %v2501_v26  ;;  %v2451_v26 = vsel %vm360_vm0, %v9685_v20, -inf  ;;  %v2460_v63 = vsel %vm360_vm0, %v9688_v1, -inf }
 0x85d   : > { %v7887_v17 = vpop.permute.xlu0 %7886  ;;  %v2568_v38 = vsel %vm360_vm0, %v9704_v49, 0.0 }
 0x85e   : > { %8195 = vpow2.f32 %v2531_v30  ;;  %v7889_v56 = vunpack.i.h.bf16 %v7887_v17  ;;  %v7888_v23 = vunpack.i.l.bf16 %v7887_v17  ;;  %2569 = vadd.xlane.f32.xlu1 %v2568_v38  ;;  %v2457_v30 = vsel %vm360_vm0, %v9690_v31, -inf }
 0x85f   : > { %v9708_v32 = vpop.eup %8187 }
 0x860   : > { %v9710_v47 = vpop.eup %8189  ;;  %v2574_v28 = vsel %vm360_vm0, %v9708_v32, 0.0  ;;  %v7425_v61 = vpack.c.bf16 %v7889_v56, %v7888_v23 }
 0x861   : > { %v2565_v46 = vsel %vm360_vm0, %v9710_v47, 0.0 }
 0x862   : > { %2575 = vadd.xlane.f32.xlu1 %v2574_v28  ;;  %2566 = vadd.xlane.f32.xlu0 %v2565_v46 }
 0x863   : > { %v9716_v41 = vpop.eup %8191  ;;  %7426 = vmatprep.subr.bf16.mxu1 %v7425_v61 }
 0x864   : > { %v9718_v12 = vpop.eup %8193  ;;  %7428 = vmatpush3.bf16.msra.mxu1 %v7425_v61  ;;  %v2580_v15 = vsel %vm360_vm0, %v9716_v41, 0.0 }
 0x865   : > { %7430 = vmatprep.subr.bf16.mxu1 %v7429_v29  ;;  %v2571_v24 = vsel %vm360_vm0, %v9718_v12, 0.0 }
 0x866   : > { %2581 = vadd.xlane.f32.xlu1 %v2580_v15  ;;  %2572 = vadd.xlane.f32.xlu0 %v2571_v24 }
 0x868   : > { %v9724_v14 = vpop.eup %8195  ;;  %7432 = vmatpush3.bf16.msra.mxu1 %v7429_v29 }
 0x869   : > { %v2577_v34 = vsel %vm360_vm0, %v9724_v14, 0.0 }
 0x86a   : > { %2578 = vadd.xlane.f32.xlu1 %v2577_v34 }
 0x87b   : > { %7901 = vrot.lane.b32.xlu1 %v9277_v44, %s8570_s10 }
 0x87c   : > { %7896 = vrot.lane.b32.xlu0 %v9262_v36, %s8570_s10 }
 0x89b   : > { %2440 = vmax.xlane.f32.xlu0 %v2439_v48 }
 0x89f   : > { %2443 = vmax.xlane.f32.xlu1 %v2442_v57  ;;  %2446 = vmax.xlane.f32.xlu0 %v2445_v33  ;;  %v3152_v33 = vld [vmem:[#allocation5 + $0x80] sm:$0xff] }
 0x8a3   : > { %2449 = vmax.xlane.f32.xlu0 %v2448_v18  ;;  %2455 = vmax.xlane.f32.xlu1 %v2454_v5  ;;  %v3153_v18 = vld [vmem:[#allocation5 + $0x88] sm:$0xff] }
 0x8a7   : > { %2452 = vmax.xlane.f32.xlu0 %v2451_v26  ;;  %2461 = vmax.xlane.f32.xlu1 %v2460_v63  ;;  %v7449_v63 = vpack.c.bf16 %v3153_v18, %v3152_v33 }
 0x8ab   : > { %2458 = vmax.xlane.f32.xlu0 %v2457_v30 }
 0x8e6   : > { %v2564_v17 = vpop.xlane.xlu1 %2563 }
 0x8e7   : > { %v2561_v38 = vpop.xlane.xlu0 %2560 }
 0x8e8   : > { %8197 = vrcp.f32 %v2561_v38  ;;  %v3155_v38 = vld [vmem:[#allocation5 + $0x98] sm:$0xff] }
 0x8e9   : > { %8199 = vrcp.f32 %v2564_v17  ;;  %v3154_v17 = vld [vmem:[#allocation5 + $0x90] sm:$0xff] }
 0x8eb   : > { %v2570_v56 = vpop.xlane.xlu1 %2569 }
 0x8ef   : > { %v2576_v23 = vpop.xlane.xlu1 %2575  ;;  %v2567_v35 = vpop.xlane.xlu0 %2566 }
 0x8f0   : > { %8201 = vrcp.f32 %v2567_v35 }
 0x8f1   : > { %8203 = vrcp.f32 %v2570_v56 }
 0x8f2   : > { %v8198_v60 = vpop.eup %8197 }
 0x8f3   : > { %v2582_v28 = vpop.xlane.xlu1 %2581  ;;  %v2573_v61 = vpop.xlane.xlu0 %2572  ;;  %v2607_v46 = vmul.f32 %v8198_v60, %v9698_v51  ;;  %v7453_v60 = vpack.c.bf16 %v3155_v38, %v3154_v17 }
 0x8f4   : > { %8205 = vrcp.f32 %v2573_v61  ;;  %v8200_v30 = vpop.eup %8199 }
 0x8f5   : > { %6813 = vmatprep.mubr.msk.f32.mxu1 %vm360_vm0, %v2607_v46  ;;  %8207 = vrcp.f32 %v2576_v23  ;;  %v2608_v56 = vmul.f32 %v8200_v30, %v9696_v59  ;;  %v3157_v23 = vld [vmem:[#allocation5 + $0xa8] sm:$0xff] }
 0x8f7   : > { %v2579_v29 = vpop.xlane.xlu1 %2578  ;;  %v7897_v15 = vpop.permute.xlu0 %7896 }
 0x8f8   : > { %v7899_v24 = vunpack.i.h.bf16 %v7897_v15  ;;  %v7898_v34 = vunpack.i.l.bf16 %v7897_v15  ;;  %8209 = vrcp.f32 %v2579_v29  ;;  %v3156_v15 = vld [vmem:[#allocation5 + $0xa0] sm:$0xff] }
 0x8f9   : > { %8211 = vrcp.f32 %v2582_v28  ;;  %v7457_v28 = vpack.c.bf16 %v3157_v23, %v3156_v15 }
 0x8fa   : > { %v7433_v48 = vpack.c.bf16 %v7899_v24, %v7898_v34  ;;  %v8202_v35 = vpop.eup %8201 }
 0x8fb   : > { %v7902_v57 = vpop.permute.xlu1 %7901  ;;  %v8204_v61 = vpop.eup %8203  ;;  %v2609_v46 = vmul.f32 %v8202_v35, %v9710_v47 }
 0x8fc   : > { %v7904_v5 = vunpack.i.h.bf16 %v7902_v57  ;;  %v7903_v26 = vunpack.i.l.bf16 %v7902_v57  ;;  %7434 = vmatprep.subr.bf16.mxu1 %v7433_v48  ;;  %v2610_v29 = vmul.f32 %v8204_v61, %v9704_v49  ;;  %v3159_v57 = vld [vmem:[#allocation5 + $0xb8] sm:$0xff] }
 0x8fd   : > { %7436 = vmatpush3.bf16.msra.mxu1 %v7433_v48  ;;  %v3158_v48 = vld [vmem:[#allocation5 + $0xb0] sm:$0xff] }
 0x8fe   : > { %v7437_v51 = vpack.c.bf16 %v7904_v5, %v7903_v26  ;;  %v8206_v24 = vpop.eup %8205  ;;  %v7461_v18 = vpack.c.bf16 %v3159_v57, %v3158_v48 }
 0x8ff   : > { %v8208_v34 = vpop.eup %8207  ;;  %v2611_v59 = vmul.f32 %v8206_v24, %v9718_v12 }
 0x900   : > { %7438 = vmatprep.subr.bf16.mxu1 %v7437_v51  ;;  %v2612_v47 = vmul.f32 %v8208_v34, %v9708_v32 }
 0x901   : > { %7440 = vmatpush3.bf16.msra.mxu1 %v7437_v51 }
 0x902   : > { %7450 = vmatprep.subr.bf16.mxu1 %v7449_v63  ;;  %v8210_v33 = vpop.eup %8209 }
 0x903   : > { %v8212_v5 = vpop.eup %8211  ;;  %v2613_v49 = vmul.f32 %v8210_v33, %v9724_v14 }
 0x904   : > { %6814 = vmatmul.mubr.msk.f32.vlgmr.msra.gmra.mrb[64].mxu1 %vm360_vm0, %v2608_v56  ;;  %v2614_v12 = vmul.f32 %v8212_v5, %v9716_v41 }
 0x905   : > { %6816 = vmatprep.mubr.msk.f32.mxu1 %vm360_vm0, %v2609_v46  ;;  %7452 = vmatpush3.bf16.msra.mxu1 %v7449_v63 }
 0x906   : > { %7454 = vmatprep.subr.bf16.mxu1 %v7453_v60 }
 0x908   : > { %6817 = vmatmul.mubr.msk.f32.gmra.mrb[66].mxu1 %vm360_vm0, %v2610_v29 }
 0x909   : > { %6819 = vmatprep.mubr.msk.f32.mxu1 %vm360_vm0, %v2611_v59  ;;  %7456 = vmatpush3.bf16.msra.mxu1 %v7453_v60 }
 0x90a   : > { %7458 = vmatprep.subr.bf16.mxu1 %v7457_v28 }
 0x90c   : > { %6820 = vmatmul.mubr.msk.f32.gmra.mrb[68].mxu1 %vm360_vm0, %v2612_v47 }
 0x90d   : > { %6822 = vmatprep.mubr.msk.f32.mxu1 %vm360_vm0, %v2613_v49  ;;  %7460 = vmatpush3.bf16.msra.mxu1 %v7457_v28 }
 0x90e   : > { %7462 = vmatprep.subr.bf16.mxu1 %v7461_v18 }
 0x910   : > { %6823 = vmatmul.mubr.msk.f32.gmra.mrb[70].mxu1 %vm360_vm0, %v2614_v12 }
 0x911   : > { %7464 = vmatpush3.bf16.msra.mxu1 %v7461_v18  ;;  %6873 = vmatprep.mubr.msk.f32.mxu1 %vm360_vm0, %v9007_v4 }
 0x914   : > { %6874 = vmatmul.mubr.msk.f32.vlgmr.msra.gmra.mrb[72].mxu1 %vm360_vm0, %v9018_v19 }
 0x915   : > { %6876 = vmatprep.mubr.msk.f32.mxu1 %vm360_vm0, %v9026_v27 }
 0x918   : > { %6877 = vmatmul.mubr.msk.f32.gmra.mrb[74].mxu1 %vm360_vm0, %v9036_v39 }
 0x919   : > { %6879 = vmatprep.mubr.msk.f32.mxu1 %vm360_vm0, %v9044_v55 }
 0x91c   : > { %6880 = vmatmul.mubr.msk.f32.gmra.mrb[76].mxu1 %vm360_vm0, %v9054_v53 }
 0x91d   : > { %6882 = vmatprep.mubr.msk.f32.mxu1 %vm360_vm0, %v9058_v58 }
 0x920   : > { %6883 = vmatmul.mubr.msk.f32.gmra.mrb[78].mxu1 %vm360_vm0, %v9072_v62 }
 0x921   : > { %6885 = vmatprep.mubr.msk.f32.mxu1 %vm360_vm0, %v9076_v2 }
 0x924   : > { %6886 = vmatmul.mubr.msk.f32.gmra.mrb[80].mxu1 %vm360_vm0, %v9090_v6 }
 0x925   : > { %6888 = vmatprep.mubr.msk.f32.mxu1 %vm360_vm0, %v9094_v8 }
 0x928   : > { %6889 = vmatmul.mubr.msk.f32.gmra.mrb[82].mxu1 %vm360_vm0, %v9108_v13  ;;  %v2441_v32 = vpop.xlane.xlu0 %2440 }
 0x929   : > { %v2487_v41 = vsub.f32 %v9673_v43, %v2441_v32  ;;  %6891 = vmatprep.mubr.msk.f32.mxu1 %vm360_vm0, %v9112_v37 }
 0x92b   : > { %v2503_v14 = vmul.f32 1.442695, %v2487_v41 }
 0x92c   : > { %6892 = vmatmul.mubr.msk.f32.gmra.mrb[84].mxu1 %vm360_vm0, %v9126_v22  ;;  %v2444_v26 = vpop.xlane.xlu1 %2443  ;;  %v2447_v51 = vpop.xlane.xlu0 %2446 }
 0x92d   : > { %8213 = vpow2.f32 %v2503_v14  ;;  %v2488_v63 = vsub.f32 %v9671_v3, %v2444_v26  ;;  %v2489_v30 = vsub.f32 %v9679_v0, %v2447_v51  ;;  %6894 = vmatprep.mubr.msk.f32.mxu1 %vm360_vm0, %v9129_v16 }
 0x92f   : > { %v2505_v17 = vmul.f32 1.442695, %v2488_v63  ;;  %v2507_v38 = vmul.f32 1.442695, %v2489_v30 }
 0x930   : > { %6895 = vmatmul.mubr.msk.f32.gmra.mrb[86].mxu1 %vm360_vm0, %v9141_v52  ;;  %v2450_v43 = vpop.xlane.xlu0 %2449  ;;  %v2456_v35 = vpop.xlane.xlu1 %2455 }
 0x931   : > { %8215 = vpow2.f32 %v2505_v17  ;;  %v2490_v56 = vsub.f32 %v9677_v40, %v2450_v43  ;;  %v2492_v60 = vsub.f32 %v9683_v9, %v2456_v35 }
 0x932   : > { %8217 = vpow2.f32 %v2507_v38 }
 0x933   : > { %v2509_v61 = vmul.f32 1.442695, %v2490_v56  ;;  %v2513_v3 = vmul.f32 1.442695, %v2492_v60 }
 0x934   : > { %v2453_v46 = vpop.xlane.xlu0 %2452  ;;  %v2462_v0 = vpop.xlane.xlu1 %2461 }
 0x935   : > { %8219 = vpow2.f32 %v2509_v61  ;;  %v2491_v15 = vsub.f32 %v9685_v20, %v2453_v46  ;;  %v2494_v29 = vsub.f32 %v9688_v1, %v2462_v0 }
 0x936   : > { %8221 = vpow2.f32 %v2513_v3 }
 0x937   : > { %v8214_v23 = vpop.eup %8213  ;;  %v2511_v24 = vmul.f32 1.442695, %v2491_v15  ;;  %v2517_v59 = vmul.f32 1.442695, %v2494_v29 }
 0x938   : > { %v2459_v28 = vpop.xlane.xlu0 %2458  ;;  %v2535_v34 = vsel %vm360_vm0, %v8214_v23, 0.0 }
 0x939   : > { %8223 = vpow2.f32 %v2511_v24  ;;  %v2493_v40 = vsub.f32 %v9690_v31, %v2459_v28  ;;  %2536 = vadd.xlane.f32.xlu0 %v2535_v34 }
 0x93b   : > { %v9805_v9 = vpop.eup %8215  ;;  %v2515_v48 = vmul.f32 1.442695, %v2493_v40 }
 0x93c   : > { %v9807_v57 = vpop.eup %8217  ;;  %v2538_v20 = vsel %vm360_vm0, %v9805_v9, 0.0 }
 0x93d   : > { %8225 = vpow2.f32 %v2515_v48  ;;  %2539 = vadd.xlane.f32.xlu1 %v2538_v20  ;;  %v2541_v1 = vsel %vm360_vm0, %v9807_v57, 0.0 }
 0x93e   : > { %2542 = vadd.xlane.f32.xlu0 %v2541_v1  ;;  %8227 = vpow2.f32 %v2517_v59 }
 0x93f   : > { %v9813_v33 = vpop.eup %8219 }
 0x940   : > { %v2544_v31 = vsel %vm360_vm0, %v9813_v33, 0.0  ;;  %v9817_v47 = vpop.eup %8221 }
 0x941   : > { %2545 = vadd.xlane.f32.xlu1 %v2544_v31  ;;  %v2550_v5 = vsel %vm360_vm0, %v9817_v47, 0.0 }
 0x943   : > { %v9819_v18 = vpop.eup %8223 }
 0x944   : > { %v2547_v49 = vsel %vm360_vm0, %v9819_v18, 0.0 }
 0x945   : > { %2551 = vadd.xlane.f32.xlu1 %v2550_v5  ;;  %2548 = vadd.xlane.f32.xlu0 %v2547_v49 }
 0x947   : > { %v9825_v12 = vpop.eup %8225 }
 0x948   : > { %v2553_v32 = vsel %vm360_vm0, %v9825_v12, 0.0  ;;  %v9829_v41 = vpop.eup %8227 }
 0x949   : > { %2554 = vadd.xlane.f32.xlu1 %v2553_v32  ;;  %v2556_v14 = vsel %vm360_vm0, %v9829_v41, 0.0 }
 0x94d   : > { %2557 = vadd.xlane.f32.xlu1 %v2556_v14 }
 0x95b   : > { %7906 = vrot.lane.b32.xlu0 %v9161_v54, %s8570_s10 }
 0x95e   : > { %7911 = vrot.lane.b32.xlu1 %v9180_v42, %s8570_s10 }
 0x95f   : > { %7916 = vrot.lane.b32.xlu0 %v9199_v25, %s8570_s10 }
 0x962   : > { %7921 = vrot.lane.b32.xlu1 %v9218_v10, %s8570_s10 }
 0x9c6   : > { %v2537_v26 = vpop.xlane.xlu0 %2536 }
 0x9c7   : > { %8229 = vrcp.f32 %v2537_v26 }
 0x9ca   : > { %v2540_v51 = vpop.xlane.xlu1 %2539 }
 0x9cb   : > { %v2543_v63 = vpop.xlane.xlu0 %2542  ;;  %8231 = vrcp.f32 %v2540_v51 }
 0x9cc   : > { %8233 = vrcp.f32 %v2543_v63 }
 0x9ce   : > { %v2546_v30 = vpop.xlane.xlu1 %2545 }
 0x9cf   : > { %8235 = vrcp.f32 %v2546_v30 }
 0x9d1   : > { %v8230_v17 = vpop.eup %8229 }
 0x9d2   : > { %v2552_v38 = vpop.xlane.xlu1 %2551  ;;  %v2549_v43 = vpop.xlane.xlu0 %2548  ;;  %v2599_v35 = vmul.f32 %v8230_v17, %v8214_v23 }
 0x9d3   : > { %8237 = vrcp.f32 %v2549_v43 }
 0x9d4   : > { %6785 = vmatprep.mubr.msk.f32.mxu0 %vm360_vm0, %v2599_v35  ;;  %8239 = vrcp.f32 %v2552_v38 }
 0x9d6   : > { %v2555_v56 = vpop.xlane.xlu1 %2554  ;;  %v7907_v60 = vpop.permute.xlu0 %7906 }
 0x9d7   : > { %v7909_v61 = vunpack.i.h.bf16 %v7907_v60  ;;  %v7908_v3 = vunpack.i.l.bf16 %v7907_v60  ;;  %v9842_v46 = vpop.f32.mrb[64].mxu1  ;;  %8241 = vrcp.f32 %v2555_v56 }
 0x9d8   : > { %v9844_v0 = vpop.f32.mrb[65].mxu1 }
 0x9d9   : > { %v7409_v15 = vpack.c.bf16 %v7909_v61, %v7908_v3  ;;  %v8232_v3 = vpop.eup %8231 }
 0x9da   : > { %v2558_v24 = vpop.xlane.xlu1 %2557  ;;  %v7917_v28 = vpop.permute.xlu0 %7916 }
 0x9db   : > { %7410 = vmatprep.subr.bf16.mxu0 %v7409_v15  ;;  %v9846_v29 = vpop.f32.mrb[66].mxu1  ;;  %v7919_v40 = vunpack.i.h.bf16 %v7917_v28  ;;  %v7918_v59 = vunpack.i.l.bf16 %v7917_v28  ;;  %8243 = vrcp.f32 %v2558_v24  ;;  %v2600_v28 = vmul.f32 %v8232_v3, %v9805_v9  ;;  %v2938_v3 = vld [vmem:[#allocation8 + $0x20] sm:$0xff] }
 0x9dc   : > { %7412 = vmatpush3.bf16.msra.mxu0 %v7409_v15  ;;  %v9848_v34 = vpop.f32.mrb[67].mxu1  ;;  %v8234_v15 = vpop.eup %8233 }
 0x9dd   : > { %v7417_v32 = vpack.c.bf16 %v7919_v40, %v7918_v59  ;;  %v2601_v56 = vmul.f32 %v8234_v15, %v9807_v57  ;;  %v2939_v15 = vld [vmem:[#allocation8 + $0x28] sm:$0xff] }
 0x9de   : > { %v7912_v23 = vpop.permute.xlu1 %7911 }
 0x9df   : > { %v7914_v48 = vunpack.i.h.bf16 %v7912_v23  ;;  %v7913_v20 = vunpack.i.l.bf16 %v7912_v23  ;;  %v9850_v1 = vpop.f32.mrb[68].mxu1  ;;  %v8236_v23 = vpop.eup %8235 }
 0x9e0   : > { %v9852_v31 = vpop.f32.mrb[69].mxu1  ;;  %v8238_v40 = vpop.eup %8237  ;;  %v2602_v9 = vmul.f32 %v8236_v23, %v9813_v33 }
 0x9e1   : > { %v7413_v5 = vpack.c.bf16 %v7914_v48, %v7913_v20  ;;  %v8240_v20 = vpop.eup %8239 }
 0x9e2   : > { %v7922_v49 = vpop.permute.xlu1 %7921 }
 0x9e3   : > { %v7924_v14 = vunpack.i.h.bf16 %v7922_v49  ;;  %v7923_v26 = vunpack.i.l.bf16 %v7922_v49  ;;  %7414 = vmatprep.subr.bf16.mxu0 %v7413_v5  ;;  %v9854_v17 = vpop.f32.mrb[70].mxu1  ;;  %v8242_v49 = vpop.eup %8241 }
 0x9e4   : > { %7416 = vmatpush3.bf16.msra.mxu0 %v7413_v5  ;;  %v9856_v35 = vpop.f32.mrb[71].mxu1  ;;  %v2603_v5 = vmul.f32 %v8238_v40, %v9819_v18  ;;  %v2605_v33 = vmul.f32 %v8242_v49, %v9825_v12 }
 0x9e5   : > { %7418 = vmatprep.subr.bf16.mxu0 %v7417_v32  ;;  %v7421_v51 = vpack.c.bf16 %v7924_v14, %v7923_v26  ;;  %v2604_v26 = vmul.f32 %v8240_v20, %v9817_v47  ;;  %v2940_v47 = vld [vmem:[#allocation8 + $0x30] sm:$0xff] }
 0x9e7   : > { %v9858_v60 = vpop.f32.mrb[72].mxu1 }
 0x9e8   : > { %7420 = vmatpush3.bf16.msra.mxu0 %v7417_v32  ;;  %v9860_v63 = vpop.f32.mrb[73].mxu1 }
 0x9e9   : > { %v7945_v61 = vpack.i.bf16 %v9858_v60, %v9860_v63  ;;  %7422 = vmatprep.subr.bf16.mxu0 %v7421_v51 }
 0x9eb   : > { %v9864_v30 = vpop.f32.mrb[74].mxu1 }
 0x9ec   : > { %7424 = vmatpush3.bf16.msra.mxu0 %v7421_v51  ;;  %v9866_v43 = vpop.f32.mrb[75].mxu1  ;;  %v8244_v51 = vpop.eup %8243 }
 0x9ed   : > { %v7950_v38 = vpack.i.bf16 %v9864_v30, %v9866_v43  ;;  %v2606_v40 = vmul.f32 %v8244_v51, %v9829_v41 }
 0x9ef   : > { %6786 = vmatmul.mubr.msk.f32.vlgmr.msra.gmra.mrb[48].mxu0 %vm360_vm0, %v2600_v28  ;;  %v9873_v59 = vpop.f32.mrb[76].mxu1  ;;  %v7441_v28 = vpack.c.bf16 %v2939_v15, %v2938_v3 }
 0x9f0   : > { %6788 = vmatprep.mubr.msk.f32.mxu0 %vm360_vm0, %v2601_v56  ;;  %v9876_v48 = vpop.f32.mrb[77].mxu1 }
 0x9f1   : > { %v7955_v24 = vpack.i.bf16 %v9873_v59, %v9876_v48  ;;  %7442 = vmatprep.subr.bf16.mxu0 %v7441_v28 }
 0x9f2   : > { %7444 = vmatpush3.bf16.msra.mxu0 %v7441_v28 }
 0x9f3   : > { %6789 = vmatmul.mubr.msk.f32.gmra.mrb[50].mxu0 %vm360_vm0, %v2602_v9  ;;  %v9883_v57 = vpop.f32.mrb[78].mxu1  ;;  %v2941_v9 = vld [vmem:[#allocation8 + $0x38] sm:$0xff] }
 0x9f4   : > { %6791 = vmatprep.mubr.msk.f32.mxu0 %vm360_vm0, %v2603_v5  ;;  %v9886_v32 = vpop.f32.mrb[79].mxu1  ;;  %v7445_v12 = vpack.c.bf16 %v2941_v9, %v2940_v47 }
 0x9f5   : > { %v7960_v14 = vpack.i.bf16 %v9883_v57, %v9886_v32 }
 0x9f6   : > { %7446 = vmatprep.subr.bf16.mxu0 %v7445_v12 }
 0x9f7   : > { %6792 = vmatmul.mubr.msk.f32.gmra.mrb[52].mxu0 %vm360_vm0, %v2604_v26  ;;  %v6887_v18 = vpop.f32.mrb[80].mxu1 }
 0x9f8   : > { %6794 = vmatprep.mubr.msk.f32.mxu0 %vm360_vm0, %v2605_v33  ;;  %v3266_v23 = vpop.f32.mrb[81].mxu1  ;;  %7448 = vmatpush3.bf16.msra.mxu0 %v7445_v12 }
 0x9f9   : > { %v7925_v56 = vpack.i.bf16 %v6887_v18, %v3266_v23  ;;  %6941 = vmatprep.mubr.msk.f32.mxu1 %vm1017_vm1, %v3266_v23 }
 0x9fb   : > { %v6890_v20 = vpop.f32.mrb[82].mxu1  ;;  %7926 = vrot.lane.b32.xlu0 %v7925_v56, %s8570_s10  ;;  %6795 = vmatmul.mubr.msk.f32.gmra.mrb[54].mxu0 %vm360_vm0, %v2606_v40 }
 0x9fc   : > { %v3276_v5 = vpop.f32.mrb[83].mxu1 }
 0x9fd   : > { %v7930_v49 = vpack.i.bf16 %v6890_v20, %v3276_v5 }
 0x9ff   : > { %v6893_v26 = vpop.f32.mrb[84].mxu1  ;;  %7931 = vrot.lane.b32.xlu1 %v7930_v49, %s8570_s10 }
 0xa00   : > { %v3286_v33 = vpop.f32.mrb[85].mxu1 }
 0xa01   : > { %v7935_v3 = vpack.i.bf16 %v6893_v26, %v3286_v33 }
 0xa03   : > { %v6896_v41 = vpop.f32.mrb[86].mxu1  ;;  %7936 = vrot.lane.b32.xlu0 %v7935_v3, %s8570_s10 }
 0xa04   : > { %v3296_v51 = vpop.f32.mrb[87].mxu1 }
 0xa05   : > { %v7940_v15 = vpack.i.bf16 %v6896_v41, %v3296_v51 }
 0xa07   : > { %7946 = vrot.lane.b32.xlu0 %v7945_v61, %s8570_s10  ;;  %7941 = vrot.lane.b32.xlu1 %v7940_v15, %s8570_s10 }
 0xa0b   : > { %7956 = vrot.lane.b32.xlu0 %v7955_v24, %s8570_s10  ;;  %7951 = vrot.lane.b32.xlu1 %v7950_v38, %s8570_s10 }
 0xa0f   : > { %7961 = vrot.lane.b32.xlu1 %v7960_v14, %s8570_s10 }
 0xa6d   : > { %v7927_v28 = vpop.permute.xlu0 %7926 }
 0xa6e   : > { %v7929_v23 = vunpack.i.h.bf16 %v7927_v28  ;;  %v7928_v56 = vunpack.i.l.bf16 %v7927_v28 }
 0xa70   : > { %v7489_v40 = vpack.c.bf16 %v7929_v23, %v7928_v56 }
 0xa71   : > { %v7932_v47 = vpop.permute.xlu1 %7931 }
 0xa72   : > { %v7934_v9 = vunpack.i.h.bf16 %v7932_v47  ;;  %v7933_v12 = vunpack.i.l.bf16 %v7932_v47  ;;  %7491 = vmatprep.subr.msk.bf16.mxu1 %vm9284_vm2, %v7489_v40 }
 0xa73   : > { %7494 = vmatpush3.bf16.xpose.msk.msra.mxu1 %vm9284_vm2, %v7489_v40 }
 0xa74   : > { %v7495_v61 = vpack.c.bf16 %v7934_v9, %v7933_v12 }
 0xa75   : > { %v7937_v49 = vpop.permute.xlu0 %7936 }
 0xa76   : > { %v7939_v24 = vunpack.i.h.bf16 %v7937_v49  ;;  %v7938_v3 = vunpack.i.l.bf16 %v7937_v49  ;;  %7497 = vmatprep.subr.msk.bf16.mxu1 %vm9284_vm2, %v7495_v61 }
 0xa78   : > { %v7501_v14 = vpack.c.bf16 %v7939_v24, %v7938_v3 }
 0xa79   : > { %v7947_v38 = vpop.permute.xlu0 %7946  ;;  %v7942_v23 = vpop.permute.xlu1 %7941 }
 0xa7a   : > { %v7949_v15 = vunpack.i.h.bf16 %v7947_v38  ;;  %v7948_v28 = vunpack.i.l.bf16 %v7947_v38  ;;  %v7944_v40 = vunpack.i.h.bf16 %v7942_v23  ;;  %v7943_v47 = vunpack.i.l.bf16 %v7942_v23 }
 0xa7b   : > { %7500 = vmatpush3.bf16.xpose.msk.msra.mxu1 %vm9284_vm2, %v7495_v61 }
 0xa7c   : > { %v7465_v56 = vpack.c.bf16 %v7949_v15, %v7948_v28  ;;  %7503 = vmatprep.subr.msk.bf16.mxu1 %vm9284_vm2, %v7501_v14  ;;  %v7507_v9 = vpack.c.bf16 %v7944_v40, %v7943_v47 }
 0xa7d   : > { %v7952_v12 = vpop.permute.xlu1 %7951 }
 0xa7e   : > { %7467 = vmatprep.subr.msk.bf16.mxu0 %vm9284_vm2, %v7465_v56  ;;  %v7954_v61 = vunpack.i.h.bf16 %v7952_v12  ;;  %v7953_v49 = vunpack.i.l.bf16 %v7952_v12 }
 0xa81   : > { %v7962_v15 = vpop.permute.xlu1 %7961 }
 0xa82   : > { %v7963_v40 = vunpack.i.l.bf16 %v7962_v15 }
 0xa83   : > { %7506 = vmatpush3.bf16.xpose.msk.msra.mxu1 %vm9284_vm2, %v7501_v14 }
 0xa84   : > { %7509 = vmatprep.subr.msk.bf16.mxu1 %vm9284_vm2, %v7507_v9 }
 0xa8b   : > { %7512 = vmatpush3.bf16.xpose.msk.msra.mxu1 %vm9284_vm2, %v7507_v9 }
 0xa92   : > { %6942 = vmatmul.mubr.msk.f32.vlgmr.msra.gmra.mrb[88].mxu1 %vm1017_vm1, %v6887_v18  ;;  %v7471_v18 = vpack.c.bf16 %v7954_v61, %v7953_v49 }
 0xa93   : > { %6944 = vmatprep.mubr.msk.f32.mxu1 %vm1017_vm1, %v3276_v5  ;;  %v7957_v5 = vpop.permute.xlu0 %7956 }
 0xa96   : > { %6945 = vmatmul.mubr.msk.f32.gmra.mrb[90].mxu1 %vm1017_vm1, %v6890_v20 }
 0xa97   : > { %6947 = vmatprep.mubr.msk.f32.mxu1 %vm1017_vm1, %v3286_v33  ;;  %v7959_v33 = vunpack.i.h.bf16 %v7957_v5 }
 0xa9a   : > { %6948 = vmatmul.mubr.msk.f32.gmra.mrb[92].mxu1 %vm1017_vm1, %v6893_v26 }
 0xa9b   : > { %6950 = vmatprep.mubr.msk.f32.mxu1 %vm1017_vm1, %v3296_v51 }
 0xa9e   : > { %6951 = vmatmul.mubr.msk.f32.gmra.mrb[94].mxu1 %vm1017_vm1, %v6896_v41  ;;  %v7958_v41 = vunpack.i.l.bf16 %v7957_v5 }
 0xaa0   : > { %v7477_v14 = vpack.c.bf16 %v7959_v33, %v7958_v41 }
 0xac2   : > { %v6787_v24 = vpop.f32.mrb[48].mxu0 }
 0xac3   : > { %v2737_v3 = vpop.f32.mrb[49].mxu0 }
 0xac4   : > { %6833 = vmatprep.mubr.msk.f32.mxu0 %vm1017_vm1, %v2737_v3 }
 0xac5   : > { %6834 = vmatmul.mubr.msk.f32.vlgmr.msra.gmra.mrb[24].mxu0 %vm1017_vm1, %v6787_v24 }
 0xac6   : > { %7470 = vmatpush3.bf16.xpose.msk.msra.mxu0 %vm9284_vm2, %v7465_v56  ;;  %v6790_v20 = vpop.f32.mrb[50].mxu0  ;;  %v7964_v56 = vunpack.i.h.bf16 %v7962_v15 }
 0xac7   : > { %7473 = vmatprep.subr.msk.bf16.mxu0 %vm9284_vm2, %v7471_v18  ;;  %v2747_v26 = vpop.f32.mrb[51].mxu0 }
 0xac8   : > { %6836 = vmatprep.mubr.msk.f32.mxu0 %vm1017_vm1, %v2747_v26  ;;  %v7483_v47 = vpack.c.bf16 %v7964_v56, %v7963_v40 }
 0xac9   : > { %6837 = vmatmul.mubr.msk.f32.gmra.mrb[26].mxu0 %vm1017_vm1, %v6790_v20 }
 0xaca   : > { %v6793_v51 = vpop.f32.mrb[52].mxu0 }
 0xacb   : > { %v2757_v38 = vpop.f32.mrb[53].mxu0 }
 0xacc   : > { %6839 = vmatprep.mubr.msk.f32.mxu0 %vm1017_vm1, %v2757_v38 }
 0xacd   : > { %6840 = vmatmul.mubr.msk.f32.gmra.mrb[28].mxu0 %vm1017_vm1, %v6793_v51 }
 0xace   : > { %7476 = vmatpush3.bf16.xpose.msk.msra.mxu0 %vm9284_vm2, %v7471_v18  ;;  %v6796_v28 = vpop.f32.mrb[54].mxu0 }
 0xacf   : > { %7479 = vmatprep.subr.msk.bf16.mxu0 %vm9284_vm2, %v7477_v14  ;;  %v2767_v23 = vpop.f32.mrb[55].mxu0 }
 0xad0   : > { %6842 = vmatprep.mubr.msk.f32.mxu0 %vm1017_vm1, %v2767_v23 }
 0xad1   : > { %6843 = vmatmul.mubr.msk.f32.gmra.mrb[30].mxu0 %vm1017_vm1, %v6796_v28 }
 0xad2   : > { %6845 = vmatprep.mubr.msk.f32.mxu0 %vm1017_vm1, %v9844_v0 }
 0xad5   : > { %6846 = vmatmul.mubr.msk.f32.gmra.mrb[32].mxu0 %vm1017_vm1, %v9842_v46 }
 0xad6   : > { %7482 = vmatpush3.bf16.xpose.msk.msra.mxu0 %vm9284_vm2, %v7477_v14  ;;  %6848 = vmatprep.mubr.msk.f32.mxu0 %vm1017_vm1, %v9848_v34 }
 0xad7   : > { %7485 = vmatprep.subr.msk.bf16.mxu0 %vm9284_vm2, %v7483_v47 }
 0xad9   : > { %6849 = vmatmul.mubr.msk.f32.gmra.mrb[34].mxu0 %vm1017_vm1, %v9846_v29 }
 0xada   : > { %6851 = vmatprep.mubr.msk.f32.mxu0 %vm1017_vm1, %v9852_v31 }
 0xadd   : > { %6852 = vmatmul.mubr.msk.f32.gmra.mrb[36].mxu0 %vm1017_vm1, %v9850_v1 }
 0xade   : > { %7488 = vmatpush3.bf16.xpose.msk.msra.mxu0 %vm9284_vm2, %v7483_v47  ;;  %6854 = vmatprep.mubr.msk.f32.mxu0 %vm1017_vm1, %v9856_v35 }
 0xae1   : > { %6855 = vmatmul.mubr.msk.f32.gmra.mrb[38].mxu0 %vm1017_vm1, %v9854_v17 }
 0xae2   : > { %6913 = vmatprep.mubr.msk.f32.mxu0 %vm1017_vm1, %v9860_v63 }
 0xae5   : > { %6914 = vmatmul.mubr.msk.f32.vlgmr.msra.gmra.mrb[56].mxu0 %vm1017_vm1, %v9858_v60 }
 0xae6   : > { %6916 = vmatprep.mubr.msk.f32.mxu0 %vm1017_vm1, %v9866_v43 }
 0xae9   : > { %6917 = vmatmul.mubr.msk.f32.gmra.mrb[58].mxu0 %vm1017_vm1, %v9864_v30 }
 0xaea   : > { %6919 = vmatprep.mubr.msk.f32.mxu0 %vm1017_vm1, %v9876_v48 }
 0xaed   : > { %6920 = vmatmul.mubr.msk.f32.gmra.mrb[60].mxu0 %vm1017_vm1, %v9873_v59 }
 0xaee   : > { %6922 = vmatprep.mubr.msk.f32.mxu0 %vm1017_vm1, %v9886_v32 }
 0xaf1   : > { %6923 = vmatmul.mubr.msk.f32.gmra.mrb[62].mxu0 %vm1017_vm1, %v9883_v57 }
 0xb65   : > { %v9984_v46 = vpop.f32.mrb[88].mxu1 }
 0xb66   : > { %v9986_v0 = vpop.f32.mrb[89].mxu1  ;;  %v3654_v18 = vsel %vm360_vm0, %v9984_v46, -inf }
 0xb67   : > { %v3651_v5 = vsel %vm360_vm0, %v9986_v0, -inf }
 0xb69   : > { %v9988_v29 = vpop.f32.mrb[90].mxu1 }
 0xb6a   : > { %v9990_v34 = vpop.f32.mrb[91].mxu1  ;;  %v3660_v26 = vsel %vm360_vm0, %v9988_v29, -inf }
 0xb6b   : > { %v3657_v41 = vsel %vm360_vm0, %v9990_v34, -inf }
 0xb6d   : > { %v9992_v1 = vpop.f32.mrb[92].mxu1 }
 0xb6e   : > { %v9994_v31 = vpop.f32.mrb[93].mxu1  ;;  %v3666_v20 = vsel %vm360_vm0, %v9992_v1, -inf }
 0xb6f   : > { %v3663_v38 = vsel %vm360_vm0, %v9994_v31, -inf }
 0xb71   : > { %v9996_v17 = vpop.f32.mrb[94].mxu1 }
 0xb72   : > { %v9998_v35 = vpop.f32.mrb[95].mxu1  ;;  %v3672_v33 = vsel %vm360_vm0, %v9996_v17, -inf }
 0xb73   : > { %v3669_v14 = vsel %vm360_vm0, %v9998_v35, -inf }
 0xbb8   : > { %v10000_v60 = vpop.f32.mrb[56].mxu0 }
 0xbb9   : > { %v10002_v63 = vpop.f32.mrb[57].mxu0  ;;  %v3630_v30 = vsel %vm360_vm0, %v10000_v60, -inf }
 0xbba   : > { %3631 = vmax.xlane.f32.xlu1 %v3630_v30  ;;  %v3627_v43 = vsel %vm360_vm0, %v10002_v63, -inf }
 0xbbb   : > { %3628 = vmax.xlane.f32.xlu0 %v3627_v43 }
 0xbbc   : > { %v10008_v59 = vpop.f32.mrb[58].mxu0 }
 0xbbd   : > { %v10010_v48 = vpop.f32.mrb[59].mxu0  ;;  %v3636_v57 = vsel %vm360_vm0, %v10008_v59, -inf }
 0xbbe   : > { %3637 = vmax.xlane.f32.xlu1 %v3636_v57  ;;  %v3633_v32 = vsel %vm360_vm0, %v10010_v48, -inf }
 0xbbf   : > { %3634 = vmax.xlane.f32.xlu0 %v3633_v32 }
 0xbc0   : > { %v10016_v9 = vpop.f32.mrb[60].mxu0 }
 0xbc1   : > { %v10018_v12 = vpop.f32.mrb[61].mxu0  ;;  %v3642_v61 = vsel %vm360_vm0, %v10016_v9, -inf }
 0xbc2   : > { %3643 = vmax.xlane.f32.xlu1 %v3642_v61  ;;  %v3639_v49 = vsel %vm360_vm0, %v10018_v12, -inf }
 0xbc3   : > { %3640 = vmax.xlane.f32.xlu0 %v3639_v49 }
 0xbc4   : > { %v10024_v24 = vpop.f32.mrb[62].mxu0 }
 0xbc5   : > { %v10026_v3 = vpop.f32.mrb[63].mxu0  ;;  %v3648_v51 = vsel %vm360_vm0, %v10024_v24, -inf }
 0xbc6   : > { %3655 = vmax.xlane.f32.xlu1 %v3654_v18  ;;  %v3645_v15 = vsel %vm360_vm0, %v10026_v3, -inf }
 0xbc7   : > { %3652 = vmax.xlane.f32.xlu0 %v3651_v5 }
 0xbca   : > { %3667 = vmax.xlane.f32.xlu1 %v3666_v20 }
 0xbcb   : > { %3661 = vmax.xlane.f32.xlu0 %v3660_v26 }
 0xbce   : > { %3673 = vmax.xlane.f32.xlu1 %v3672_v33 }
 0xbcf   : > { %3658 = vmax.xlane.f32.xlu0 %v3657_v41 }
 0xbd2   : > { %3649 = vmax.xlane.f32.xlu1 %v3648_v51 }
 0xbd3   : > { %3664 = vmax.xlane.f32.xlu0 %v3663_v38 }
 0xbd7   : > { %3670 = vmax.xlane.f32.xlu0 %v3669_v14 }
 0xbdb   : > { %3646 = vmax.xlane.f32.xlu0 %v3645_v15 }
 0xbe3   : > { %7971 = vrot.lane.b32.xlu1 %v9247_v21, %s8571_s20 }
 0xbf1   : > { %7966 = vrot.lane.b32.xlu0 %v9232_v7, %s8571_s20 }
 0xc47   : > { %v10052_v28 = vpop.xlane.xlu1 %3631 }
 0xc48   : > { %v10056_v56 = vpop.xlane.xlu0 %3628 }
 0xc4b   : > { %v10060_v47 = vpop.xlane.xlu1 %3637 }
 0xc4c   : > { %v10064_v43 = vpop.xlane.xlu0 %3634 }
 0xc4f   : > { %v10068_v32 = vpop.xlane.xlu1 %3643 }
 0xc50   : > { %v10072_v49 = vpop.xlane.xlu0 %3640 }
 0xc53   : > { %v3656_v5 = vpop.xlane.xlu1 %3655 }
 0xc54   : > { %v3684_v20 = vsub.f32 %v9984_v46, %v3656_v5  ;;  %v3653_v26 = vpop.xlane.xlu0 %3652 }
 0xc55   : > { %v3683_v33 = vsub.f32 %v9986_v0, %v3653_v26 }
 0xc56   : > { %v3709_v41 = vmul.f32 1.442695, %v3684_v20 }
 0xc57   : > { %v3707_v51 = vmul.f32 1.442695, %v3683_v33  ;;  %v3668_v38 = vpop.xlane.xlu1 %3667 }
 0xc58   : > { %8245 = vpow2.f32 %v3709_v41  ;;  %v3688_v14 = vsub.f32 %v9992_v1, %v3668_v38  ;;  %v3662_v15 = vpop.xlane.xlu0 %3661 }
 0xc59   : > { %8247 = vpow2.f32 %v3707_v51  ;;  %v3686_v61 = vsub.f32 %v9988_v29, %v3662_v15 }
 0xc5a   : > { %v3717_v30 = vmul.f32 1.442695, %v3688_v14 }
 0xc5b   : > { %v3713_v57 = vmul.f32 1.442695, %v3686_v61  ;;  %v3674_v23 = vpop.xlane.xlu1 %3673 }
 0xc5c   : > { %v3690_v18 = vsub.f32 %v9996_v17, %v3674_v23  ;;  %v3659_v40 = vpop.xlane.xlu0 %3658 }
 0xc5d   : > { %8249 = vpow2.f32 %v3713_v57  ;;  %v3685_v46 = vsub.f32 %v9990_v34, %v3659_v40 }
 0xc5e   : > { %8251 = vpow2.f32 %v3717_v30  ;;  %v3721_v0 = vmul.f32 1.442695, %v3690_v18 }
 0xc5f   : > { %v3711_v5 = vmul.f32 1.442695, %v3685_v46  ;;  %v3650_v40 = vpop.xlane.xlu1 %3649 }
 0xc60   : > { %v3665_v20 = vpop.xlane.xlu0 %3664 }
 0xc61   : > { %8253 = vpow2.f32 %v3711_v5  ;;  %v3687_v1 = vsub.f32 %v9994_v31, %v3665_v20 }
 0xc62   : > { %v10083_v26 = vpop.eup %8245  ;;  %8255 = vpow2.f32 %v3721_v0 }
 0xc63   : > { %v10085_v33 = vpop.eup %8247  ;;  %v3715_v29 = vmul.f32 1.442695, %v3687_v1  ;;  %v3750_v17 = vsel %vm360_vm0, %v10083_v26, 0.0  ;;  %v7972_v38 = vpop.permute.xlu1 %7971 }
 0xc64   : > { %v3671_v23 = vpop.xlane.xlu0 %3670  ;;  %3751 = vadd.xlane.f32.xlu1 %v3750_v17  ;;  %v3747_v34 = vsel %vm360_vm0, %v10085_v33, 0.0  ;;  %v7974_v20 = vunpack.i.h.bf16 %v7972_v38  ;;  %v7973_v1 = vunpack.i.l.bf16 %v7972_v38  ;;  %v10695_v38 = vsub.f32 %v10002_v63, %v10056_v56 }
 0xc65   : > { %8257 = vpow2.f32 %v3715_v29  ;;  %v3689_v30 = vsub.f32 %v9998_v35, %v3671_v23  ;;  %3748 = vadd.xlane.f32.xlu0 %v3747_v34 }
 0xc67   : > { %v10092_v31 = vpop.eup %8249  ;;  %v3719_v57 = vmul.f32 1.442695, %v3689_v30  ;;  %v7533_v30 = vpack.c.bf16 %v7974_v20, %v7973_v1  ;;  %v10698_v20 = vsub.f32 %v10008_v59, %v10060_v47 }
 0xc68   : > { %v3647_v61 = vpop.xlane.xlu0 %3646  ;;  %v3756_v18 = vsel %vm360_vm0, %v10092_v31, 0.0  ;;  %v10096_v41 = vpop.eup %8251 }
 0xc69   : > { %8259 = vpow2.f32 %v3719_v57  ;;  %3757 = vadd.xlane.f32.xlu1 %v3756_v18  ;;  %v3762_v15 = vsel %vm360_vm0, %v10096_v41, 0.0  ;;  %v3697_v1 = vmul.f32 1.442695, %v10698_v20  ;;  %v3681_v56 = vsub.f32 %v10026_v3, %v3647_v61 }
 0xc6b   : > { %v10098_v51 = vpop.eup %8253 }
 0xc6c   : > { %v7967_v14 = vpop.permute.xlu0 %7966  ;;  %v3753_v35 = vsel %vm360_vm0, %v10098_v51, 0.0  ;;  %v10104_v46 = vpop.eup %8255 }
 0xc6d   : > { %v7969_v0 = vunpack.i.h.bf16 %v7967_v14  ;;  %v7968_v5 = vunpack.i.l.bf16 %v7967_v14  ;;  %3763 = vadd.xlane.f32.xlu1 %v3762_v15  ;;  %3754 = vadd.xlane.f32.xlu0 %v3753_v35  ;;  %v3768_v23 = vsel %vm360_vm0, %v10104_v46, 0.0  ;;  %v3691_v14 = vmul.f32 1.442695, %v10695_v38 }
 0xc6e   : > { %v10696_v15 = vsub.f32 %v10000_v60, %v10052_v28  ;;  %v10700_v60 = vsub.f32 %v10018_v12, %v10072_v49 }
 0xc6f   : > { %v10106_v29 = vpop.eup %8257  ;;  %v7529_v17 = vpack.c.bf16 %v7969_v0, %v7968_v5  ;;  %8261 = vpow2.f32 %v3691_v14  ;;  %v10697_v0 = vsub.f32 %v10010_v48, %v10064_v43  ;;  %v3682_v48 = vsub.f32 %v10024_v24, %v3650_v40 }
 0xc70   : > { %v3759_v34 = vsel %vm360_vm0, %v10106_v29, 0.0  ;;  %v3693_v35 = vmul.f32 1.442695, %v10696_v15  ;;  %v3699_v28 = vmul.f32 1.442695, %v10700_v60 }
 0xc71   : > { %3769 = vadd.xlane.f32.xlu1 %v3768_v23  ;;  %3760 = vadd.xlane.f32.xlu0 %v3759_v34  ;;  %v3695_v5 = vmul.f32 1.442695, %v10697_v0  ;;  %v3703_v43 = vmul.f32 1.442695, %v3681_v56  ;;  %v3705_v59 = vmul.f32 1.442695, %v3682_v48 }
 0xc72   : > { %7530 = vmatprep.subr.bf16.mxu1 %v7529_v17  ;;  %8263 = vpow2.f32 %v3693_v35 }
 0xc73   : > { %v10112_v57 = vpop.eup %8259  ;;  %7532 = vmatpush3.bf16.msra.mxu1 %v7529_v17  ;;  %8265 = vpow2.f32 %v3695_v5  ;;  %v10699_v17 = vsub.f32 %v10016_v9, %v10068_v32 }
 0xc74   : > { %7534 = vmatprep.subr.bf16.mxu1 %v7533_v30  ;;  %v3765_v18 = vsel %vm360_vm0, %v10112_v57, 0.0  ;;  %8267 = vpow2.f32 %v3697_v1 }
 0xc75   : > { %3766 = vadd.xlane.f32.xlu1 %v3765_v18  ;;  %v3701_v63 = vmul.f32 1.442695, %v10699_v17 }
 0xc77   : > { %7536 = vmatpush3.bf16.msra.mxu1 %v7533_v30  ;;  %8269 = vpow2.f32 %v3701_v63 }
 0xc78   : > { %8271 = vpow2.f32 %v3699_v28 }
 0xc79   : > { %v10140_v23 = vpop.eup %8261  ;;  %8273 = vpow2.f32 %v3703_v43 }
 0xc7a   : > { %v3723_v9 = vsel %vm360_vm0, %v10140_v23, 0.0  ;;  %8275 = vpow2.f32 %v3705_v59 }
 0xc7c   : > { %v10142_v47 = vpop.eup %8263 }
 0xc7d   : > { %v10146_v3 = vpop.eup %8265  ;;  %v3726_v24 = vsel %vm360_vm0, %v10142_v47, 0.0 }
 0xc7e   : > { %v10148_v12 = vpop.eup %8267  ;;  %v3729_v32 = vsel %vm360_vm0, %v10146_v3, 0.0 }
 0xc7f   : > { %v3732_v34 = vsel %vm360_vm0, %v10148_v12, 0.0 }
 0xc81   : > { %v10154_v49 = vpop.eup %8269 }
 0xc82   : > { %v10156_v40 = vpop.eup %8271  ;;  %v3738_v61 = vsel %vm360_vm0, %v10154_v49, 0.0 }
 0xc83   : > { %v10162_v30 = vpop.eup %8273  ;;  %v3735_v18 = vsel %vm360_vm0, %v10156_v40, 0.0 }
 0xc84   : > { %v3741_v38 = vsel %vm360_vm0, %v10162_v30, 0.0  ;;  %v10168_v14 = vpop.eup %8275 }
 0xc85   : > { %v3744_v15 = vsel %vm360_vm0, %v10168_v14, 0.0 }
 0xc86   : > { %7981 = vrot.lane.b32.xlu1 %v9277_v44, %s8571_s20 }
 0xc87   : > { %7976 = vrot.lane.b32.xlu0 %v9262_v36, %s8571_s20 }
 0xca6   : > { %3724 = vadd.xlane.f32.xlu0 %v3723_v9 }
 0xcaa   : > { %3727 = vadd.xlane.f32.xlu1 %v3726_v24  ;;  %3730 = vadd.xlane.f32.xlu0 %v3729_v32  ;;  %v4324_v32 = vld [vmem:[#allocation5 + $0xc0] sm:$0xff] }
 0xcae   : > { %3739 = vadd.xlane.f32.xlu1 %v3738_v61  ;;  %3733 = vadd.xlane.f32.xlu0 %v3732_v34  ;;  %v4325_v61 = vld [vmem:[#allocation5 + $0xc8] sm:$0xff] }
 0xcb2   : > { %3736 = vadd.xlane.f32.xlu0 %v3735_v18  ;;  %3742 = vadd.xlane.f32.xlu1 %v3741_v38  ;;  %v7553_v38 = vpack.c.bf16 %v4325_v61, %v4324_v32 }
 0xcb6   : > { %3745 = vadd.xlane.f32.xlu1 %v3744_v15 }
 0xcc7   : > { %7991 = vrot.lane.b32.xlu1 %v9180_v42, %s8571_s20 }
 0xcc8   : > { %7986 = vrot.lane.b32.xlu0 %v9161_v54, %s8571_s20 }
 0xccb   : > { %8001 = vrot.lane.b32.xlu1 %v9218_v10, %s8571_s20 }
 0xccc   : > { %7996 = vrot.lane.b32.xlu0 %v9199_v25, %s8571_s20 }
 0xcf1   : > { %v3752_v35 = vpop.xlane.xlu1 %3751 }
 0xcf2   : > { %v3749_v0 = vpop.xlane.xlu0 %3748 }
 0xcf3   : > { %8277 = vrcp.f32 %v3749_v0  ;;  %v4327_v0 = vld [vmem:[#allocation5 + $0xd8] sm:$0xff] }
 0xcf4   : > { %8279 = vrcp.f32 %v3752_v35  ;;  %v4326_v35 = vld [vmem:[#allocation5 + $0xd0] sm:$0xff] }
 0xcf6   : > { %v3758_v5 = vpop.xlane.xlu1 %3757 }
 0xcfa   : > { %v3764_v20 = vpop.xlane.xlu1 %3763  ;;  %v3755_v1 = vpop.xlane.xlu0 %3754 }
 0xcfb   : > { %8281 = vrcp.f32 %v3755_v1 }
 0xcfc   : > { %8283 = vrcp.f32 %v3758_v5 }
 0xcfd   : > { %v8278_v17 = vpop.eup %8277 }
 0xcfe   : > { %v3770_v63 = vpop.xlane.xlu1 %3769  ;;  %v3761_v56 = vpop.xlane.xlu0 %3760  ;;  %v3795_v60 = vmul.f32 %v8278_v17, %v10085_v33  ;;  %v7557_v17 = vpack.c.bf16 %v4327_v0, %v4326_v35 }
 0xcff   : > { %8285 = vrcp.f32 %v3761_v56  ;;  %v8280_v15 = vpop.eup %8279 }
 0xd00   : > { %6997 = vmatprep.mubr.msk.f32.mxu1 %vm360_vm0, %v3795_v60  ;;  %8287 = vrcp.f32 %v3764_v20  ;;  %v3796_v5 = vmul.f32 %v8280_v15, %v10083_v26  ;;  %v4329_v20 = vld [vmem:[#allocation5 + $0xe8] sm:$0xff] }
 0xd02   : > { %v3767_v28 = vpop.xlane.xlu1 %3766  ;;  %v7977_v48 = vpop.permute.xlu0 %7976 }
 0xd03   : > { %v7979_v43 = vunpack.i.h.bf16 %v7977_v48  ;;  %v7978_v59 = vunpack.i.l.bf16 %v7977_v48  ;;  %8289 = vrcp.f32 %v3767_v28  ;;  %v4328_v48 = vld [vmem:[#allocation5 + $0xe0] sm:$0xff] }
 0xd04   : > { %8291 = vrcp.f32 %v3770_v63  ;;  %v7561_v63 = vpack.c.bf16 %v4329_v20, %v4328_v48 }
 0xd05   : > { %v7537_v9 = vpack.c.bf16 %v7979_v43, %v7978_v59  ;;  %v8282_v1 = vpop.eup %8281 }
 0xd06   : > { %v7982_v24 = vpop.permute.xlu1 %7981  ;;  %v8284_v56 = vpop.eup %8283  ;;  %v3797_v60 = vmul.f32 %v8282_v1, %v10098_v51 }
 0xd07   : > { %v7984_v34 = vunpack.i.h.bf16 %v7982_v24  ;;  %v7983_v18 = vunpack.i.l.bf16 %v7982_v24  ;;  %7538 = vmatprep.subr.bf16.mxu1 %v7537_v9  ;;  %v3798_v28 = vmul.f32 %v8284_v56, %v10092_v31  ;;  %v4331_v24 = vld [vmem:[#allocation5 + $0xf8] sm:$0xff] }
 0xd08   : > { %7540 = vmatpush3.bf16.msra.mxu1 %v7537_v9  ;;  %v4330_v9 = vld [vmem:[#allocation5 + $0xf0] sm:$0xff] }
 0xd09   : > { %v7541_v33 = vpack.c.bf16 %v7984_v34, %v7983_v18  ;;  %v8286_v43 = vpop.eup %8285  ;;  %v7565_v61 = vpack.c.bf16 %v4331_v24, %v4330_v9  ;;  %v4112_v9 = vld [vmem:[#allocation8 + $0x50] sm:$0xff] }
 0xd0a   : > { %v8288_v59 = vpop.eup %8287  ;;  %v3799_v26 = vmul.f32 %v8286_v43, %v10106_v29 }
 0xd0b   : > { %7542 = vmatprep.subr.bf16.mxu1 %v7541_v33  ;;  %v3800_v51 = vmul.f32 %v8288_v59, %v10096_v41 }
 0xd0c   : > { %7544 = vmatpush3.bf16.msra.mxu1 %v7541_v33 }
 0xd0d   : > { %7554 = vmatprep.subr.bf16.mxu1 %v7553_v38  ;;  %v8290_v32 = vpop.eup %8289 }
 0xd0e   : > { %v8292_v34 = vpop.eup %8291  ;;  %v3801_v31 = vmul.f32 %v8290_v32, %v10112_v57  ;;  %v4113_v32 = vld [vmem:[#allocation8 + $0x58] sm:$0xff] }
 0xd0f   : > { %6998 = vmatmul.mubr.msk.f32.vlgmr.msra.gmra.mrb[96].mxu1 %vm360_vm0, %v3796_v5  ;;  %v3802_v29 = vmul.f32 %v8292_v34, %v10104_v46 }
 0xd10   : > { %7000 = vmatprep.mubr.msk.f32.mxu1 %vm360_vm0, %v3797_v60  ;;  %7556 = vmatpush3.bf16.msra.mxu1 %v7553_v38 }
 0xd11   : > { %7558 = vmatprep.subr.bf16.mxu1 %v7557_v17 }
 0xd13   : > { %7001 = vmatmul.mubr.msk.f32.gmra.mrb[98].mxu1 %vm360_vm0, %v3798_v28 }
 0xd14   : > { %7003 = vmatprep.mubr.msk.f32.mxu1 %vm360_vm0, %v3799_v26  ;;  %7560 = vmatpush3.bf16.msra.mxu1 %v7557_v17 }
 0xd15   : > { %7562 = vmatprep.subr.bf16.mxu1 %v7561_v63 }
 0xd17   : > { %7004 = vmatmul.mubr.msk.f32.gmra.mrb[100].mxu1 %vm360_vm0, %v3800_v51  ;;  %v7549_v51 = vpack.c.bf16 %v4113_v32, %v4112_v9 }
 0xd18   : > { %7006 = vmatprep.mubr.msk.f32.mxu1 %vm360_vm0, %v3801_v31  ;;  %7564 = vmatpush3.bf16.msra.mxu1 %v7561_v63 }
 0xd19   : > { %7566 = vmatprep.subr.bf16.mxu1 %v7565_v61 }
 0xd1b   : > { %7007 = vmatmul.mubr.msk.f32.gmra.mrb[102].mxu1 %vm360_vm0, %v3802_v29 }
 0xd1c   : > { %7568 = vmatpush3.bf16.msra.mxu1 %v7565_v61  ;;  %7057 = vmatprep.mubr.msk.f32.mxu1 %vm360_vm0, %v9007_v4 }
 0xd1f   : > { %7058 = vmatmul.mubr.msk.f32.vlgmr.msra.gmra.mrb[104].mxu1 %vm360_vm0, %v9018_v19 }
 0xd20   : > { %7060 = vmatprep.mubr.msk.f32.mxu1 %vm360_vm0, %v9026_v27 }
 0xd23   : > { %7061 = vmatmul.mubr.msk.f32.gmra.mrb[106].mxu1 %vm360_vm0, %v9036_v39 }
 0xd24   : > { %7063 = vmatprep.mubr.msk.f32.mxu1 %vm360_vm0, %v9044_v55 }
 0xd27   : > { %7064 = vmatmul.mubr.msk.f32.gmra.mrb[108].mxu1 %vm360_vm0, %v9054_v53 }
 0xd28   : > { %7066 = vmatprep.mubr.msk.f32.mxu1 %vm360_vm0, %v9058_v58 }
 0xd2b   : > { %7067 = vmatmul.mubr.msk.f32.gmra.mrb[110].mxu1 %vm360_vm0, %v9072_v62 }
 0xd2c   : > { %7069 = vmatprep.mubr.msk.f32.mxu1 %vm360_vm0, %v9076_v2 }
 0xd2f   : > { %7070 = vmatmul.mubr.msk.f32.gmra.mrb[112].mxu1 %vm360_vm0, %v9090_v6 }
 0xd30   : > { %7072 = vmatprep.mubr.msk.f32.mxu1 %vm360_vm0, %v9094_v8 }
 0xd33   : > { %v3725_v4 = vpop.xlane.xlu0 %3724  ;;  %7073 = vmatmul.mubr.msk.f32.gmra.mrb[114].mxu1 %vm360_vm0, %v9108_v13 }
 0xd34   : > { %8293 = vrcp.f32 %v3725_v4  ;;  %7075 = vmatprep.mubr.msk.f32.mxu1 %vm360_vm0, %v9112_v37 }
 0xd37   : > { %v3728_v19 = vpop.xlane.xlu1 %3727  ;;  %v3731_v27 = vpop.xlane.xlu0 %3730  ;;  %7076 = vmatmul.mubr.msk.f32.gmra.mrb[116].mxu1 %vm360_vm0, %v9126_v22 }
 0xd38   : > { %7078 = vmatprep.mubr.msk.f32.mxu1 %vm360_vm0, %v9129_v16  ;;  %8295 = vrcp.f32 %v3728_v19 }
 0xd39   : > { %8297 = vrcp.f32 %v3731_v27 }
 0xd3b   : > { %v3740_v39 = vpop.xlane.xlu1 %3739  ;;  %v3734_v55 = vpop.xlane.xlu0 %3733  ;;  %7079 = vmatmul.mubr.msk.f32.gmra.mrb[118].mxu1 %vm360_vm0, %v9141_v52 }
 0xd3c   : > { %8299 = vrcp.f32 %v3734_v55 }
 0xd3e   : > { %v8294_v53 = vpop.eup %8293 }
 0xd3f   : > { %v3743_v58 = vpop.xlane.xlu1 %3742  ;;  %v3737_v62 = vpop.xlane.xlu0 %3736  ;;  %v3787_v2 = vmul.f32 %v8294_v53, %v10140_v23 }
 0xd40   : > { %8301 = vrcp.f32 %v3737_v62 }
 0xd41   : > { %6969 = vmatprep.mubr.msk.f32.mxu0 %vm360_vm0, %v3787_v2  ;;  %8303 = vrcp.f32 %v3740_v39 }
 0xd42   : > { %8305 = vrcp.f32 %v3743_v58  ;;  %v8296_v1 = vpop.eup %8295 }
 0xd43   : > { %v3746_v6 = vpop.xlane.xlu1 %3745  ;;  %v7987_v8 = vpop.permute.xlu0 %7986  ;;  %v3788_v17 = vmul.f32 %v8296_v1, %v10142_v47 }
 0xd44   : > { %v7989_v13 = vunpack.i.h.bf16 %v7987_v8  ;;  %v7988_v37 = vunpack.i.l.bf16 %v7987_v8  ;;  %v8298_v5 = vpop.eup %8297  ;;  %8307 = vrcp.f32 %v3746_v6 }
 0xd45   : > { %v3789_v60 = vmul.f32 %v8298_v5, %v10146_v3 }
 0xd46   : > { %v7513_v22 = vpack.c.bf16 %v7989_v13, %v7988_v37  ;;  %v8300_v56 = vpop.eup %8299 }
 0xd47   : > { %v7992_v41 = vpop.permute.xlu1 %7991  ;;  %v7997_v46 = vpop.permute.xlu0 %7996  ;;  %v3790_v20 = vmul.f32 %v8300_v56, %v10148_v12  ;;  %v4110_v12 = vld [vmem:[#allocation8 + $0x40] sm:$0xff] }
 0xd48   : > { %v7994_v16 = vunpack.i.h.bf16 %v7992_v41  ;;  %v7993_v57 = vunpack.i.l.bf16 %v7992_v41  ;;  %v7999_v18 = vunpack.i.h.bf16 %v7997_v46  ;;  %v7998_v33 = vunpack.i.l.bf16 %v7997_v46  ;;  %7514 = vmatprep.subr.bf16.mxu0 %v7513_v22 }
 0xd49   : > { %7516 = vmatpush3.bf16.msra.mxu0 %v7513_v22 }
 0xd4a   : > { %v7517_v52 = vpack.c.bf16 %v7994_v16, %v7993_v57  ;;  %v7521_v23 = vpack.c.bf16 %v7999_v18, %v7998_v33  ;;  %v8302_v48 = vpop.eup %8301 }
 0xd4b   : > { %v8002_v38 = vpop.permute.xlu1 %8001  ;;  %v8304_v43 = vpop.eup %8303  ;;  %v3791_v28 = vmul.f32 %v8302_v48, %v10156_v40  ;;  %v4111_v40 = vld [vmem:[#allocation8 + $0x48] sm:$0xff] }
 0xd4c   : > { %v8004_v15 = vunpack.i.h.bf16 %v8002_v38  ;;  %v8003_v35 = vunpack.i.l.bf16 %v8002_v38  ;;  %7518 = vmatprep.subr.bf16.mxu0 %v7517_v52  ;;  %v8306_v63 = vpop.eup %8305  ;;  %v3792_v47 = vmul.f32 %v8304_v43, %v10154_v49  ;;  %v7545_v24 = vpack.c.bf16 %v4111_v40, %v4110_v12 }
 0xd4d   : > { %7520 = vmatpush3.bf16.msra.mxu0 %v7517_v52  ;;  %v3793_v3 = vmul.f32 %v8306_v63, %v10162_v30 }
 0xd4e   : > { %7522 = vmatprep.subr.bf16.mxu0 %v7521_v23  ;;  %v7525_v0 = vpack.c.bf16 %v8004_v15, %v8003_v35  ;;  %v8308_v59 = vpop.eup %8307 }
 0xd4f   : > { %v3794_v26 = vmul.f32 %v8308_v59, %v10168_v14 }
 0xd51   : > { %7524 = vmatpush3.bf16.msra.mxu0 %v7521_v23 }
 0xd52   : > { %7526 = vmatprep.subr.bf16.mxu0 %v7525_v0 }
 0xd55   : > { %7528 = vmatpush3.bf16.msra.mxu0 %v7525_v0 }
 0xd56   : > { %7546 = vmatprep.subr.bf16.mxu0 %v7545_v24 }
 0xd58   : > { %6970 = vmatmul.mubr.msk.f32.vlgmr.msra.gmra.mrb[64].mxu0 %vm360_vm0, %v3788_v17 }
 0xd59   : > { %6972 = vmatprep.mubr.msk.f32.mxu0 %vm360_vm0, %v3789_v60  ;;  %7548 = vmatpush3.bf16.msra.mxu0 %v7545_v24 }
 0xd5a   : > { %7550 = vmatprep.subr.bf16.mxu0 %v7549_v51 }
 0xd5c   : > { %6973 = vmatmul.mubr.msk.f32.gmra.mrb[66].mxu0 %vm360_vm0, %v3790_v20 }
 0xd5d   : > { %6975 = vmatprep.mubr.msk.f32.mxu0 %vm360_vm0, %v3791_v28  ;;  %7552 = vmatpush3.bf16.msra.mxu0 %v7549_v51 }
 0xd60   : > { %6976 = vmatmul.mubr.msk.f32.gmra.mrb[68].mxu0 %vm360_vm0, %v3792_v47 }
 0xd61   : > { %6978 = vmatprep.mubr.msk.f32.mxu0 %vm360_vm0, %v3793_v3 }
 0xd64   : > { %6979 = vmatmul.mubr.msk.f32.gmra.mrb[70].mxu0 %vm360_vm0, %v3794_v26 }
 0xde2   : > { %v6999_v49 = vpop.f32.mrb[96].mxu1 }
 0xde3   : > { %v4070_v30 = vpop.f32.mrb[97].mxu1 }
 0xde6   : > { %v7002_v61 = vpop.f32.mrb[98].mxu1 }
 0xde7   : > { %v4080_v34 = vpop.f32.mrb[99].mxu1 }
 0xdea   : > { %v7005_v31 = vpop.f32.mrb[100].mxu1 }
 0xdeb   : > { %v4090_v29 = vpop.f32.mrb[101].mxu1 }
 0xdee   : > { %v7008_v4 = vpop.f32.mrb[102].mxu1 }
 0xdef   : > { %v4100_v14 = vpop.f32.mrb[103].mxu1 }
 0xdf2   : > { %v10244_v19 = vpop.f32.mrb[104].mxu1 }
 0xdf3   : > { %v4398_v27 = vpop.f32.mrb[105].mxu1 }
 0xdf4   : > { %v8005_v39 = vpack.i.bf16 %v10244_v19, %v4398_v27 }
 0xdf6   : > { %8006 = vrot.lane.b32.xlu0 %v8005_v39, %s8570_s10  ;;  %v10248_v55 = vpop.f32.mrb[106].mxu1 }
 0xdf7   : > { %v10250_v53 = vpop.f32.mrb[107].mxu1 }
 0xdf8   : > { %v8010_v58 = vpack.i.bf16 %v10248_v55, %v10250_v53 }
 0xdfa   : > { %8011 = vrot.lane.b32.xlu1 %v8010_v58, %s8570_s10  ;;  %v10255_v62 = vpop.f32.mrb[108].mxu1 }
 0xdfb   : > { %v10257_v2 = vpop.f32.mrb[109].mxu1 }
 0xdfc   : > { %v8015_v6 = vpack.i.bf16 %v10255_v62, %v10257_v2 }
 0xdfe   : > { %8016 = vrot.lane.b32.xlu0 %v8015_v6, %s8570_s10  ;;  %v10262_v8 = vpop.f32.mrb[110].mxu1 }
 0xdff   : > { %v10264_v13 = vpop.f32.mrb[111].mxu1 }
 0xe00   : > { %v8025_v37 = vpack.i.bf16 %v10262_v8, %v10264_v13 }
 0xe02   : > { %8026 = vrot.lane.b32.xlu0 %v8025_v37, %s8570_s10  ;;  %v10269_v22 = vpop.f32.mrb[112].mxu1 }
 0xe03   : > { %v4438_v41 = vpop.f32.mrb[113].mxu1 }
 0xe04   : > { %v8020_v46 = vpack.i.bf16 %v10269_v22, %v4438_v41  ;;  %7125 = vmatprep.mubr.msk.f32.mxu1 %vm1017_vm1, %v4438_v41 }
 0xe06   : > { %8021 = vrot.lane.b32.xlu1 %v8020_v46, %s8570_s10  ;;  %v10274_v16 = vpop.f32.mrb[114].mxu1 }
 0xe07   : > { %v10276_v57 = vpop.f32.mrb[115].mxu1 }
 0xe08   : > { %v8030_v18 = vpack.i.bf16 %v10274_v16, %v10276_v57 }
 0xe0a   : > { %8031 = vrot.lane.b32.xlu1 %v8030_v18, %s8570_s10  ;;  %v10281_v33 = vpop.f32.mrb[116].mxu1 }
 0xe0b   : > { %v10283_v52 = vpop.f32.mrb[117].mxu1 }
 0xe0c   : > { %v8035_v38 = vpack.i.bf16 %v10281_v33, %v10283_v52 }
 0xe0e   : > { %8036 = vrot.lane.b32.xlu0 %v8035_v38, %s8570_s10  ;;  %v10288_v23 = vpop.f32.mrb[118].mxu1 }
 0xe0f   : > { %v10290_v15 = vpop.f32.mrb[119].mxu1 }
 0xe10   : > { %v8040_v35 = vpack.i.bf16 %v10288_v23, %v10290_v15 }
 0xe12   : > { %8046 = vrot.lane.b32.xlu0 %v9161_v54, %s8572_s21  ;;  %8041 = vrot.lane.b32.xlu1 %v8040_v35, %s8570_s10  ;;  %s8573_s10 = smov [#allocation10]  }
 0xe13   : > { %s8492_s14 = sshll.u32 %s8573_s10, 4  ;;  %s8493_s14 = int_to_ptr.vmem [resolvable:$false] %s8492_s14 }
 0xe14   : > { %s8494_s12 = scalar_lea.vmem %s8493_s14, 4096  ;;  %p8495_p12 = scmp.lt.s32.totalorder %s10599_s8, %s8493_s14 }
 0xe15   : > { %p8496_p1 = scmp.lt.s32.totalorder %s8494_s12, %s8488_s15 }
 0xe16   : > { %8056 = vrot.lane.b32.xlu0 %v9199_v25, %s8572_s21  ;;  %8051 = vrot.lane.b32.xlu1 %v9180_v42, %s8572_s21 }
 0xe17   : > { %p8497_p2 = por %p8496_p1, %p8495_p12 }
 0xe19   : > { %p8498_p4 = pnand %p8497_p2, %p8491_p7 }
 0xe2b   : > { %v6971_v0 = vpop.f32.mrb[64].mxu0 }
 0xe2c   : > { %v3917_v1 = vpop.f32.mrb[65].mxu0 }
 0xe2d   : > { %7017 = vmatprep.mubr.msk.f32.mxu0 %vm1017_vm1, %v3917_v1 }
 0xe2e   : > { %7018 = vmatmul.mubr.msk.f32.vlgmr.msra.gmra.mrb[24].mxu0 %vm1017_vm1, %v6971_v0 }
 0xe2f   : > { %v6974_v5 = vpop.f32.mrb[66].mxu0 }
 0xe30   : > { %v3927_v17 = vpop.f32.mrb[67].mxu0 }
 0xe31   : > { %7020 = vmatprep.mubr.msk.f32.mxu0 %vm1017_vm1, %v3927_v17 }
 0xe32   : > { %7021 = vmatmul.mubr.msk.f32.gmra.mrb[26].mxu0 %vm1017_vm1, %v6974_v5 }
 0xe33   : > { %v6977_v54 = vpop.f32.mrb[68].mxu0 }
 0xe34   : > { %v3937_v56 = vpop.f32.mrb[69].mxu0 }
 0xe35   : > { %7023 = vmatprep.mubr.msk.f32.mxu0 %vm1017_vm1, %v3937_v56 }
 0xe36   : > { %7024 = vmatmul.mubr.msk.f32.gmra.mrb[28].mxu0 %vm1017_vm1, %v6977_v54 }
 0xe37   : > { %v6980_v25 = vpop.f32.mrb[70].mxu0 }
 0xe38   : > { %v3947_v42 = vpop.f32.mrb[71].mxu0 }
 0xe39   : > { %7026 = vmatprep.mubr.msk.f32.mxu0 %vm1017_vm1, %v3947_v42 }
 0xe3a   : > { %7027 = vmatmul.mubr.msk.f32.gmra.mrb[30].mxu0 %vm1017_vm1, %v6980_v25 }
 0xe3b   : > { %7029 = vmatprep.mubr.msk.f32.mxu0 %vm1017_vm1, %v4070_v30 }
 0xe3e   : > { %7030 = vmatmul.mubr.msk.f32.gmra.mrb[32].mxu0 %vm1017_vm1, %v6999_v49 }
 0xe3f   : > { %7032 = vmatprep.mubr.msk.f32.mxu0 %vm1017_vm1, %v4080_v34 }
 0xe42   : > { %7033 = vmatmul.mubr.msk.f32.gmra.mrb[34].mxu0 %vm1017_vm1, %v7002_v61 }
 0xe43   : > { %7035 = vmatprep.mubr.msk.f32.mxu0 %vm1017_vm1, %v4090_v29 }
 0xe46   : > { %7036 = vmatmul.mubr.msk.f32.gmra.mrb[36].mxu0 %vm1017_vm1, %v7005_v31 }
 0xe47   : > { %7038 = vmatprep.mubr.msk.f32.mxu0 %vm1017_vm1, %v4100_v14 }
 0xe4a   : > { %7039 = vmatmul.mubr.msk.f32.gmra.mrb[38].mxu0 %vm1017_vm1, %v7008_v4 }
 0xe4b   : > { %7097 = vmatprep.mubr.msk.f32.mxu0 %vm1017_vm1, %v4398_v27 }
 0xe68   : > { %v8007_v60 = vpop.permute.xlu0 %8006 }
 0xe69   : > { %v8009_v48 = vunpack.i.h.bf16 %v8007_v60  ;;  %v8008_v20 = vunpack.i.l.bf16 %v8007_v60 }
 0xe6b   : > { %v7569_v43 = vpack.c.bf16 %v8009_v48, %v8008_v20 }
 0xe6c   : > { %v8012_v28 = vpop.permute.xlu1 %8011 }
 0xe6d   : > { %v8014_v63 = vunpack.i.h.bf16 %v8012_v28  ;;  %v8013_v47 = vunpack.i.l.bf16 %v8012_v28  ;;  %7571 = vmatprep.subr.msk.bf16.mxu0 %vm9284_vm2, %v7569_v43 }
 0xe6e   : > { %7574 = vmatpush3.bf16.xpose.msk.msra.mxu0 %vm9284_vm2, %v7569_v43 }
 0xe6f   : > { %v7575_v59 = vpack.c.bf16 %v8014_v63, %v8013_v47 }
 0xe70   : > { %v8017_v3 = vpop.permute.xlu0 %8016 }
 0xe71   : > { %v8019_v26 = vunpack.i.h.bf16 %v8017_v3  ;;  %v8018_v12 = vunpack.i.l.bf16 %v8017_v3  ;;  %7577 = vmatprep.subr.msk.bf16.mxu0 %vm9284_vm2, %v7575_v59 }
 0xe73   : > { %v7581_v40 = vpack.c.bf16 %v8019_v26, %v8018_v12 }
 0xe74   : > { %v8027_v9 = vpop.permute.xlu0 %8026 }
 0xe75   : > { %v8029_v32 = vunpack.i.h.bf16 %v8027_v9  ;;  %v8028_v51 = vunpack.i.l.bf16 %v8027_v9 }
 0xe76   : > { %7580 = vmatpush3.bf16.xpose.msk.msra.mxu0 %vm9284_vm2, %v7575_v59 }
 0xe77   : > { %7583 = vmatprep.subr.msk.bf16.mxu0 %vm9284_vm2, %v7581_v40  ;;  %v7587_v31 = vpack.c.bf16 %v8029_v32, %v8028_v51 }
 0xe78   : > { %v8022_v24 = vpop.permute.xlu1 %8021 }
 0xe79   : > { %v8024_v49 = vunpack.i.h.bf16 %v8022_v24  ;;  %v8023_v30 = vunpack.i.l.bf16 %v8022_v24 }
 0xe7b   : > { %v7593_v61 = vpack.c.bf16 %v8024_v49, %v8023_v30 }
 0xe7c   : > { %v8032_v34 = vpop.permute.xlu1 %8031 }
 0xe7d   : > { %v8034_v29 = vunpack.i.h.bf16 %v8032_v34  ;;  %v8033_v4 = vunpack.i.l.bf16 %v8032_v34  ;;  %7595 = vmatprep.subr.msk.bf16.mxu1 %vm9284_vm2, %v7593_v61 }
 0xe7e   : > { %7586 = vmatpush3.bf16.xpose.msk.msra.mxu0 %vm9284_vm2, %v7581_v40  ;;  %7598 = vmatpush3.bf16.xpose.msk.msra.mxu1 %vm9284_vm2, %v7593_v61 }
 0xe7f   : > { %v7599_v14 = vpack.c.bf16 %v8034_v29, %v8033_v4  ;;  %7589 = vmatprep.subr.msk.bf16.mxu0 %vm9284_vm2, %v7587_v31 }
 0xe80   : > { %v8037_v27 = vpop.permute.xlu0 %8036 }
 0xe81   : > { %v8039_v39 = vunpack.i.h.bf16 %v8037_v27  ;;  %v8038_v58 = vunpack.i.l.bf16 %v8037_v27  ;;  %7601 = vmatprep.subr.msk.bf16.mxu1 %vm9284_vm2, %v7599_v14 }
 0xe83   : > { %v7605_v41 = vpack.c.bf16 %v8039_v39, %v8038_v58 }
 0xe84   : > { %v8047_v6 = vpop.permute.xlu0 %8046  ;;  %v8042_v37 = vpop.permute.xlu1 %8041 }
 0xe85   : > { %v8049_v46 = vunpack.i.h.bf16 %v8047_v6  ;;  %v8048_v18 = vunpack.i.l.bf16 %v8047_v6  ;;  %v8044_v0 = vunpack.i.h.bf16 %v8042_v37  ;;  %v8043_v1 = vunpack.i.l.bf16 %v8042_v37 }
 0xe86   : > { %7592 = vmatpush3.bf16.xpose.msk.msra.mxu0 %vm9284_vm2, %v7587_v31  ;;  %7604 = vmatpush3.bf16.xpose.msk.msra.mxu1 %vm9284_vm2, %v7599_v14 }
 0xe87   : > { %v7617_v38 = vpack.c.bf16 %v8049_v46, %v8048_v18  ;;  %7607 = vmatprep.subr.msk.bf16.mxu1 %vm9284_vm2, %v7605_v41  ;;  %v7611_v56 = vpack.c.bf16 %v8044_v0, %v8043_v1 }
 0xe88   : > { %v8052_v35 = vpop.permute.xlu1 %8051  ;;  %v8057_v54 = vpop.permute.xlu0 %8056 }
 0xe89   : > { %7618 = vmatprep.subr.bf16.mxu0 %v7617_v38  ;;  %v8054_v5 = vunpack.i.h.bf16 %v8052_v35  ;;  %v8053_v17 = vunpack.i.l.bf16 %v8052_v35  ;;  %v8059_v25 = vunpack.i.h.bf16 %v8057_v54  ;;  %v8058_v42 = vunpack.i.l.bf16 %v8057_v54 }
 0xe8b   : > { %v7621_v60 = vpack.c.bf16 %v8054_v5, %v8053_v17  ;;  %v7625_v48 = vpack.c.bf16 %v8059_v25, %v8058_v42 }
 0xe8d   : > { %7098 = vmatmul.mubr.msk.f32.vlgmr.msra.gmra.mrb[72].mxu0 %vm1017_vm1, %v10244_v19 }
 0xe8e   : > { %7100 = vmatprep.mubr.msk.f32.mxu0 %vm1017_vm1, %v10250_v53  ;;  %7610 = vmatpush3.bf16.xpose.msk.msra.mxu1 %vm9284_vm2, %v7605_v41 }
 0xe8f   : > { %7620 = vmatpush3.bf16.msra.mxu0 %v7617_v38  ;;  %7613 = vmatprep.subr.msk.bf16.mxu1 %vm9284_vm2, %v7611_v56 }
 0xe90   : > { %7622 = vmatprep.subr.bf16.mxu0 %v7621_v60 }
 0xe91   : > { %7101 = vmatmul.mubr.msk.f32.gmra.mrb[74].mxu0 %vm1017_vm1, %v10248_v55 }
 0xe92   : > { %7103 = vmatprep.mubr.msk.f32.mxu0 %vm1017_vm1, %v10257_v2 }
 0xe93   : > { %7624 = vmatpush3.bf16.msra.mxu0 %v7621_v60 }
 0xe94   : > { %7626 = vmatprep.subr.bf16.mxu0 %v7625_v48 }
 0xe95   : > { %7104 = vmatmul.mubr.msk.f32.gmra.mrb[76].mxu0 %vm1017_vm1, %v10255_v62 }
 0xe96   : > { %7106 = vmatprep.mubr.msk.f32.mxu0 %vm1017_vm1, %v10264_v13  ;;  %7616 = vmatpush3.bf16.xpose.msk.msra.mxu1 %vm9284_vm2, %v7611_v56 }
 0xe97   : > { %7628 = vmatpush3.bf16.msra.mxu0 %v7625_v48 }
 0xe99   : > { %7107 = vmatmul.mubr.msk.f32.gmra.mrb[78].mxu0 %vm1017_vm1, %v10262_v8 }
 0xe9d   : > { %7126 = vmatmul.mubr.msk.f32.vlgmr.msra.gmra.mrb[120].mxu1 %vm1017_vm1, %v10269_v22 }
 0xe9e   : > { %7128 = vmatprep.mubr.msk.f32.mxu1 %vm1017_vm1, %v10276_v57 }
 0xea1   : > { %7129 = vmatmul.mubr.msk.f32.gmra.mrb[122].mxu1 %vm1017_vm1, %v10274_v16 }
 0xea2   : > { %7131 = vmatprep.mubr.msk.f32.mxu1 %vm1017_vm1, %v10283_v52 }
 0xea5   : > { %7132 = vmatmul.mubr.msk.f32.gmra.mrb[124].mxu1 %vm1017_vm1, %v10281_v33 }
 0xea6   : > { %7134 = vmatprep.mubr.msk.f32.mxu1 %vm1017_vm1, %v10290_v15 }
 0xea9   : > { %7135 = vmatmul.mubr.msk.f32.gmra.mrb[126].mxu1 %vm1017_vm1, %v10288_v23 }
 0xf60   : > { %v7099_v11 = vpop.f32.mrb[72].mxu0 }
 0xf61   : > { %v4599_v19 = vpop.f32.mrb[73].mxu0  ;;  %v4802_v55 = vsel %vm360_vm0, %v7099_v11, -inf }
 0xf62   : > { %4803 = vmax.xlane.f32.xlu1 %v4802_v55  ;;  %v4799_v53 = vsel %vm360_vm0, %v4599_v19, -inf }
 0xf63   : > { %4800 = vmax.xlane.f32.xlu0 %v4799_v53 }
 0xf64   : > { %v7102_v62 = vpop.f32.mrb[74].mxu0 }
 0xf65   : > { %v4609_v2 = vpop.f32.mrb[75].mxu0  ;;  %v4808_v8 = vsel %vm360_vm0, %v7102_v62, -inf }
 0xf66   : > { %v4805_v57 = vsel %vm360_vm0, %v4609_v2, -inf }
 0xf67   : > { %4809 = vmax.xlane.f32.xlu0 %v4808_v8 }
 0xf68   : > { %v7105_v13 = vpop.f32.mrb[76].mxu0 }
 0xf69   : > { %v10381_v22 = vpop.f32.mrb[77].mxu0  ;;  %v4814_v16 = vsel %vm360_vm0, %v7105_v13, -inf }
 0xf6a   : > { %4815 = vmax.xlane.f32.xlu1 %v4814_v16  ;;  %v4811_v15 = vsel %vm360_vm0, %v10381_v22, -inf }
 0xf6b   : > { %4806 = vmax.xlane.f32.xlu0 %v4805_v57 }
 0xf6c   : > { %v7108_v33 = vpop.f32.mrb[78].mxu0 }
 0xf6d   : > { %v10385_v52 = vpop.f32.mrb[79].mxu0  ;;  %v4820_v23 = vsel %vm360_vm0, %v7108_v33, -inf }
 0xf6e   : > { %4821 = vmax.xlane.f32.xlu1 %v4820_v23  ;;  %v4817_v63 = vsel %vm360_vm0, %v10385_v52, -inf }
 0xf6f   : > { %4812 = vmax.xlane.f32.xlu0 %v4811_v15 }
 0xf70   : > { %v10390_v20 = vpop.f32.mrb[120].mxu1 }
 0xf71   : > { %v10392_v43 = vpop.f32.mrb[121].mxu1  ;;  %v4826_v28 = vsel %vm360_vm0, %v10390_v20, -inf }
 0xf72   : > { %4827 = vmax.xlane.f32.xlu1 %v4826_v28  ;;  %v4823_v26 = vsel %vm360_vm0, %v10392_v43, -inf }
 0xf73   : > { %4818 = vmax.xlane.f32.xlu0 %v4817_v63 }
 0xf74   : > { %v10398_v47 = vpop.f32.mrb[122].mxu1 }
 0xf75   : > { %v10400_v59 = vpop.f32.mrb[123].mxu1  ;;  %v4832_v3 = vsel %vm360_vm0, %v10398_v47, -inf }
 0xf76   : > { %4833 = vmax.xlane.f32.xlu1 %v4832_v3  ;;  %v4829_v24 = vsel %vm360_vm0, %v10400_v59, -inf }
 0xf77   : > { %4824 = vmax.xlane.f32.xlu0 %v4823_v26 }
 0xf78   : > { %v10406_v12 = vpop.f32.mrb[124].mxu1 }
 0xf79   : > { %v10408_v40 = vpop.f32.mrb[125].mxu1  ;;  %v4838_v9 = vsel %vm360_vm0, %v10406_v12, -inf }
 0xf7a   : > { %4839 = vmax.xlane.f32.xlu1 %v4838_v9  ;;  %v4835_v30 = vsel %vm360_vm0, %v10408_v40, -inf }
 0xf7b   : > { %4830 = vmax.xlane.f32.xlu0 %v4829_v24 }
 0xf7c   : > { %v10414_v32 = vpop.f32.mrb[126].mxu1 }
 0xf7d   : > { %v10416_v51 = vpop.f32.mrb[127].mxu1  ;;  %v4844_v49 = vsel %vm360_vm0, %v10414_v32, -inf }
 0xf7e   : > { %4845 = vmax.xlane.f32.xlu1 %v4844_v49  ;;  %v4841_v61 = vsel %vm360_vm0, %v10416_v51, -inf }
 0xf7f   : > { %4836 = vmax.xlane.f32.xlu0 %v4835_v30 }
 0xf8f   : > { %8061 = vrot.lane.b32.xlu1 %v9218_v10, %s8572_s21 }
 0xf95   : > { %8066 = vrot.lane.b32.xlu0 %v9232_v7, %s8572_s21 }
 0xfb4   : > { %4842 = vmax.xlane.f32.xlu0 %v4841_v61 }
 0xfca   : > { %8071 = vrot.lane.b32.xlu0 %v9247_v21, %s8572_s21 }
 0xfef   : > { %v4804_v34 = vpop.xlane.xlu1 %4803 }
 0xff0   : > { %v4848_v31 = vsub.f32 %v7099_v11, %v4804_v34  ;;  %v4801_v29 = vpop.xlane.xlu0 %4800 }
 0xff1   : > { %v4847_v4 = vsub.f32 %v4599_v19, %v4801_v29 }
 0xff2   : > { %v4865_v14 = vmul.f32 1.442695, %v4848_v31 }
 0xff3   : > { %v4863_v27 = vmul.f32 1.442695, %v4847_v4 }
 0xff4   : > { %8309 = vpow2.f32 %v4865_v14  ;;  %v4810_v39 = vpop.xlane.xlu0 %4809 }
 0xff5   : > { %8311 = vpow2.f32 %v4863_v27  ;;  %v4850_v10 = vsub.f32 %v7102_v62, %v4810_v39 }
 0xff7   : > { %v4869_v58 = vmul.f32 1.442695, %v4850_v10  ;;  %v4816_v6 = vpop.xlane.xlu1 %4815 }
 0xff8   : > { %v4852_v7 = vsub.f32 %v7105_v13, %v4816_v6  ;;  %v4807_v37 = vpop.xlane.xlu0 %4806 }
 0xff9   : > { %8313 = vpow2.f32 %v4869_v58  ;;  %v4849_v41 = vsub.f32 %v4609_v2, %v4807_v37 }
 0xffa   : > { %v4873_v46 = vmul.f32 1.442695, %v4852_v7 }
 0xffb   : > { %v4867_v18 = vmul.f32 1.442695, %v4849_v41  ;;  %v4822_v38 = vpop.xlane.xlu1 %4821 }
 0xffc   : > { %8315 = vpow2.f32 %v4873_v46  ;;  %v4854_v21 = vsub.f32 %v7108_v33, %v4822_v38  ;;  %v4813_v35 = vpop.xlane.xlu0 %4812 }
 0xffd   : > { %8317 = vpow2.f32 %v4867_v18  ;;  %v4851_v0 = vsub.f32 %v10381_v22, %v4813_v35 }
 0xffe   : > { %v10431_v1 = vpop.eup %8309  ;;  %v4877_v5 = vmul.f32 1.442695, %v4854_v21 }
 0xfff   : > { %v10433_v17 = vpop.eup %8311  ;;  %v4871_v54 = vmul.f32 1.442695, %v4851_v0  ;;  %v4828_v56 = vpop.xlane.xlu1 %4827  ;;  %v4898_v25 = vsel %vm360_vm0, %v10431_v1, 0.0 }
0x1000   : > { %8319 = vpow2.f32 %v4877_v5  ;;  %v4856_v42 = vsub.f32 %v10390_v20, %v4828_v56  ;;  %4899 = vadd.xlane.f32.xlu1 %v4898_v25  ;;  %v4819_v60 = vpop.xlane.xlu0 %4818  ;;  %v4895_v48 = vsel %vm360_vm0, %v10433_v17, 0.0 }
0x1001   : > { %8321 = vpow2.f32 %v4871_v54  ;;  %v4853_v11 = vsub.f32 %v10385_v52, %v4819_v60  ;;  %4896 = vadd.xlane.f32.xlu0 %v4895_v48 }
0x1002   : > { %v4881_v55 = vmul.f32 1.442695, %v4856_v42 }
0x1003   : > { %v10441_v19 = vpop.eup %8313  ;;  %v4875_v53 = vmul.f32 1.442695, %v4853_v11  ;;  %v4834_v62 = vpop.xlane.xlu1 %4833 }
0x1004   : > { %v4858_v2 = vsub.f32 %v10398_v47, %v4834_v62  ;;  %v4825_v8 = vpop.xlane.xlu0 %4824  ;;  %v4904_v13 = vsel %vm360_vm0, %v10441_v19, 0.0 }
0x1005   : > { %8323 = vpow2.f32 %v4875_v53  ;;  %v4855_v22 = vsub.f32 %v10392_v43, %v4825_v8  ;;  %4905 = vadd.xlane.f32.xlu1 %v4904_v13 }
0x1006   : > { %v10447_v16 = vpop.eup %8315  ;;  %8325 = vpow2.f32 %v4881_v55  ;;  %v4885_v33 = vmul.f32 1.442695, %v4858_v2 }
0x1007   : > { %v10449_v57 = vpop.eup %8317  ;;  %v4879_v52 = vmul.f32 1.442695, %v4855_v22  ;;  %v4840_v23 = vpop.xlane.xlu1 %4839  ;;  %v4910_v15 = vsel %vm360_vm0, %v10447_v16, 0.0  ;;  %v5283_v22 = vld [vmem:[#allocation8 + $0x68] sm:$0xff] }
0x1008   : > { %v4831_v20 = vpop.xlane.xlu0 %4830  ;;  %v4901_v28 = vsel %vm360_vm0, %v10449_v57, 0.0  ;;  %v4860_v3 = vsub.f32 %v10406_v12, %v4840_v23 }
0x1009   : > { %8327 = vpow2.f32 %v4879_v52  ;;  %v4857_v63 = vsub.f32 %v10400_v59, %v4831_v20  ;;  %4911 = vadd.xlane.f32.xlu1 %v4910_v15  ;;  %4902 = vadd.xlane.f32.xlu0 %v4901_v28 }
0x100a   : > { %v10456_v43 = vpop.eup %8319  ;;  %8329 = vpow2.f32 %v4885_v33  ;;  %v4889_v34 = vmul.f32 1.442695, %v4860_v3  ;;  %v5285_v3 = vld [vmem:[#allocation8 + $0x78] sm:$0xff] }
0x100b   : > { %v10458_v47 = vpop.eup %8321  ;;  %v4883_v26 = vmul.f32 1.442695, %v4857_v63  ;;  %v4846_v9 = vpop.xlane.xlu1 %4845  ;;  %v4916_v24 = vsel %vm360_vm0, %v10456_v43, 0.0  ;;  %v5284_v63 = vld [vmem:[#allocation8 + $0x70] sm:$0xff] }
0x100c   : > { %v4837_v49 = vpop.xlane.xlu0 %4836  ;;  %v4907_v30 = vsel %vm360_vm0, %v10458_v47, 0.0  ;;  %v4862_v31 = vsub.f32 %v10414_v32, %v4846_v9 }
0x100d   : > { %v4859_v59 = vsub.f32 %v10408_v40, %v4837_v49  ;;  %4917 = vadd.xlane.f32.xlu1 %v4916_v24  ;;  %4908 = vadd.xlane.f32.xlu0 %v4907_v30  ;;  %8331 = vpow2.f32 %v4883_v26  ;;  %v7653_v30 = vpack.c.bf16 %v5285_v3, %v5284_v63 }
0x100e   : > { %v4893_v37 = vmul.f32 1.442695, %v4862_v31 }
0x100f   : > { %v10466_v61 = vpop.eup %8323  ;;  %v4887_v12 = vmul.f32 1.442695, %v4859_v59  ;;  %v8062_v29 = vpop.permute.xlu1 %8061 }
0x1010   : > { %v8064_v4 = vunpack.i.h.bf16 %v8062_v29  ;;  %v8063_v14 = vunpack.i.l.bf16 %v8062_v29  ;;  %v8067_v27 = vpop.permute.xlu0 %8066  ;;  %v4913_v39 = vsel %vm360_vm0, %v10466_v61, 0.0  ;;  %v10471_v10 = vpop.eup %8325 }
0x1011   : > { %8333 = vpow2.f32 %v4887_v12  ;;  %v8069_v40 = vunpack.i.h.bf16 %v8067_v27  ;;  %v8068_v58 = vunpack.i.l.bf16 %v8067_v27  ;;  %4914 = vadd.xlane.f32.xlu1 %v4913_v39  ;;  %v4922_v41 = vsel %vm360_vm0, %v10471_v10, 0.0 }
0x1012   : > { %v7629_v6 = vpack.c.bf16 %v8064_v4, %v8063_v14  ;;  %8335 = vpow2.f32 %v4889_v34 }
0x1013   : > { %v10473_v7 = vpop.eup %8327  ;;  %v7633_v32 = vpack.c.bf16 %v8069_v40, %v8068_v58  ;;  %8337 = vpow2.f32 %v4893_v37 }
0x1014   : > { %7630 = vmatprep.subr.bf16.mxu0 %v7629_v6  ;;  %v4919_v46 = vsel %vm360_vm0, %v10473_v7, 0.0  ;;  %v10479_v18 = vpop.eup %8329 }
0x1015   : > { %7632 = vmatpush3.bf16.msra.mxu0 %v7629_v6  ;;  %4923 = vadd.xlane.f32.xlu1 %v4922_v41  ;;  %v4928_v38 = vsel %vm360_vm0, %v10479_v18, 0.0 }
0x1016   : > { %4920 = vadd.xlane.f32.xlu0 %v4919_v46  ;;  %7634 = vmatprep.subr.bf16.mxu1 %v7633_v32 }
0x1017   : > { %7636 = vmatpush3.bf16.msra.mxu1 %v7633_v32  ;;  %v10483_v21 = vpop.eup %8331 }
0x1018   : > { %v4925_v0 = vsel %vm360_vm0, %v10483_v21, 0.0 }
0x1019   : > { %4929 = vadd.xlane.f32.xlu1 %v4928_v38 }
0x101b   : > { %v10485_v35 = vpop.eup %8333 }
0x101c   : > { %v4931_v5 = vsel %vm360_vm0, %v10485_v35, 0.0  ;;  %v10491_v54 = vpop.eup %8335 }
0x101d   : > { %4926 = vadd.xlane.f32.xlu1 %v4925_v0  ;;  %4932 = vadd.xlane.f32.xlu0 %v4931_v5  ;;  %v4934_v56 = vsel %vm360_vm0, %v10491_v54, 0.0  ;;  %v10495_v25 = vpop.eup %8337 }
0x101e   : > { %v4940_v42 = vsel %vm360_vm0, %v10495_v25, 0.0 }
0x1021   : > { %4935 = vadd.xlane.f32.xlu1 %v4934_v56 }
0x1025   : > { %4941 = vadd.xlane.f32.xlu1 %v4940_v42 }
0x1033   : > { %8081 = vrot.lane.b32.xlu0 %v9277_v44, %s8572_s21  ;;  %v5282_v44 = vld [vmem:[#allocation8 + $0x60] sm:$0xff] }
0x1041   : > { %v4843_v60 = vpop.xlane.xlu0 %4842 }
0x1042   : > { %v4861_v48 = vsub.f32 %v10416_v51, %v4843_v60  ;;  %v7649_v51 = vpack.c.bf16 %v5283_v22, %v5282_v44 }
0x1044   : > { %v4891_v11 = vmul.f32 1.442695, %v4861_v48  ;;  %7650 = vmatprep.subr.bf16.mxu0 %v7649_v51 }
0x1045   : > { %v8072_v55 = vpop.permute.xlu0 %8071 }
0x1046   : > { %8339 = vpow2.f32 %v4891_v11  ;;  %v8074_v53 = vunpack.i.h.bf16 %v8072_v55  ;;  %v8073_v62 = vunpack.i.l.bf16 %v8072_v55 }
0x1048   : > { %v7637_v2 = vpack.c.bf16 %v8074_v53, %v8073_v62 }
0x104a   : > { %7638 = vmatprep.subr.bf16.mxu1 %v7637_v2 }
0x104b   : > { %7640 = vmatpush3.bf16.msra.mxu1 %v7637_v2 }
0x1050   : > { %v10502_v8 = vpop.eup %8339 }
0x1051   : > { %v4937_v13 = vsel %vm360_vm0, %v10502_v8, 0.0 }
0x1052   : > { %4938 = vadd.xlane.f32.xlu1 %v4937_v13 }
0x1063   : > { %8076 = vrot.lane.b32.xlu1 %v9262_v36, %s8572_s21 }
0x108d   : > { %v4900_v33 = vpop.xlane.xlu1 %4899 }
0x108e   : > { %8341 = vrcp.f32 %v4900_v33  ;;  %v4897_v52 = vpop.xlane.xlu0 %4896 }
0x108f   : > { %8343 = vrcp.f32 %v4897_v52 }
0x1092   : > { %v4906_v23 = vpop.xlane.xlu1 %4905 }
0x1093   : > { %8345 = vrcp.f32 %v4906_v23 }
0x1096   : > { %v4912_v15 = vpop.xlane.xlu1 %4911  ;;  %v4903_v20 = vpop.xlane.xlu0 %4902 }
0x1097   : > { %8347 = vrcp.f32 %v4903_v20 }
0x1098   : > { %v8342_v28 = vpop.eup %8341  ;;  %8349 = vrcp.f32 %v4912_v15 }
0x1099   : > { %v8344_v26 = vpop.eup %8343  ;;  %v4960_v49 = vmul.f32 %v8342_v28, %v10431_v1 }
0x109a   : > { %v4918_v9 = vpop.xlane.xlu1 %4917  ;;  %v4909_v24 = vpop.xlane.xlu0 %4908  ;;  %v4959_v36 = vmul.f32 %v8344_v26, %v10433_v17 }
0x109b   : > { %8351 = vrcp.f32 %v4909_v24 }
0x109c   : > { %7153 = vmatprep.mubr.msk.f32.mxu0 %vm360_vm0, %v4959_v36  ;;  %8353 = vrcp.f32 %v4918_v9 }
0x109d   : > { %7154 = vmatmul.mubr.msk.f32.vlgmr.msra.gmra.mrb[80].mxu0 %vm360_vm0, %v4960_v49  ;;  %v8346_v34 = vpop.eup %8345 }
0x109e   : > { %v4915_v59 = vpop.xlane.xlu1 %4914  ;;  %7652 = vmatpush3.bf16.msra.mxu0 %v7649_v51  ;;  %v4962_v1 = vmul.f32 %v8346_v34, %v10441_v19 }
0x109f   : > { %8355 = vrcp.f32 %v4915_v59  ;;  %7654 = vmatprep.subr.bf16.mxu0 %v7653_v30 }
0x10a1   : > { %v8348_v31 = vpop.eup %8347 }
0x10a2   : > { %7656 = vmatpush3.bf16.msra.mxu0 %v7653_v30  ;;  %v4961_v17 = vmul.f32 %v8348_v31, %v10449_v57  ;;  %v8350_v29 = vpop.eup %8349  ;;  %v8373_v30 = vld [vmem:[%s10652_s6] ss:$0 sm:$0xff] }
0x10a3   : > { %v4921_v12 = vpop.xlane.xlu0 %4920  ;;  %v4964_v39 = vmul.f32 %v8350_v29, %v10447_v16  ;;  %v825_v59 = vadd.f32 %v8373_v30, %v9147_v45  ;;  %v824_v31 = vadd.f32 %v8373_v30, %v9151_v50  ;;  %v10701_v29 = vld [vmem:[#allocation16_spill] sm:$0xff] }
0x10a4   : > { %8357 = vrcp.f32 %v4921_v12  ;;  %7156 = vmatprep.mubr.msk.f32.mxu0 %vm360_vm0, %v4961_v17 }
0x10a5   : > { %v8352_v4 = vpop.eup %8351  ;;  %7157 = vmatmul.mubr.msk.f32.gmra.mrb[82].mxu0 %vm360_vm0, %v4962_v1 }
0x10a6   : > { %v4963_v14 = vmul.f32 %v8352_v4, %v10458_v47  ;;  %v8354_v27 = vpop.eup %8353  ;;  %v4924_v47 = vpop.xlane.xlu1 %4923  ;;  %v827_v4 = vadd.f32 %v8373_v30, %v10701_v29 }
0x10a7   : > { %v4966_v19 = vmul.f32 %v8354_v27, %v10456_v43  ;;  %8359 = vrcp.f32 %v4924_v47 }
0x10a8   : > { %7159 = vmatprep.mubr.msk.f32.mxu0 %vm360_vm0, %v4963_v14  ;;  %v10702_v14 = vld [vmem:[#allocation17_spill] sm:$0xff] }
0x10a9   : > { %v8356_v40 = vpop.eup %8355  ;;  %7160 = vmatmul.mubr.msk.f32.gmra.mrb[84].mxu0 %vm360_vm0, %v4964_v39  ;;  %v826_v27 = vadd.f32 %v8373_v30, %v10702_v14 }
0x10aa   : > { %v4965_v57 = vmul.f32 %v8356_v40, %v10466_v61  ;;  %v4930_v16 = vpop.xlane.xlu1 %4929  ;;  %v4933_v41 = vpop.xlane.xlu0 %4932 }
0x10ac   : > { %7162 = vmatprep.mubr.msk.f32.mxu0 %vm360_vm0, %v4965_v57  ;;  %v10703_v57 = vld [vmem:[#allocation18_spill] sm:$0xff] }
0x10ad   : > { %7163 = vmatmul.mubr.msk.f32.gmra.mrb[86].mxu0 %vm360_vm0, %v4966_v19  ;;  %v829_v19 = vadd.f32 %v8373_v30, %v10703_v57 }
0x10ae   : > { %v8358_v58 = vpop.eup %8357  ;;  %v4927_v37 = vpop.xlane.xlu1 %4926 }
0x10af   : > { %v4967_v6 = vmul.f32 %v8358_v58, %v10473_v7  ;;  %v8082_v61 = vpop.permute.xlu0 %8081  ;;  %8361 = vrcp.f32 %v4927_v37 }
0x10b0   : > { %v8084_v5 = vunpack.i.h.bf16 %v8082_v61  ;;  %v8083_v43 = vunpack.i.l.bf16 %v8082_v61  ;;  %8363 = vrcp.f32 %v4930_v16  ;;  %v10706_v61 = vld [vmem:[#allocation21_spill] sm:$0xff] }
0x10b1   : > { %7181 = vmatprep.mubr.msk.f32.mxu1 %vm360_vm0, %v4967_v6  ;;  %8365 = vrcp.f32 %v4933_v41  ;;  %v8360_v48 = vpop.eup %8359  ;;  %v10704_v6 = vld [vmem:[#allocation19_spill] sm:$0xff]  ;;  %v10705_v41 = vld [vmem:[#allocation20_spill] sm:$0xff] }
0x10b2   : > { %v4936_v32 = vpop.xlane.xlu1 %4935  ;;  %v7645_v60 = vpack.c.bf16 %v8084_v5, %v8083_v43  ;;  %v4968_v55 = vmul.f32 %v8360_v48, %v10471_v10  ;;  %v828_v47 = vadd.f32 %v8373_v30, %v10704_v6 }
0x10b3   : > { %8367 = vrcp.f32 %v4936_v32 }
0x10b6   : > { %v4942_v46 = vpop.xlane.xlu1 %4941 }
0x10b9   : > { %v8362_v11 = vpop.eup %8361 }
0x10ba   : > { %v8364_v53 = vpop.eup %8363  ;;  %v4969_v62 = vmul.f32 %v8362_v11, %v10483_v21  ;;  %v10708_v11 = vld [vmem:[#allocation23_spill] sm:$0xff] }
0x10bb   : > { %v8366_v2 = vpop.eup %8365  ;;  %v4970_v13 = vmul.f32 %v8364_v53, %v10479_v18 }
0x10bc   : > { %v4971_v22 = vmul.f32 %v8366_v2, %v10485_v35 }
0x10bd   : > { %v8368_v44 = vpop.eup %8367 }
0x10be   : > { %v4972_v10 = vmul.f32 %v8368_v44, %v10491_v54  ;;  %v10710_v44 = vld [vmem:[#allocation25_spill] sm:$0xff] }
0x10df   : > { %v4939_v38 = vpop.xlane.xlu1 %4938 }
0x10e0   : > { %8369 = vrcp.f32 %v4939_v38 }
0x10e1   : > { %8371 = vrcp.f32 %v4942_v46  ;;  %v831_v46 = vadd.f32 %v8373_v30, %v10705_v41 }
0x10e3   : > { %v8077_v0 = vpop.permute.xlu1 %8076 }
0x10e4   : > { %v8079_v56 = vunpack.i.h.bf16 %v8077_v0  ;;  %v8078_v42 = vunpack.i.l.bf16 %v8077_v0  ;;  %v830_v0 = vadd.f32 %v8373_v30, %v10706_v61 }
0x10e6   : > { %v7641_v7 = vpack.c.bf16 %v8079_v56, %v8078_v42 }
0x10e8   : > { %7642 = vmatprep.subr.bf16.mxu1 %v7641_v7 }
0x10e9   : > { %7644 = vmatpush3.bf16.msra.mxu1 %v7641_v7  ;;  %v10707_v7 = vld [vmem:[#allocation22_spill] sm:$0xff] }
0x10ea   : > { %7646 = vmatprep.subr.bf16.mxu1 %v7645_v60  ;;  %v8370_v51 = vpop.eup %8369 }
0x10eb   : > { %v8372_v33 = vpop.eup %8371  ;;  %v4973_v21 = vmul.f32 %v8370_v51, %v10502_v8 }
0x10ec   : > { %v4974_v52 = vmul.f32 %v8372_v33, %v10495_v25 }
0x10ed   : > { %7648 = vmatpush3.bf16.msra.mxu1 %v7645_v60 }
0x10f0   : > { %7182 = vmatmul.mubr.msk.f32.vlgmr.msra.gmra.mrb[128].mxu1 %vm360_vm0, %v4968_v55 }
0x10f1   : > { %7184 = vmatprep.mubr.msk.f32.mxu1 %vm360_vm0, %v4969_v62  ;;  %v10709_v62 = vld [vmem:[#allocation24_spill] sm:$0xff] }
0x10f4   : > { %7185 = vmatmul.mubr.msk.f32.gmra.mrb[130].mxu1 %vm360_vm0, %v4970_v13 }
0x10f5   : > { %7187 = vmatprep.mubr.msk.f32.mxu1 %vm360_vm0, %v4971_v22 }
0x10f8   : > { %7188 = vmatmul.mubr.msk.f32.gmra.mrb[132].mxu1 %vm360_vm0, %v4972_v10  ;;  %v10711_v10 = vld [vmem:[#allocation26_spill] sm:$0xff] }
0x10f9   : > { %7190 = vmatprep.mubr.msk.f32.mxu1 %vm360_vm0, %v4973_v21 }
0x10fc   : > { %7191 = vmatmul.mubr.msk.f32.gmra.mrb[134].mxu1 %vm360_vm0, %v4974_v52  ;;  %v10712_v52 = vld [vmem:[#allocation27_spill] sm:$0xff] }
0x1170   : > { %v7155_v18 = vpop.f32.mrb[80].mxu0 }
0x1171   : > { %v5089_v35 = vpop.f32.mrb[81].mxu0 }
0x1172   : > { %7201 = vmatprep.mubr.msk.f32.mxu0 %vm1017_vm1, %v5089_v35 }
0x1173   : > { %7202 = vmatmul.mubr.msk.f32.vlgmr.msra.gmra.mrb[24].mxu0 %vm1017_vm1, %v7155_v18 }
0x1178   : > { %v7158_v23 = vpop.f32.mrb[82].mxu0 }
0x1179   : > { %v5099_v15 = vpop.f32.mrb[83].mxu0 }
0x117a   : > { %7204 = vmatprep.mubr.msk.f32.mxu0 %vm1017_vm1, %v5099_v15 }
0x117b   : > { %7205 = vmatmul.mubr.msk.f32.gmra.mrb[26].mxu0 %vm1017_vm1, %v7158_v23  ;;  %v10713_v23 = vld [vmem:[#allocation28_spill] sm:$0xff] }
0x117c   : > { %v7161_v54 = vpop.f32.mrb[84].mxu0 }
0x117d   : > { %v5109_v8 = vpop.f32.mrb[85].mxu0 }
0x117e   : > { %7207 = vmatprep.mubr.msk.f32.mxu0 %vm1017_vm1, %v5109_v8  ;;  %v10714_v8 = vld [vmem:[#allocation29_spill] sm:$0xff] }
0x117f   : > { %7208 = vmatmul.mubr.msk.f32.gmra.mrb[28].mxu0 %vm1017_vm1, %v7161_v54 }
0x1180   : > { %v7164_v25 = vpop.f32.mrb[86].mxu0 }
0x1181   : > { %v5119_v20 = vpop.f32.mrb[87].mxu0 }
0x1182   : > { %7210 = vmatprep.mubr.msk.f32.mxu0 %vm1017_vm1, %v5119_v20 }
0x1183   : > { %7211 = vmatmul.mubr.msk.f32.gmra.mrb[30].mxu0 %vm1017_vm1, %v7164_v25 }
0x11c3   : > { %v7183_v28 = vpop.f32.mrb[128].mxu1 }
0x11c4   : > { %v5242_v63 = vpop.f32.mrb[129].mxu1 }
0x11c5   : > { %7213 = vmatprep.mubr.msk.f32.mxu0 %vm1017_vm1, %v5242_v63 }
0x11c6   : > { %7214 = vmatmul.mubr.msk.f32.gmra.mrb[32].mxu0 %vm1017_vm1, %v7183_v28 }
0x11c7   : > { %v7186_v3 = vpop.f32.mrb[130].mxu1 }
0x11c8   : > { %v5252_v26 = vpop.f32.mrb[131].mxu1 }
0x11c9   : > { %7216 = vmatprep.mubr.msk.f32.mxu0 %vm1017_vm1, %v5252_v26 }
0x11ca   : > { %7217 = vmatmul.mubr.msk.f32.gmra.mrb[34].mxu0 %vm1017_vm1, %v7186_v3 }
0x11cb   : > { %v7189_v9 = vpop.f32.mrb[132].mxu1 }
0x11cc   : > { %v5262_v24 = vpop.f32.mrb[133].mxu1 }
0x11cd   : > { %7219 = vmatprep.mubr.msk.f32.mxu0 %vm1017_vm1, %v5262_v24 }
0x11ce   : > { %7220 = vmatmul.mubr.msk.f32.gmra.mrb[36].mxu0 %vm1017_vm1, %v7189_v9 }
0x11cf   : > { %v7192_v36 = vpop.f32.mrb[134].mxu1 }
0x11d0   : > { %v5272_v49 = vpop.f32.mrb[135].mxu1 }
0x11d1   : > { %7222 = vmatprep.mubr.msk.f32.mxu0 %vm1017_vm1, %v5272_v49 }
0x11d2   : > { %7223 = vmatmul.mubr.msk.f32.gmra.mrb[38].mxu0 %vm1017_vm1, %v7192_v36 }
0x1246   : > { %v7203_v34 = vpop.f32.mrb[24].mxu0 }
0x1247   : > { %v7657_v12 = vadd.f32 %v7203_v34, %v825_v59  ;;  %v5400_v17 = vpop.f32.mrb[25].mxu0 }
0x1248   : > { %v7658_v1 = vadd.f32 %v5400_v17, %v824_v31 }
0x1249   : > { %5496 = vst [vmem:[%s10563_s11 + $0x8] sm:$0xff] %v7657_v12 }
0x124a   : > { %5495 = vst [vmem:[%s10563_s11] sm:$0xff] %v7658_v1 }
0x124e   : > { %v7206_v45 = vpop.f32.mrb[26].mxu0 }
0x124f   : > { %v7659_v50 = vadd.f32 %v7206_v45, %v827_v4  ;;  %v5410_v39 = vpop.f32.mrb[27].mxu0 }
0x1250   : > { %v7660_v40 = vadd.f32 %v5410_v39, %v826_v27 }
0x1251   : > { %5498 = vst [vmem:[%s10563_s11 + $0x18] sm:$0xff] %v7659_v50 }
0x1252   : > { %5497 = vst [vmem:[%s10563_s11 + $0x10] sm:$0xff] %v7660_v40  ;;  %v7209_v58 = vpop.f32.mrb[28].mxu0 }
0x1253   : > { %v7661_v16 = vadd.f32 %v7209_v58, %v829_v19  ;;  %v5420_v37 = vpop.f32.mrb[29].mxu0 }
0x1254   : > { %v7662_v32 = vadd.f32 %v5420_v37, %v828_v47 }
0x1255   : > { %5500 = vst [vmem:[%s10563_s11 + $0x28] sm:$0xff] %v7661_v16 }
0x1256   : > { %5499 = vst [vmem:[%s10563_s11 + $0x20] sm:$0xff] %v7662_v32  ;;  %v7212_v38 = vpop.f32.mrb[30].mxu0 }
0x1257   : > { %v7663_v5 = vadd.f32 %v7212_v38, %v831_v46  ;;  %v5430_v43 = vpop.f32.mrb[31].mxu0 }
0x1258   : > { %v7664_v56 = vadd.f32 %v5430_v43, %v830_v0 }
0x1259   : > { %5502 = vst [vmem:[%s10563_s11 + $0x38] sm:$0xff] %v7663_v5 }
0x125a   : > { %5501 = vst [vmem:[%s10563_s11 + $0x30] sm:$0xff] %v7664_v56 }
0x1299   : > { %v7215_v42 = vpop.f32.mrb[32].mxu0 }
0x129a   : > { %v7665_v60 = vadd.f32 %v7215_v42, %v10707_v7  ;;  %v5440_v48 = vpop.f32.mrb[33].mxu0 }
0x129b   : > { %v7666_v55 = vadd.f32 %v5440_v48, %v10708_v11 }
0x129c   : > { %5504 = vst [vmem:[%s10563_s11 + $0x48] sm:$0xff] %v7665_v60 }
0x129d   : > { %5503 = vst [vmem:[%s10563_s11 + $0x40] sm:$0xff] %v7666_v55  ;;  %v7218_v53 = vpop.f32.mrb[34].mxu0 }
0x129e   : > { %v7667_v2 = vadd.f32 %v7218_v53, %v10709_v62  ;;  %v5450_v13 = vpop.f32.mrb[35].mxu0 }
0x129f   : > { %v7668_v22 = vadd.f32 %v5450_v13, %v10710_v44 }
0x12a0   : > { %5506 = vst [vmem:[%s10563_s11 + $0x58] sm:$0xff] %v7667_v2 }
0x12a1   : > { %5505 = vst [vmem:[%s10563_s11 + $0x50] sm:$0xff] %v7668_v22  ;;  %v7221_v51 = vpop.f32.mrb[36].mxu0 }
0x12a2   : > { %v7669_v33 = vadd.f32 %v7221_v51, %v10711_v10  ;;  %v5460_v21 = vpop.f32.mrb[37].mxu0 }
0x12a3   : > { %v7670_v18 = vadd.f32 %v5460_v21, %v10712_v52 }
0x12a4   : > { %5508 = vst [vmem:[%s10563_s11 + $0x68] sm:$0xff] %v7669_v33 }
0x12a5   : > { %5507 = vst [vmem:[%s10563_s11 + $0x60] sm:$0xff] %v7670_v18  ;;  %v7224_v35 = vpop.f32.mrb[38].mxu0 }
0x12a6   : > { %v7671_v15 = vadd.f32 %v7224_v35, %v10713_v23  ;;  %v5470_v54 = vpop.f32.mrb[39].mxu0 }
0x12a7   : > { %v7672_v25 = vadd.f32 %v5470_v54, %v10714_v8 }
0x12a8   : > { %5510 = vst [vmem:[%s10563_s11 + $0x78] sm:$0xff] %v7671_v15 }
0x12a9   : > { %5509 = vst [vmem:[%s10563_s11 + $0x70] sm:$0xff] %v7672_v25 }
0x12aa   : > { %8501 = shalt.err (!%p8498_p4)
}
0x12ab   : > { %s8502_s20 = scalar_lea.hbm %s10597_s13, 2048  ;;  %s8506_s29 = scalar_lea.hbm %s10653_s7, 4096 }
0x12ac   : > { %p8503_p9 = scmp.ne.s32.totalorder %s10597_s13, %s8502_s20  ;;  %p8507_p8 = scmp.lt.u32.totalorder %s10597_s13, %s10653_s7 }
0x12ad   : > { %p8508_p13 = scmp.lt.u32.totalorder %s8506_s29, %s8502_s20  ;;  %p8510_p10 = scmp.lt.u32.totalorder %s8502_s20, %s10597_s13 }
0x12ae   : > { %p8504_p0 = pnand %p8503_p9, %p8770_p5 }
0x12af   : > { %p8509_p6 = por %p8508_p13, %p8507_p8 }
0x12b0   : > { %p8505_p11 = pneg %p8504_p0 }
0x12b1   : > { %p8511_p3 = por %p8510_p10, %p8509_p6 }
0x12b3   : > { %p8512_p7 = pnand %p8511_p3, %p8505_p11 }
0x12b5   : > { %8515 = shalt.err (!%p8512_p7)
}
0x12b6   : > { %s8574_s30 = smov 128   ;;  %s8575_s9 = smov 8  }
0x12b7   : > { %7735 = dma.vmem_to_hbm [thread:$0]  (%p8770_p5), %s10599_s8, 2048, %s10597_s13, %s5512_s28, %s8574_s30, %s8574_s30, %s8575_s9  }
0x12b8 PF: > { %s10715_s15 = sld [smem:[#allocation15_spill]]  ;;  %s5541_s10 = sand.u32 1, %s8550_s24  }
0x12b9   : > { %p10717_p1 = scmp.ge.s32.totalorder %s8562_s27, 2  ;;  %s5542_s14 = scalar_lea.sflag [#allocation4], %s5541_s10 }
0x12be   : > { %p10716_p12 = scmp.ne.s32.totalorder %s10715_s15, 0 }
0x12c0   : > { %p7752_p2 = pnand %p10717_p1, %p10716_p12 }
0x12c2   : > { %8545 = dma.done.wait (!%p7752_p2), %s5542_s14, 2048  }
0x12c3   : > { %8547 = vsyncadd (!%p7752_p2), %s5542_s14, 4294965248  ;;  %p22_p4 = scmp.ge.s32.totalorder %s8756_s22, 4   ;;  %s10718_s24 = smov %s8554_s25 }
0x12c4   : > { %s10719_s25 = smov %s8558_s26  ;;  %s10720_s26 = smov %s8766_s18 }
0x12c5   : > { %s10721_s27 = smov %s8756_s22  ;;  %24 = sbr.rel (!%p22_p4) target bundleno = 7 (0x7), region = 111 }
0x12cc   :  { %5547 = vsyncpa [#allocation3], 1 }
0x12cd   :  { %5549 = vsyncpa [#allocation3 + $0x1], 1 }
0x12ce   :  { %5550 = vsyncpa [#allocation6], 1 }
0x12cf   :  { %5551 = vsyncpa [#allocation9], 1 }
0x12d0   :  { %5552 = vsyncpa [#allocation4], 1 }
0x12d1   :  { %5554 = vsyncpa [#allocation4 + $0x1], 1 }

</bundles_post_ra>
